<compile_context>
chip_gen: v7x
topology: tpu7x:2x2x1
jax: 0.10.0
libtpu: 0.0.40
codegen_flags: <defaults>
</compile_context>

<pallas_src>
import jax
import jax.numpy as jnp
from jax.experimental import pallas as pl
from jax.experimental.pallas import tpu as pltpu

EPS = 1e-5
LATENT = 1024
SLAB = 512  # output-column slab for the last matmul / fused max


def pcn_kernel(x_ref,
               w1_ref, b1_ref,
               w2_ref, b2_ref,
               w3g_ref, w3f_ref, b3_ref,
               w4_ref, b4_ref,
               o_ref):
    # x_ref: (1, B_TILE*n, 8) f32 (3 real channels zero-padded to 8)
    # o_ref: (1, B_TILE, LATENT) f32
    bt = o_ref.shape[1]
    n = x_ref.shape[1] // bt
    latent = o_ref.shape[2]

    xb = x_ref[0].astype(jnp.bfloat16)                                 # (bt*n, 8)

    # ---- first_conv: Conv1d(3->128,1) [BN folded] + ReLU + Conv1d(128->256,1)
    h = jnp.dot(xb, w1_ref[...], preferred_element_type=jnp.float32) + b1_ref[...]
    h = jnp.maximum(h, 0.0)
    f = jnp.dot(h.astype(jnp.bfloat16), w2_ref[...],
                preferred_element_type=jnp.float32) + b2_ref[...]       # (bt*n, 256)

    # ---- per-batch global max-pool over points
    fg = jnp.max(f.reshape(bt, n, f.shape[-1]), axis=1)                 # (bt, 256)

    # ---- second_conv first layer (Conv1d(512->512,1), BN folded), concat-free:
    #      [fg_bcast, f] @ w3 == fg @ w3[:256] + f @ w3[256:]
    g_term = jnp.dot(fg.astype(jnp.bfloat16), w3g_ref[...],
                     preferred_element_type=jnp.float32) + b3_ref[...]  # (bt, 512)
    h2 = jnp.dot(f.astype(jnp.bfloat16), w3f_ref[...],
                 preferred_element_type=jnp.float32)                    # (bt*n, 512)
    h2 = h2.reshape(bt, n, h2.shape[-1]) + g_term[:, None, :]
    h2 = jnp.maximum(h2, 0.0).astype(jnp.bfloat16)
    h2 = h2.reshape(bt * n, h2.shape[-1])                               # (bt*n, 512)

    # ---- Conv1d(512->1024,1) tiled over output columns, max fused per slab.
    #      Bias is hoisted past the max (max(x+b) == max(x)+b per column).
    for s in range(latent // SLAB):
        lo, hi = s * SLAB, (s + 1) * SLAB
        out_s = jnp.dot(h2, w4_ref[:, lo:hi],
                        preferred_element_type=jnp.float32)             # (bt*n, SLAB)
        out_s = jnp.max(out_s.reshape(bt, n, SLAB), axis=1)             # (bt, SLAB)
        o_ref[0, :, lo:hi] = out_s + b4_ref[:, lo:hi]


def prepare_params(params):
    """Fold eval-mode BN into conv weights/biases, split w3, cast weights to bf16."""
    (w1, b1, g1, be1, rm1, rv1,
     w2, b2,
     w3, b3, g2, be2, rm2, rv2,
     w4, b4) = params

    s1 = g1 * jax.lax.rsqrt(rv1 + EPS)                    # (1, 128)
    w1f = (w1 * s1).astype(jnp.bfloat16)                  # (8, 128)
    b1f = (b1 - rm1) * s1 + be1                           # (1, 128) f32

    s2 = g2 * jax.lax.rsqrt(rv2 + EPS)                    # (1, 512)
    w3_fold = w3 * s2                                     # (512, 512)
    b3f = (b3 - rm2) * s2 + be2                           # (1, 512) f32
    w3g = w3_fold[:256].astype(jnp.bfloat16)              # rows hit by the global feature
    w3l = w3_fold[256:].astype(jnp.bfloat16)              # rows hit by the per-point feature

    return (w1f, b1f,
            w2.astype(jnp.bfloat16), b2,
            w3g, w3l, b3f,
            w4.astype(jnp.bfloat16), b4)


def pcn_forward(x, params, *, b_tile=2):
    """x: (bs, n, 3) float32 -> (bs, LATENT) float32."""
    bs, n, c = x.shape
    assert c == 3
    (w1f, b1f, w2b, b2, w3g, w3l, b3f, w4b, b4) = prepare_params(params)

    # Pad batch up to a multiple of b_tile and group b_tile batches per grid step.
    g = -(-bs // b_tile)
    pad_b = g * b_tile - bs
    x_pad = jnp.pad(x, ((0, pad_b), (0, 0), (0, 5)))       # channels 3 -> 8 (zero rows in w1)
    x_grp = x_pad.reshape(g, b_tile * n, 8)

    full = lambda a: pl.BlockSpec(a.shape, lambda i: (0,) * a.ndim)

    out = pl.pallas_call(
        pcn_kernel,
        out_shape=jax.ShapeDtypeStruct((g, b_tile, LATENT), jnp.float32),
        grid_spec=pltpu.PrefetchScalarGridSpec(
            num_scalar_prefetch=0,
            grid=(g,),
            in_specs=[
                pl.BlockSpec((1, b_tile * n, 8), lambda i: (i, 0, 0)),   # x
                full(w1f), full(b1f),
                full(w2b), full(b2),
                full(w3g), full(w3l), full(b3f),
                full(w4b), full(b4),
            ],
            out_specs=pl.BlockSpec((1, b_tile, LATENT), lambda i: (i, 0, 0)),
        ),
        compiler_params=pltpu.CompilerParams(dimension_semantics=("parallel",)),
    )(x_grp, w1f, b1f, w2b, b2, w3g, w3l, b3f, w4b, b4)
    return out.reshape(g * b_tile, LATENT)[:bs]


def make_params(key):
    ks = jax.random.split(key, 8)
    f32 = jnp.float32
    # Conv1d weights (PyTorch shape (Cout, Cin, 1)) stored transposed as (Cin, Cout).
    w1 = jax.random.normal(ks[0], (3, 128), f32) * 0.05
    w1 = jnp.pad(w1, ((0, 5), (0, 0)))                     # pad Cin 3 -> 8 with zeros
    b1 = jax.random.normal(ks[1], (1, 128), f32) * 0.05
    # BatchNorm1d(128) default init: gamma=1, beta=0, running_mean=0, running_var=1
    g1, be1 = jnp.ones((1, 128), f32), jnp.zeros((1, 128), f32)
    rm1, rv1 = jnp.zeros((1, 128), f32), jnp.ones((1, 128), f32)

    w2 = jax.random.normal(ks[2], (128, 256), f32) * 0.05
    b2 = jax.random.normal(ks[3], (1, 256), f32) * 0.05

    w3 = jax.random.normal(ks[4], (512, 512), f32) * 0.05
    b3 = jax.random.normal(ks[5], (1, 512), f32) * 0.05
    g2, be2 = jnp.ones((1, 512), f32), jnp.zeros((1, 512), f32)
    rm2, rv2 = jnp.zeros((1, 512), f32), jnp.ones((1, 512), f32)

    w4 = jax.random.normal(ks[6], (512, LATENT), f32) * 0.05
    b4 = jax.random.normal(ks[7], (1, LATENT), f32) * 0.05

    return (w1, b1, g1, be1, rm1, rv1, w2, b2,
            w3, b3, g2, be2, rm2, rv2, w4, b4)


def pcn_reference_prepared(x, prep):
    """Pure-JAX reference with the SAME numerics as the kernel (folded BN, bf16
    weights, f32 accumulation) but the naive concat/bias-before-max structure."""
    (w1f, b1f, w2b, b2, w3g, w3l, b3f, w4b, b4) = prep
    bf16, f32 = jnp.bfloat16, jnp.float32
    x_pad = jnp.pad(x, ((0, 0), (0, 0), (0, 5))).astype(bf16)
    h = jnp.einsum('bnc,cd->bnd', x_pad, w1f, preferred_element_type=f32) + b1f
    h = jnp.maximum(h, 0.0)
    f = jnp.einsum('bnc,cd->bnd', h.astype(bf16), w2b, preferred_element_type=f32) + b2
    fg = jnp.max(f, axis=1, keepdims=True)
    feat = jnp.concatenate([jnp.broadcast_to(fg, f.shape), f], axis=-1)
    w3_full = jnp.concatenate([w3g, w3l], axis=0)
    h2 = jnp.einsum('bnc,cd->bnd', feat.astype(bf16), w3_full,
                    preferred_element_type=f32) + b3f
    h2 = jnp.maximum(h2, 0.0)
    out = jnp.einsum('bnc,cd->bnd', h2.astype(bf16), w4b,
                     preferred_element_type=f32) + b4
    return jnp.max(out, axis=1)


def pcn_reference_f32(x, params):
    """Full-precision reference mirroring the PyTorch forward (eval-mode BN)."""
    (w1, b1, g1, be1, rm1, rv1, w2, b2,
     w3, b3, g2, be2, rm2, rv2, w4, b4) = params
    x_pad = jnp.pad(x, ((0, 0), (0, 0), (0, 5)))
    h = x_pad @ w1 + b1
    h = (h - rm1) * jax.lax.rsqrt(rv1 + EPS) * g1 + be1
    h = jnp.maximum(h, 0.0)
    f = h @ w2 + b2
    fg = jnp.max(f, axis=1, keepdims=True)
    feat = jnp.concatenate([jnp.broadcast_to(fg, f.shape), f], axis=-1)
    h2 = feat @ w3 + b3
    h2 = (h2 - rm2) * jax.lax.rsqrt(rv2 + EPS) * g2 + be2
    h2 = jnp.maximum(h2, 0.0)
    out = h2 @ w4 + b4
    return jnp.max(out, axis=1)


if __name__ == "__main__":
    key = jax.random.PRNGKey(0)
    kx, kp = jax.random.split(key)

    bs, n = 4, 128
    x = jax.random.normal(kx, (bs, n, 3), jnp.float32)     # point cloud (B, N, 3)
    params = make_params(kp)

    y = jax.block_until_ready(pcn_forward(x, params))
    assert y.shape == (bs, LATENT), y.shape

    # Tight check: kernel vs. same-numerics JAX reference (validates the w3 split,
    # BN folding into the fed params, bias hoist, slab tiling and batching).
    y_tight = jax.block_until_ready(pcn_reference_prepared(x, prepare_params(params)))
    assert jnp.allclose(y, y_tight, atol=1e-3, rtol=1e-3), \
        float(jnp.max(jnp.abs(y - y_tight)))

    # Loose check: kernel vs. full-f32 eval-mode PyTorch-equivalent forward
    # (bounds the bf16-weight approximation).
    y_f32 = jax.block_until_ready(pcn_reference_f32(x, params))
    assert jnp.allclose(y, y_f32, atol=5e-2, rtol=5e-2), \
        float(jnp.max(jnp.abs(y - y_f32)))

    print("KERNEL_OK")
</pallas_src>

<mosaic_0001>
module attributes {stable_mosaic.version = 11 : i64} {
  func.func @pcn_kernel(%arg0: i32, %arg1: memref<1x256x8xf32, #tpu.memory_space<vmem>>, %arg2: memref<8x128xbf16, #tpu.memory_space<vmem>>, %arg3: memref<1x128xf32, #tpu.memory_space<vmem>>, %arg4: memref<128x256xbf16, #tpu.memory_space<vmem>>, %arg5: memref<1x256xf32, #tpu.memory_space<vmem>>, %arg6: memref<256x512xbf16, #tpu.memory_space<vmem>>, %arg7: memref<256x512xbf16, #tpu.memory_space<vmem>>, %arg8: memref<1x512xf32, #tpu.memory_space<vmem>>, %arg9: memref<512x1024xbf16, #tpu.memory_space<vmem>>, %arg10: memref<1x1024xf32, #tpu.memory_space<vmem>>, %arg11: memref<1x2x1024xf32, #tpu.memory_space<vmem>>) attributes {dimension_semantics = [#tpu.dimension_semantics<parallel>], iteration_bounds = array<i64: 2>, scalar_prefetch = 0 : i64, scratch_operands = 0 : i64, tpu.core_type = #tpu.core_type<tc>, window_params = [{transform_indices = @transform_0, window_bounds = array<i64: 1, 256, 8>}, {pipeline_mode = #tpu.pipeline_mode<synchronous>, transform_indices = @transform_1, window_bounds = array<i64: 8, 128>}, {pipeline_mode = #tpu.pipeline_mode<synchronous>, transform_indices = @transform_2, window_bounds = array<i64: 1, 128>}, {pipeline_mode = #tpu.pipeline_mode<synchronous>, transform_indices = @transform_3, window_bounds = array<i64: 128, 256>}, {pipeline_mode = #tpu.pipeline_mode<synchronous>, transform_indices = @transform_4, window_bounds = array<i64: 1, 256>}, {pipeline_mode = #tpu.pipeline_mode<synchronous>, transform_indices = @transform_5, window_bounds = array<i64: 256, 512>}, {pipeline_mode = #tpu.pipeline_mode<synchronous>, transform_indices = @transform_6, window_bounds = array<i64: 256, 512>}, {pipeline_mode = #tpu.pipeline_mode<synchronous>, transform_indices = @transform_7, window_bounds = array<i64: 1, 512>}, {pipeline_mode = #tpu.pipeline_mode<synchronous>, transform_indices = @transform_8, window_bounds = array<i64: 512, 1024>}, {pipeline_mode = #tpu.pipeline_mode<synchronous>, transform_indices = @transform_9, window_bounds = array<i64: 1, 1024>}, {transform_indices = @transform_10, window_bounds = array<i64: 1, 2, 1024>}]} {
    %c0 = arith.constant 0 : index
    %c0_0 = arith.constant 0 : index
    %c0_1 = arith.constant 0 : index
    %0 = vector.load %arg1[%c0, %c0_0, %c0_1] : memref<1x256x8xf32, #tpu.memory_space<vmem>>, vector<1x256x8xf32>
    %1 = vector.shape_cast %0 : vector<1x256x8xf32> to vector<256x8xf32>
    %2 = arith.truncf %1 : vector<256x8xf32> to vector<256x8xbf16>
    %c0_2 = arith.constant 0 : index
    %c0_3 = arith.constant 0 : index
    %3 = vector.load %arg2[%c0_2, %c0_3] : memref<8x128xbf16, #tpu.memory_space<vmem>>, vector<8x128xbf16>
    %cst = arith.constant dense<0.000000e+00> : vector<256x128xf32>
    %4 = tpu.matmul %2, %3, %cst {dimension_numbers = #tpu.dot_dimension_numbers<[1], [0], [0], [1], [0, 0, 1, 1], [], []>} : vector<256x8xbf16>, vector<8x128xbf16>, vector<256x128xf32> -> vector<256x128xf32>
    %c0_4 = arith.constant 0 : index
    %c0_5 = arith.constant 0 : index
    %5 = vector.load %arg3[%c0_4, %c0_5] : memref<1x128xf32, #tpu.memory_space<vmem>>, vector<1x128xf32>
    %6 = vector.broadcast %5 : vector<1x128xf32> to vector<256x128xf32>
    %7 = arith.addf %4, %6 : vector<256x128xf32>
    %cst_6 = arith.constant 0.000000e+00 : f32
    %8 = vector.broadcast %cst_6 : f32 to vector<256x128xf32>
    %9 = arith.maximumf %7, %8 : vector<256x128xf32>
    %10 = arith.truncf %9 : vector<256x128xf32> to vector<256x128xbf16>
    %c0_7 = arith.constant 0 : index
    %c0_8 = arith.constant 0 : index
    %11 = vector.load %arg4[%c0_7, %c0_8] : memref<128x256xbf16, #tpu.memory_space<vmem>>, vector<128x256xbf16>
    %cst_9 = arith.constant dense<0.000000e+00> : vector<256x256xf32>
    %12 = tpu.matmul %10, %11, %cst_9 {dimension_numbers = #tpu.dot_dimension_numbers<[1], [0], [0], [1], [0, 0, 1, 1], [], []>} : vector<256x128xbf16>, vector<128x256xbf16>, vector<256x256xf32> -> vector<256x256xf32>
    %c0_10 = arith.constant 0 : index
    %c0_11 = arith.constant 0 : index
    %13 = vector.load %arg5[%c0_10, %c0_11] : memref<1x256xf32, #tpu.memory_space<vmem>>, vector<1x256xf32>
    %14 = vector.broadcast %13 : vector<1x256xf32> to vector<256x256xf32>
    %15 = arith.addf %12, %14 : vector<256x256xf32>
    %16 = vector.shape_cast %15 : vector<256x256xf32> to vector<2x128x256xf32>
    %cst_12 = arith.constant dense<0xFF800000> : vector<2x256xf32>
    %17 = vector.multi_reduction <maximumf>, %16, %cst_12 [1] : vector<2x128x256xf32> to vector<2x256xf32>
    %18 = arith.truncf %17 : vector<2x256xf32> to vector<2x256xbf16>
    %c0_13 = arith.constant 0 : index
    %c0_14 = arith.constant 0 : index
    %19 = vector.load %arg6[%c0_13, %c0_14] : memref<256x512xbf16, #tpu.memory_space<vmem>>, vector<256x512xbf16>
    %cst_15 = arith.constant dense<0.000000e+00> : vector<2x512xf32>
    %20 = tpu.matmul %18, %19, %cst_15 {dimension_numbers = #tpu.dot_dimension_numbers<[1], [0], [0], [1], [0, 0, 1, 1], [], []>} : vector<2x256xbf16>, vector<256x512xbf16>, vector<2x512xf32> -> vector<2x512xf32>
    %c0_16 = arith.constant 0 : index
    %c0_17 = arith.constant 0 : index
    %21 = vector.load %arg8[%c0_16, %c0_17] : memref<1x512xf32, #tpu.memory_space<vmem>>, vector<1x512xf32>
    %22 = vector.broadcast %21 : vector<1x512xf32> to vector<2x512xf32>
    %23 = arith.addf %20, %22 : vector<2x512xf32>
    %24 = arith.truncf %15 : vector<256x256xf32> to vector<256x256xbf16>
    %c0_18 = arith.constant 0 : index
    %c0_19 = arith.constant 0 : index
    %25 = vector.load %arg7[%c0_18, %c0_19] : memref<256x512xbf16, #tpu.memory_space<vmem>>, vector<256x512xbf16>
    %cst_20 = arith.constant dense<0.000000e+00> : vector<256x512xf32>
    %26 = tpu.matmul %24, %25, %cst_20 {dimension_numbers = #tpu.dot_dimension_numbers<[1], [0], [0], [1], [0, 0, 1, 1], [], []>} : vector<256x256xbf16>, vector<256x512xbf16>, vector<256x512xf32> -> vector<256x512xf32>
    %27 = vector.shape_cast %26 : vector<256x512xf32> to vector<2x128x512xf32>
    %28 = vector.shape_cast %23 : vector<2x512xf32> to vector<2x1x512xf32>
    %29 = vector.broadcast %28 : vector<2x1x512xf32> to vector<2x128x512xf32>
    %30 = arith.addf %27, %29 : vector<2x128x512xf32>
    %cst_21 = arith.constant 0.000000e+00 : f32
    %31 = vector.broadcast %cst_21 : f32 to vector<2x128x512xf32>
    %32 = arith.maximumf %30, %31 : vector<2x128x512xf32>
    %33 = arith.truncf %32 : vector<2x128x512xf32> to vector<2x128x512xbf16>
    %34 = vector.shape_cast %33 : vector<2x128x512xbf16> to vector<256x512xbf16>
    %c0_22 = arith.constant 0 : index
    %c0_23 = arith.constant 0 : index
    %35 = vector.load %arg9[%c0_22, %c0_23] : memref<512x1024xbf16, #tpu.memory_space<vmem>>, vector<512x512xbf16>
    %cst_24 = arith.constant dense<0.000000e+00> : vector<256x512xf32>
    %36 = tpu.matmul %34, %35, %cst_24 {dimension_numbers = #tpu.dot_dimension_numbers<[1], [0], [0], [1], [0, 0, 1, 1], [], []>} : vector<256x512xbf16>, vector<512x512xbf16>, vector<256x512xf32> -> vector<256x512xf32>
    %37 = vector.shape_cast %36 : vector<256x512xf32> to vector<2x128x512xf32>
    %cst_25 = arith.constant dense<0xFF800000> : vector<2x512xf32>
    %38 = vector.multi_reduction <maximumf>, %37, %cst_25 [1] : vector<2x128x512xf32> to vector<2x512xf32>
    %c0_26 = arith.constant 0 : index
    %c0_27 = arith.constant 0 : index
    %39 = vector.load %arg10[%c0_26, %c0_27] : memref<1x1024xf32, #tpu.memory_space<vmem>>, vector<1x512xf32>
    %40 = vector.broadcast %39 : vector<1x512xf32> to vector<2x512xf32>
    %41 = arith.addf %38, %40 : vector<2x512xf32>
    %c0_28 = arith.constant 0 : index
    %c0_29 = arith.constant 0 : index
    %c0_30 = arith.constant 0 : index
    %42 = vector.load %arg11[%c0_28, %c0_29, %c0_30] : memref<1x2x1024xf32, #tpu.memory_space<vmem>>, vector<1x2x512xf32>
    %43 = vector.shape_cast %42 : vector<1x2x512xf32> to vector<2x512xf32>
    %44 = vector.shape_cast %41 : vector<2x512xf32> to vector<1x2x512xf32>
    tpu.vector_store %arg11[%c0_28, %c0_29, %c0_30], %44 {strides = array<i32>} : memref<1x2x1024xf32, #tpu.memory_space<vmem>>, vector<1x2x512xf32>,
    %c0_31 = arith.constant 0 : index
    %c512 = arith.constant 512 : index
    %45 = vector.load %arg9[%c0_31, %c512] : memref<512x1024xbf16, #tpu.memory_space<vmem>>, vector<512x512xbf16>
    %cst_32 = arith.constant dense<0.000000e+00> : vector<256x512xf32>
    %46 = tpu.matmul %34, %45, %cst_32 {dimension_numbers = #tpu.dot_dimension_numbers<[1], [0], [0], [1], [0, 0, 1, 1], [], []>} : vector<256x512xbf16>, vector<512x512xbf16>, vector<256x512xf32> -> vector<256x512xf32>
    %47 = vector.shape_cast %46 : vector<256x512xf32> to vector<2x128x512xf32>
    %cst_33 = arith.constant dense<0xFF800000> : vector<2x512xf32>
    %48 = vector.multi_reduction <maximumf>, %47, %cst_33 [1] : vector<2x128x512xf32> to vector<2x512xf32>
    %c0_34 = arith.constant 0 : index
    %c512_35 = arith.constant 512 : index
    %49 = vector.load %arg10[%c0_34, %c512_35] : memref<1x1024xf32, #tpu.memory_space<vmem>>, vector<1x512xf32>
    %50 = vector.broadcast %49 : vector<1x512xf32> to vector<2x512xf32>
    %51 = arith.addf %48, %50 : vector<2x512xf32>
    %c0_36 = arith.constant 0 : index
    %c0_37 = arith.constant 0 : index
    %c512_38 = arith.constant 512 : index
    %52 = vector.load %arg11[%c0_36, %c0_37, %c512_38] : memref<1x2x1024xf32, #tpu.memory_space<vmem>>, vector<1x2x512xf32>
    %53 = vector.shape_cast %52 : vector<1x2x512xf32> to vector<2x512xf32>
    %54 = vector.shape_cast %51 : vector<2x512xf32> to vector<1x2x512xf32>
    tpu.vector_store %arg11[%c0_36, %c0_37, %c512_38], %54 {strides = array<i32>} : memref<1x2x1024xf32, #tpu.memory_space<vmem>>, vector<1x2x512xf32>,
    return
  }
  func.func @transform_0(%arg0: i32) -> (i32, i32, i32) {
    %c0_i32 = arith.constant 0 : i32
    %c0_i32_0 = arith.constant 0 : i32
    %c0_i32_1 = arith.constant 0 : i32
    return %arg0, %c0_i32, %c0_i32_0 : i32, i32, i32
  }
  func.func @transform_1(%arg0: i32) -> (i32, i32) {
    %c0_i32 = arith.constant 0 : i32
    %c0_i32_0 = arith.constant 0 : i32
    %c0_i32_1 = arith.constant 0 : i32
    return %c0_i32, %c0_i32_0 : i32, i32
  }
  func.func @transform_2(%arg0: i32) -> (i32, i32) {
    %c0_i32 = arith.constant 0 : i32
    %c0_i32_0 = arith.constant 0 : i32
    %c0_i32_1 = arith.constant 0 : i32
    return %c0_i32, %c0_i32_0 : i32, i32
  }
  func.func @transform_3(%arg0: i32) -> (i32, i32) {
    %c0_i32 = arith.constant 0 : i32
    %c0_i32_0 = arith.constant 0 : i32
    %c0_i32_1 = arith.constant 0 : i32
    return %c0_i32, %c0_i32_0 : i32, i32
  }
  func.func @transform_4(%arg0: i32) -> (i32, i32) {
    %c0_i32 = arith.constant 0 : i32
    %c0_i32_0 = arith.constant 0 : i32
    %c0_i32_1 = arith.constant 0 : i32
    return %c0_i32, %c0_i32_0 : i32, i32
  }
  func.func @transform_5(%arg0: i32) -> (i32, i32) {
    %c0_i32 = arith.constant 0 : i32
    %c0_i32_0 = arith.constant 0 : i32
    %c0_i32_1 = arith.constant 0 : i32
    return %c0_i32, %c0_i32_0 : i32, i32
  }
  func.func @transform_6(%arg0: i32) -> (i32, i32) {
    %c0_i32 = arith.constant 0 : i32
    %c0_i32_0 = arith.constant 0 : i32
    %c0_i32_1 = arith.constant 0 : i32
    return %c0_i32, %c0_i32_0 : i32, i32
  }
  func.func @transform_7(%arg0: i32) -> (i32, i32) {
    %c0_i32 = arith.constant 0 : i32
    %c0_i32_0 = arith.constant 0 : i32
    %c0_i32_1 = arith.constant 0 : i32
    return %c0_i32, %c0_i32_0 : i32, i32
  }
  func.func @transform_8(%arg0: i32) -> (i32, i32) {
    %c0_i32 = arith.constant 0 : i32
    %c0_i32_0 = arith.constant 0 : i32
    %c0_i32_1 = arith.constant 0 : i32
    return %c0_i32, %c0_i32_0 : i32, i32
  }
  func.func @transform_9(%arg0: i32) -> (i32, i32) {
    %c0_i32 = arith.constant 0 : i32
    %c0_i32_0 = arith.constant 0 : i32
    %c0_i32_1 = arith.constant 0 : i32
    return %c0_i32, %c0_i32_0 : i32, i32
  }
  func.func @transform_10(%arg0: i32) -> (i32, i32, i32) {
    %c0_i32 = arith.constant 0 : i32
    %c0_i32_0 = arith.constant 0 : i32
    %c0_i32_1 = arith.constant 0 : i32
    return %arg0, %c0_i32, %c0_i32_0 : i32, i32, i32
  }
}

</mosaic_0001>

<bundles_post_ra>
// kernel: tpu_custom_call.1
= control target key start
LH: loop header
LB: loop body
LE: loop exit
PB: predicated region body
PF: predicated region fallthrough
CT: control target
= control target key end

     0   :  { %s9794_s0 = inlined_call_operand.vmem [shape: f32[2,256,8], index: 0, kind: input, shape index: {}]   ;;  %s9795_s1 = inlined_call_operand.vmem [shape: bf16[8,128], index: 1, kind: input, shape index: {}]   ;;  %s9796_s2 = inlined_call_operand.vmem [shape: f32[1,128], index: 2, kind: input, shape index: {}]   ;;  %s9797_s3 = inlined_call_operand.hbm [shape: bf16[128,256], index: 3, kind: input, shape index: {}]   ;;  %s9798_s4 = inlined_call_operand.vmem [shape: f32[1,256], index: 4, kind: input, shape index: {}]   ;;  %s9799_s5 = inlined_call_operand.vmem [shape: bf16[256,512], index: 5, kind: input, shape index: {}]   ;;  %s9800_s6 = inlined_call_operand.hbm [shape: bf16[256,512], index: 6, kind: input, shape index: {}]   ;;  %s9801_s7 = inlined_call_operand.vmem [shape: f32[1,512], index: 7, kind: input, shape index: {}]   ;;  %s9802_s8 = inlined_call_operand.hbm [shape: bf16[512,1024], index: 8, kind: input, shape index: {}]   ;;  %s9803_s9 = inlined_call_operand.vmem [shape: f32[1,1024], index: 9, kind: input, shape index: {}]   ;;  %s9804_s10 = inlined_call_operand.hbm [shape: f32[2,2,1024], index: 10, kind: output, shape index: {}]  }
   0x1   :  { %9933 = sst [smem:[#allocation77_spill]] %s9800_s6 }
   0x2   :  { %15 = vsyncpa [#allocation3], 0 }
   0x3   :  { %16 = vsyncpa [#allocation6], 0 }
   0x4   :  { %17 = vsyncpa [#allocation4], 0 }
   0x5   :  { %19 = vsyncpa [#allocation4 + $0x1], 0  ;;  %s7795_s13 = smov 0   ;;  %s7797_s14 = smov 0  }
   0x6   :  { %s7799_s15 = smov 0   ;;  %s7801_s16 = smov 0  }
   0x7 LB: > { %9934 = sst [smem:[#allocation12_spill]] %s7713_s13  ;;  %s7816_s17 = sadd.s32 4294967295, %s7725_s16   ;;  %s7725_s16 = sphi %s7801_s16, %s10222_s16   ;;  %s7721_s15 = sphi %s7799_s15, %s10227_s15   ;;  %s7717_s14 = sphi %s7797_s14, %s10226_s14   ;;  %s7713_s13 = sphi %s7795_s13, %s10225_s13  }
   0x8   : > { %9935 = sst [smem:[#allocation13_spill]] %s7721_s15  ;;  %s6499_s18 = sadd.s32 4294967294, %s7725_s16  }
   0x9   : > { %s7820_s19 = sadd.s32 1, %s7725_s16   ;;  %s247_s20 = sadd.s32 1, %s7721_s15 }
   0xa   : > { %9936 = sst [smem:[#allocation14_spill]] %s7820_s19  ;;  %s244_s21 = ssub.s32 %s7725_s16, %s7820_s19 }
   0xb   : > { %p257_p0 = scmp.ne.s32.totalorder %s7721_s15, %s7717_s14  ;;  %p245_p1 = scmp.eq.s32.totalorder %s244_s21, 0 }
   0xc   : > { %p258_p2 = scmp.eq.s32.totalorder %s7816_s17, 1  ;;  %p263_p3 = scmp.ne.s32.totalorder %s7717_s14, %s7713_s13 }
   0xd   : > { %p264_p4 = scmp.eq.s32.totalorder %s6499_s18, 1  ;;  %p6500_p7 = scmp.ge.s32.totalorder %s7725_s16, 1 }
   0xe   : > { %s7831_s22 = scalar_select %p245_p1, %s7721_s15, %s247_s20  }
   0xf   : > { %p7833_p5 = por %p258_p2, %p257_p0  ;;  %p7837_p6 = por %p264_p4, %p263_p3 }
  0x10   : > { %9937 = sst [smem:[#allocation15_spill]] %s7831_s22  ;;  %p271_p8 = scmp.lt.s32.totalorder %s7725_s16, 3 }
  0x11   : > { %s9938_s23 = scalar_select %p7833_p5, 1, 0 }
  0x12   : > { %s9939_s24 = scalar_select %p7837_p6, 1, 0 }
  0x13   : > { %p9805_p9 = scmp.eq.s32.totalorder %s7816_s17, 0  ;;  %p7844_p10 = pnand %p6500_p7, %p271_p8 }
  0x14   : > { %9940 = sst [smem:[#allocation16_spill]] %s9939_s24  ;;  %s7727_s26 = smov [#allocation5]  }
  0x15   : > { %s9941_s25 = scalar_select %p7844_p10, 1, 0 }
  0x16   : > { %s308_s27 = sshll.u32 %s7727_s26, 4  ;;  %p7290_p11 = pneg %p7844_p10  ;;  %s309_s27 = int_to_ptr.vmem [resolvable:$true] %s308_s27 }
  0x17   : > { %s7728_s29 = smov [#allocation2]   ;;  %s9943_s6 = sld [smem:[#allocation77_spill]] }
  0x18   : > { %p7852_p12 = pnand %p9805_p9, %p7290_p11  ;;  %s289_s30 = sshll.u32 %s7728_s29, 4  ;;  %s7856_s30 = int_to_ptr.vmem [resolvable:$true] %s289_s30 }
  0x1a   : > { %p7866_p0 = pneg %p7852_p12 }
  0x1d   : > { %s7571_s18 = scalar_lea.hbm %s9943_s6, 8192 }
  0x1e   : > { %p7572_p13 = scmp.ne.s32.totalorder %s9943_s6, %s7571_s18  ;;  %p7578_p3 = scmp.lt.u32.totalorder %s7571_s18, %s9943_s6 }
  0x20   : > { %p7574_p1 = pnand %p7866_p0, %p7572_p13 }
  0x22   : > { %p7575_p2 = pneg %p7574_p1 }
  0x24   : > { %p7580_p4 = pnand %p7578_p3, %p7575_p2 }
  0x26   : > { %7583 = shalt.err (!%p7580_p4)
}
  0x27   : > { %s7584_s11 = scalar_lea.vmem %s309_s27, 8192  ;;  %p7592_p9 = scmp.lt.s32.totalorder %s309_s27, %s309_s27 }
  0x28   : > { %p7585_p7 = scmp.ne.s32.totalorder %s309_s27, %s7584_s11  ;;  %p7593_p6 = scmp.lt.s32.totalorder %s7584_s11, %s7584_s11 }
  0x2a   : > { %p7587_p8 = pnand %p7585_p7, %p7866_p0  ;;  %p7594_p5 = por %p7593_p6, %p7592_p9 }
  0x2c   : > { %p7588_p11 = pneg %p7587_p8 }
  0x2e   : > { %p7595_p10 = pnand %p7594_p5, %p7588_p11 }
  0x30   : > { %7598 = shalt.err (!%p7595_p10)
}
  0x31   : > { %s7729_s12 = smov 256   ;;  %s7730_s20 = smov 16  }
  0x32   : > { %7296 = dma.hbm_to_vmem [thread:$0]  (!%p7852_p12), %s9943_s6, 8192, %s309_s27, [#allocation6], %s7729_s12, %s7729_s12, %s7730_s20  }
  0x33   : > { %s7599_s15 = scalar_lea.hbm %s9797_s3, 2048 }
  0x34   : > { %p7600_p13 = scmp.ne.s32.totalorder %s9797_s3, %s7599_s15  ;;  %p7606_p9 = scmp.lt.u32.totalorder %s7599_s15, %s9797_s3 }
  0x36   : > { %p7602_p5 = pnand %p7600_p13, %p7866_p0 }
  0x38   : > { %p7603_p6 = pneg %p7602_p5 }
  0x3a   : > { %p7608_p10 = pnand %p7606_p9, %p7603_p6 }
  0x3c   : > { %7611 = shalt.err (!%p7608_p10)
}
  0x3d   : > { %s7612_s27 = scalar_lea.vmem %s7856_s30, 2048  ;;  %p7620_p4 = scmp.lt.s32.totalorder %s7856_s30, %s7856_s30 }
  0x3e   : > { %p7613_p1 = scmp.ne.s32.totalorder %s7856_s30, %s7612_s27  ;;  %p7621_p7 = scmp.lt.s32.totalorder %s7612_s27, %s7612_s27 }
  0x40   : > { %p7615_p2 = pnand %p7613_p1, %p7866_p0  ;;  %p7622_p8 = por %p7621_p7, %p7620_p4 }
  0x42   : > { %p7616_p3 = pneg %p7615_p2 }
  0x44   : > { %p7623_p11 = pnand %p7622_p8, %p7616_p3 }
  0x46   : > { %7626 = shalt.err (!%p7623_p11)
}
  0x47   : > { %s7731_s19 = smov 128   ;;  %s7732_s13 = smov 8  }
  0x48   : > { %7293 = dma.hbm_to_vmem [thread:$0]  (!%p7852_p12), %s9797_s3, 2048, %s7856_s30, [#allocation3], %s7731_s19, %s7731_s19, %s7732_s13  }
  0x49   : > { %s7733_s12 = smov [#allocation7]   ;;  %s7627_s21 = scalar_lea.hbm %s9802_s8, 32768 }
  0x4a   : > { %s324_s20 = sshll.u32 %s7733_s12, 4  ;;  %p7628_p13 = scmp.ne.s32.totalorder %s9802_s8, %s7627_s21  ;;  %s325_s20 = int_to_ptr.vmem [resolvable:$true] %s324_s20 }
  0x4b   : > { %p7634_p9 = scmp.lt.u32.totalorder %s7627_s21, %s9802_s8 }
  0x4c   : > { %p7630_p5 = pnand %p7628_p13, %p7866_p0 }
  0x4e   : > { %p7631_p6 = pneg %p7630_p5 }
  0x50   : > { %p7636_p10 = pnand %p7634_p9, %p7631_p6 }
  0x52   : > { %7639 = shalt.err (!%p7636_p10)
}
  0x53   : > { %s7640_s30 = scalar_lea.vmem %s325_s20, 32768  ;;  %p7648_p4 = scmp.lt.s32.totalorder %s325_s20, %s325_s20 }
  0x54   : > { %p7641_p1 = scmp.ne.s32.totalorder %s325_s20, %s7640_s30  ;;  %p7649_p7 = scmp.lt.s32.totalorder %s7640_s30, %s7640_s30 }
  0x56   : > { %p7643_p2 = pnand %p7641_p1, %p7866_p0  ;;  %p7650_p8 = por %p7649_p7, %p7648_p4 }
  0x58   : > { %p7644_p3 = pneg %p7643_p2 }
  0x5a   : > { %p7651_p11 = pnand %p7650_p8, %p7644_p3 }
  0x5c   : > { %7654 = shalt.err (!%p7651_p11)
}
  0x5d   : > { %s7734_s19 = smov 512   ;;  %s7735_s13 = smov 32  }
  0x5e   : > { %7299 = dma.hbm_to_vmem [thread:$0]  (!%p7852_p12), %s9802_s8, 32768, %s325_s20, [#allocation6], %s7734_s19, %s7734_s19, %s7735_s13  }
  0x5f   : > { %p9945_p13 = scmp.ne.s32.totalorder %s9941_s25, 0 }
  0x61   : > { %351 = sbr.rel (%p9945_p13) target bundleno = 1781 (0x6f5), region = 60 }
  0x68   : > { %p9946_p5 = scmp.eq.s32.totalorder %s7816_s17, 0 }
  0x6a   : > { %7700 = dma.done.wait (%p9946_p5), [#allocation3], 2048   ;;  %p9947_p0 = pmov %p9946_p5 }
  0x6c   : > { %7702 = vsyncadd (%p9947_p0), [#allocation3], 4294965248  ;;  %p9948_p6 = pmov %p9947_p0 }
  0x6d   : > { %p9949_p9 = pmov %p9947_p0 }
  0x6e   : > { %7704 = dma.done.wait (%p9948_p6), [#allocation6], 40960  }
  0x6f   : > { %7706 = vsyncadd (%p9949_p9), [#allocation6], 4294926336  ;;  %p397_p10 = scmp.lt.s32.totalorder %s7816_s17, 1  ;;  %vm508_vm0 = vcmask 1043456   ;;  %v451_v0 = vld [vmem:[%s9795_s1] sm:$0xf] }
  0x70   : > { %vm459_vm1 = vcmask 64512   ;;  %7275 = vmatprep.subr.msk.bf16.mxu0 %vm508_vm0, %v451_v0  ;;  %v510_v3 = vsel %vm508_vm0, %v451_v0, 0  ;;  %v7355_v17 = vld [vmem:[#allocation2 + $0x4] ss:$8 sps:$4 sm:$0xff]   ;;  %v7357_v20 = vld [vmem:[#allocation2] ss:$8 sps:$4 sm:$0xff]  }
  0x71   : > { %s398_s28 = scalar_select %p397_p10, %s7816_s17, 1  ;;  %6954 = vmatpush3.bf16.msra.mxu0 %v510_v3  ;;  %829 = vmatprep.subr.bf16.mxu1 %v7355_v17  ;;  %v7358_v22 = vld [vmem:[#allocation2 + $0x14] ss:$8 sps:$4 sm:$0xff]   ;;  %v7360_v24 = vld [vmem:[#allocation2 + $0x10] ss:$8 sps:$4 sm:$0xff]   ;;  %vm1204_vm2 = vcmask 1041409  }
  0x72   : > { %830 = vmatpush1.bf16.msra.mxu1 %v7357_v20  ;;  %v7361_v25 = vld [vmem:[#allocation2 + $0x24] ss:$8 sps:$4 sm:$0xff]   ;;  %v7363_v28 = vld [vmem:[#allocation2 + $0x20] ss:$8 sps:$4 sm:$0xff]   ;;  %v7364_v29 = vld [vmem:[#allocation2 + $0x34] ss:$8 sps:$4 sm:$0xff]  }
  0x73   : > { %s6934_s26 = sshll.u32 %s398_s28, 8  ;;  %831 = vmatprep.subr.bf16.mxu1 %v7358_v22  ;;  %v7366_v32 = vld [vmem:[#allocation2 + $0x30] ss:$8 sps:$4 sm:$0xff]   ;;  %v7367_v35 = vld [vmem:[#allocation2 + $0x44] ss:$8 sps:$4 sm:$0xff]   ;;  %s394_s18 = sand.u32 1, %s7717_s14  }
  0x74   : > { %s7938_s12 = scalar_lea.vmem %s9794_s0, %s6934_s26  ;;  %v7369_v36 = vld [vmem:[#allocation2 + $0x40] ss:$8 sps:$4 sm:$0xff]   ;;  %v7370_v38 = vld [vmem:[#allocation2 + $0x54] ss:$8 sps:$4 sm:$0xff]   ;;  %v7372_v42 = vld [vmem:[#allocation2 + $0x50] ss:$8 sps:$4 sm:$0xff]  }
  0x75   : > { %v403_v1 = vld [vmem:[%s7938_s12] sm:$0xff]  ;;  %v404_v2 = vld [vmem:[%s7938_s12 + $0x8] sm:$0xff]  ;;  %v405_v5 = vld [vmem:[%s7938_s12 + $0x10] sm:$0xff]  ;;  %s6509_s21 = sshll.u32 %s394_s18, 4  ;;  %vm4597_vm3 = vcmask 1043459   ;;  %vm4599_vm4 = vcmask 1045509  }
  0x76   : > { %v435_v4 = vpack.c.bf16 %v404_v2, %v403_v1  ;;  %v406_v6 = vld [vmem:[%s7938_s12 + $0x18] sm:$0xff]  ;;  %v407_v7 = vld [vmem:[%s7938_s12 + $0x20] sm:$0xff]  ;;  %v408_v9 = vld [vmem:[%s7938_s12 + $0x28] sm:$0xff]  ;;  %832 = vmatpush1.bf16.msra.mxu1 %v7360_v24  ;;  %v7736_v2 = vmov 0   ;;  %vm4601_vm5 = vcmask 1047559   ;;  %s9679_s29 = scalar_lea.vmem [#allocation8], %s6509_s21 }
  0x77   : > { %v436_v8 = vpack.c.bf16 %v406_v6, %v405_v5  ;;  %v437_v10 = vpack.c.bf16 %v408_v9, %v407_v7  ;;  %v409_v11 = vld [vmem:[%s7938_s12 + $0x30] sm:$0xff]  ;;  %v410_v12 = vld [vmem:[%s7938_s12 + $0x38] sm:$0xff]  ;;  %v411_v13 = vld [vmem:[%s7938_s12 + $0x40] sm:$0xff]  ;;  %833 = vmatprep.subr.bf16.mxu1 %v7361_v25  ;;  %861 = vmatprep.mubr.bf16.mxu1 %v7736_v2  ;;  %s6935_s30 = sshll.u32 %s7816_s17, 8  ;;  %s6409_s19 = sshll.u32 %s9679_s29, 4  ;;  %s9750_s19 = int_to_ptr.vmem [resolvable:$true] %s6409_s19 }
  0x78   : > { %6955 = vmatprep.mubr.msk.bf16.mxu0 %vm459_vm1, %v435_v4  ;;  %v412_v14 = vld [vmem:[%s7938_s12 + $0x48] sm:$0xff]  ;;  %v438_v15 = vpack.c.bf16 %v410_v12, %v409_v11  ;;  %v413_v18 = vld [vmem:[%s7938_s12 + $0x50] sm:$0xff]  ;;  %v414_v19 = vld [vmem:[%s7938_s12 + $0x58] sm:$0xff]  ;;  %s9748_s6 = scalar_lea.hbm %s9804_s10, %s6935_s30  ;;  %s6395_s17 = scalar_lea.sflag [#allocation4], %s394_s18 }
  0x79   : > { %6956 = vmatmul.mubr.msk.bf16.vlgmr.msra.gmra.mrb[0].mxu0 %vm459_vm1, %v436_v8  ;;  %v439_v16 = vpack.c.bf16 %v412_v14, %v411_v13  ;;  %v415_v21 = vld [vmem:[%s7938_s12 + $0x60] sm:$0xff]  ;;  %v416_v23 = vld [vmem:[%s7938_s12 + $0x68] sm:$0xff]  ;;  %v440_v26 = vpack.c.bf16 %v414_v19, %v413_v18  ;;  %v417_v30 = vld [vmem:[%s7938_s12 + $0x70] sm:$0xff]  ;;  %s7655_s28 = scalar_lea.vmem %s9750_s19, 256  ;;  %p10218_p1 = scmp.ne.s32.totalorder %s9938_s23, 0 }
  0x7a   : > { %6959 = vmatprep.mubr.msk.bf16.mxu0 %vm459_vm1, %v437_v10  ;;  %v441_v27 = vpack.c.bf16 %v416_v23, %v415_v21  ;;  %v418_v31 = vld [vmem:[%s7938_s12 + $0x78] sm:$0xff]  ;;  %v419_v33 = vld [vmem:[%s7938_s12 + $0x80] sm:$0xff]  ;;  %v420_v34 = vld [vmem:[%s7938_s12 + $0x88] sm:$0xff]  ;;  %834 = vmatpush1.bf16.msra.mxu1 %v7363_v28  ;;  %p7656_p12 = scmp.ne.s32.totalorder %s9750_s19, %s7655_s28  ;;  %s7739_s26 = smov [#allocation8]  }
  0x7b   : > { %835 = vmatprep.subr.bf16.mxu1 %v7364_v29  ;;  %v442_v37 = vpack.c.bf16 %v418_v31, %v417_v30  ;;  %v443_v39 = vpack.c.bf16 %v420_v34, %v419_v33  ;;  %v421_v40 = vld [vmem:[%s7938_s12 + $0x90] sm:$0xff]  ;;  %v422_v41 = vld [vmem:[%s7938_s12 + $0x98] sm:$0xff]  ;;  %v423_v43 = vld [vmem:[%s7938_s12 + $0xa0] sm:$0xff]  ;;  %s7659_s25 = sshll.u32 %s7739_s26, 4  ;;  %s7660_s25 = int_to_ptr.vmem [resolvable:$false] %s7659_s25 }
  0x7c   : > { %v424_v44 = vld [vmem:[%s7938_s12 + $0xa8] sm:$0xff]  ;;  %v444_v45 = vpack.c.bf16 %v422_v41, %v421_v40  ;;  %v425_v47 = vld [vmem:[%s7938_s12 + $0xb0] sm:$0xff]  ;;  %v426_v48 = vld [vmem:[%s7938_s12 + $0xb8] sm:$0xff]  ;;  %p7657_p2 = pnand %p7656_p12, %p10218_p1  ;;  %s7661_s24 = scalar_lea.vmem %s7660_s25, 512 }
  0x7d   : > { %v445_v46 = vpack.c.bf16 %v424_v44, %v423_v43  ;;  %v427_v49 = vld [vmem:[%s7938_s12 + $0xc0] sm:$0xff]  ;;  %v428_v50 = vld [vmem:[%s7938_s12 + $0xc8] sm:$0xff]  ;;  %v446_v51 = vpack.c.bf16 %v426_v48, %v425_v47  ;;  %v429_v53 = vld [vmem:[%s7938_s12 + $0xd0] sm:$0xff]  ;;  %p7662_p4 = scmp.lt.s32.totalorder %s9750_s19, %s7660_s25  ;;  %p7663_p7 = scmp.lt.s32.totalorder %s7661_s24, %s7655_s28 }
  0x7e   : > { %836 = vmatpush1.bf16.msra.mxu1 %v7366_v32  ;;  %v447_v52 = vpack.c.bf16 %v428_v50, %v427_v49  ;;  %v430_v54 = vld [vmem:[%s7938_s12 + $0xd8] sm:$0xff]  ;;  %v431_v55 = vld [vmem:[%s7938_s12 + $0xe0] sm:$0xff]  ;;  %v432_v56 = vld [vmem:[%s7938_s12 + $0xe8] sm:$0xff]  ;;  %p7658_p3 = pneg %p7657_p2 }
  0x7f   : > { %837 = vmatprep.subr.bf16.mxu1 %v7367_v35  ;;  %v448_v57 = vpack.c.bf16 %v430_v54, %v429_v53  ;;  %v449_v58 = vpack.c.bf16 %v432_v56, %v431_v55  ;;  %v433_v59 = vld [vmem:[%s7938_s12 + $0xf0] sm:$0xff]  ;;  %v434_v60 = vld [vmem:[%s7938_s12 + $0xf8] sm:$0xff]  ;;  %v7373_v62 = vld [vmem:[#allocation2 + $0x64] ss:$8 sps:$4 sm:$0xff]   ;;  %p7664_p8 = por %p7663_p7, %p7662_p4 }
  0x80   : > { %v450_v61 = vpack.c.bf16 %v434_v60, %v433_v59  ;;  %v7375_v63 = vld [vmem:[#allocation2 + $0x60] ss:$8 sps:$4 sm:$0xff]   ;;  %v7376_v0 = vld [vmem:[#allocation2 + $0x74] ss:$8 sps:$4 sm:$0xff]   ;;  %v7378_v1 = vld [vmem:[#allocation2 + $0x70] ss:$8 sps:$4 sm:$0xff]  }
  0x81   : > { %6960 = vmatmul.mubr.msk.bf16.gmra.mrb[4].mxu0 %vm459_vm1, %v438_v15  ;;  %v7995_v3 = vld [vmem:[%s9796_s2] ss:$0 sm:$0xff]  ;;  %v7381_v9 = vld [vmem:[#allocation5 + $0x4] ss:$16 sps:$4 sm:$0xff]   ;;  %p7665_p11 = pnand %p7664_p8, %p7658_p3 }
  0x82   : > { %6963 = vmatprep.mubr.msk.bf16.mxu0 %vm459_vm1, %v439_v16  ;;  %838 = vmatpush1.bf16.msra.mxu1 %v7369_v36  ;;  %v7379_v18 = vld [vmem:[#allocation5] ss:$16 sps:$4 sm:$0xff]   ;;  %v7384_v21 = vld [vmem:[#allocation5 + $0x24] ss:$16 sps:$4 sm:$0xff]  }
  0x83   : > { %839 = vmatprep.subr.bf16.mxu1 %v7370_v38  ;;  %v7382_v29 = vld [vmem:[#allocation5 + $0x20] ss:$16 sps:$4 sm:$0xff]   ;;  %v7387_v32 = vld [vmem:[#allocation5 + $0x44] ss:$16 sps:$4 sm:$0xff]  }
  0x84   : > { %v7385_v36 = vld [vmem:[#allocation5 + $0x40] ss:$16 sps:$4 sm:$0xff]   ;;  %v7393_v50 = vld [vmem:[#allocation5 + $0x84] ss:$16 sps:$4 sm:$0xff]  }
  0x85   : > { %v7388_v47 = vld [vmem:[#allocation5 + $0x60] ss:$16 sps:$4 sm:$0xff]  }
  0x86   : > { %840 = vmatpush1.bf16.msra.mxu1 %v7372_v42  ;;  %v7391_v54 = vld [vmem:[#allocation5 + $0x80] ss:$16 sps:$4 sm:$0xff]  }
  0x87   : > { %841 = vmatprep.subr.bf16.mxu1 %v7373_v62 }
  0x89   : > { %6964 = vmatmul.mubr.msk.bf16.gmra.mrb[8].mxu0 %vm459_vm1, %v440_v26 }
  0x8a   : > { %6967 = vmatprep.mubr.msk.bf16.mxu0 %vm459_vm1, %v441_v27  ;;  %842 = vmatpush1.bf16.msra.mxu1 %v7375_v63 }
  0x8b   : > { %843 = vmatprep.subr.bf16.mxu1 %v7376_v0 }
  0x8e   : > { %844 = vmatpush1.bf16.msra.mxu1 %v7378_v1  ;;  %v7394_v1 = vld [vmem:[#allocation5 + $0xa0] ss:$16 sps:$4 sm:$0xff]  }
  0x8f   : > { %2029 = vmatprep.subr.bf16.mxu1 %v7381_v9 }
  0x91   : > { %6968 = vmatmul.mubr.msk.bf16.gmra.mrb[12].mxu0 %vm459_vm1, %v442_v37 }
  0x92   : > { %6971 = vmatprep.mubr.msk.bf16.mxu0 %vm459_vm1, %v443_v39  ;;  %v7390_v39 = vld [vmem:[#allocation5 + $0x64] ss:$16 sps:$4 sm:$0xff]  }
  0x99   : > { %6972 = vmatmul.mubr.msk.bf16.gmra.mrb[16].mxu0 %vm459_vm1, %v444_v45 }
  0x9a   : > { %6975 = vmatprep.mubr.msk.bf16.mxu0 %vm459_vm1, %v445_v46 }
  0xa1   : > { %6976 = vmatmul.mubr.msk.bf16.gmra.mrb[20].mxu0 %vm459_vm1, %v446_v51 }
  0xa2   : > { %6979 = vmatprep.mubr.msk.bf16.mxu0 %vm459_vm1, %v447_v52 }
  0xa9   : > { %6980 = vmatmul.mubr.msk.bf16.gmra.mrb[24].mxu0 %vm459_vm1, %v448_v57  ;;  %v7396_v57 = vld [vmem:[#allocation5 + $0xa4] ss:$16 sps:$4 sm:$0xff]  }
  0xaa   : > { %6983 = vmatprep.mubr.msk.bf16.mxu0 %vm459_vm1, %v449_v58 }
  0xb1   : > { %6984 = vmatmul.mubr.msk.bf16.gmra.mrb[28].mxu0 %vm459_vm1, %v450_v61 }
 0x14c   : > { %v6957_v4 = vpop.f32.mrb[0].mxu0 }
 0x14d   : > { %v555_v5 = vadd.f32 %v6957_v4, %v7995_v3  ;;  %v546_v6 = vpop.f32.mrb[1].mxu0 }
 0x14e   : > { %v547_v7 = vadd.f32 %v7995_v3, %v546_v6  ;;  %v6958_v8 = vpop.f32.mrb[2].mxu0  ;;  %v7399_v6 = vld [vmem:[#allocation5 + $0xc4] ss:$16 sps:$4 sm:$0xff]  }
 0x14f   : > { %v558_v10 = vadd.f32 %v6958_v8, %v7995_v3  ;;  %v549_v11 = vpop.f32.mrb[3].mxu0  ;;  %v675_v13 = vmax.f32 %v555_v5, 0.0 }
 0x150   : > { %v550_v12 = vadd.f32 %v7995_v3, %v549_v11  ;;  %v673_v15 = vmax.f32 %v547_v7, 0.0 }
 0x151   : > { %v676_v14 = vmax.f32 %v558_v10, 0.0  ;;  %v7397_v10 = vld [vmem:[#allocation5 + $0xc0] ss:$16 sps:$4 sm:$0xff]  }
 0x152   : > { %v674_v16 = vmax.f32 %v550_v12, 0.0 }
 0x153   : > { %v706_v17 = vpack.c.bf16 %v676_v14, %v675_v13  ;;  %v7402_v13 = vld [vmem:[#allocation5 + $0xe4] ss:$16 sps:$4 sm:$0xff]  }
 0x154   : > { %v705_v19 = vpack.c.bf16 %v674_v16, %v673_v15  ;;  %v6961_v20 = vpop.f32.mrb[4].mxu0 }
 0x155   : > { %v571_v22 = vadd.f32 %v6961_v20, %v7995_v3  ;;  %v562_v23 = vpop.f32.mrb[5].mxu0 }
 0x156   : > { %862 = vmatmul.mubr.bf16.vlgmr.msra.gmra.mrb[0].mxu1 %v705_v19  ;;  %v563_v24 = vadd.f32 %v7995_v3, %v562_v23  ;;  %v6962_v25 = vpop.f32.mrb[6].mxu0 }
 0x157   : > { %v679_v26 = vmax.f32 %v571_v22, 0.0  ;;  %v574_v27 = vadd.f32 %v6962_v25, %v7995_v3  ;;  %v565_v28 = vpop.f32.mrb[7].mxu0  ;;  %871 = vmatprep.mubr.bf16.mxu1 %v7736_v2  ;;  %2030 = vmatpush1.bf16.msra.mxu1 %v7379_v18 }
 0x158   : > { %v677_v30 = vmax.f32 %v563_v24, 0.0  ;;  %v566_v31 = vadd.f32 %v7995_v3, %v565_v28  ;;  %2031 = vmatprep.subr.bf16.mxu1 %v7384_v21  ;;  %v7400_v21 = vld [vmem:[#allocation5 + $0xe0] ss:$16 sps:$4 sm:$0xff]   ;;  %v7405_v24 = vld [vmem:[#allocation5 + $0x104] ss:$16 sps:$4 sm:$0xff]  }
 0x159   : > { %v680_v33 = vmax.f32 %v574_v27, 0.0  ;;  %v7403_v28 = vld [vmem:[#allocation5 + $0x100] ss:$16 sps:$4 sm:$0xff]  }
 0x15a   : > { %v678_v34 = vmax.f32 %v566_v31, 0.0  ;;  %v7408_v31 = vld [vmem:[#allocation5 + $0x124] ss:$16 sps:$4 sm:$0xff]  }
 0x15b   : > { %v708_v35 = vpack.c.bf16 %v680_v33, %v679_v26  ;;  %2032 = vmatpush1.bf16.msra.mxu1 %v7382_v29 }
 0x15c   : > { %v707_v37 = vpack.c.bf16 %v678_v34, %v677_v30  ;;  %v6965_v38 = vpop.f32.mrb[8].mxu0  ;;  %2033 = vmatprep.subr.bf16.mxu1 %v7387_v32 }
 0x15d   : > { %v587_v40 = vadd.f32 %v6965_v38, %v7995_v3  ;;  %v578_v41 = vpop.f32.mrb[9].mxu0 }
 0x15e   : > { %872 = vmatmul.mubr.bf16.gmra.mrb[4].mxu1 %v706_v17  ;;  %v579_v42 = vadd.f32 %v7995_v3, %v578_v41  ;;  %v6966_v43 = vpop.f32.mrb[10].mxu0 }
 0x15f   : > { %881 = vmatprep.mubr.bf16.mxu1 %v7736_v2  ;;  %v683_v44 = vmax.f32 %v587_v40, 0.0  ;;  %v590_v45 = vadd.f32 %v6966_v43, %v7995_v3  ;;  %v581_v46 = vpop.f32.mrb[11].mxu0  ;;  %2034 = vmatpush1.bf16.msra.mxu1 %v7385_v36 }
 0x160   : > { %v681_v48 = vmax.f32 %v579_v42, 0.0  ;;  %v582_v49 = vadd.f32 %v7995_v3, %v581_v46  ;;  %2035 = vmatprep.subr.bf16.mxu1 %v7390_v39  ;;  %v7406_v39 = vld [vmem:[#allocation5 + $0x120] ss:$16 sps:$4 sm:$0xff]   ;;  %v7411_v42 = vld [vmem:[#allocation5 + $0x144] ss:$16 sps:$4 sm:$0xff]  }
 0x161   : > { %v684_v51 = vmax.f32 %v590_v45, 0.0  ;;  %v7409_v46 = vld [vmem:[#allocation5 + $0x140] ss:$16 sps:$4 sm:$0xff]  }
 0x162   : > { %v682_v52 = vmax.f32 %v582_v49, 0.0  ;;  %v7414_v49 = vld [vmem:[#allocation5 + $0x164] ss:$16 sps:$4 sm:$0xff]  }
 0x163   : > { %v8011_v53 = vpack.c.bf16 %v684_v51, %v683_v44  ;;  %2036 = vmatpush1.bf16.msra.mxu1 %v7388_v47 }
 0x164   : > { %v709_v55 = vpack.c.bf16 %v682_v52, %v681_v48  ;;  %v6969_v56 = vpop.f32.mrb[12].mxu0  ;;  %2037 = vmatprep.subr.bf16.mxu1 %v7393_v50 }
 0x165   : > { %v603_v58 = vadd.f32 %v6969_v56, %v7995_v3  ;;  %v594_v59 = vpop.f32.mrb[13].mxu0 }
 0x166   : > { %882 = vmatmul.mubr.bf16.gmra.mrb[8].mxu1 %v707_v37  ;;  %v595_v60 = vadd.f32 %v7995_v3, %v594_v59  ;;  %v6970_v61 = vpop.f32.mrb[14].mxu0 }
 0x167   : > { %891 = vmatprep.mubr.bf16.mxu1 %v7736_v2  ;;  %v687_v62 = vmax.f32 %v603_v58, 0.0  ;;  %v606_v63 = vadd.f32 %v6970_v61, %v7995_v3  ;;  %v597_v0 = vpop.f32.mrb[15].mxu0  ;;  %2038 = vmatpush1.bf16.msra.mxu1 %v7391_v54  ;;  %v7412_v58 = vld [vmem:[#allocation5 + $0x160] ss:$16 sps:$4 sm:$0xff]   ;;  %v7417_v61 = vld [vmem:[#allocation5 + $0x184] ss:$16 sps:$4 sm:$0xff]  }
 0x168   : > { %v685_v4 = vmax.f32 %v595_v60, 0.0  ;;  %v598_v5 = vadd.f32 %v7995_v3, %v597_v0  ;;  %2039 = vmatprep.subr.bf16.mxu1 %v7396_v57 }
 0x169   : > { %v688_v7 = vmax.f32 %v606_v63, 0.0 }
 0x16a   : > { %v686_v8 = vmax.f32 %v598_v5, 0.0  ;;  %v7420_v5 = vld [vmem:[#allocation5 + $0x1a4] ss:$16 sps:$4 sm:$0xff]  }
 0x16b   : > { %v8018_v9 = vpack.c.bf16 %v688_v7, %v687_v62  ;;  %2040 = vmatpush1.bf16.msra.mxu1 %v7394_v1 }
 0x16c   : > { %v8020_v11 = vpack.c.bf16 %v686_v8, %v685_v4  ;;  %v6973_v12 = vpop.f32.mrb[16].mxu0  ;;  %2041 = vmatprep.subr.bf16.mxu1 %v7399_v6 }
 0x16d   : > { %v619_v14 = vadd.f32 %v6973_v12, %v7995_v3  ;;  %v610_v15 = vpop.f32.mrb[17].mxu0 }
 0x16e   : > { %892 = vmatmul.mubr.bf16.gmra.mrb[12].mxu1 %v708_v35  ;;  %v611_v16 = vadd.f32 %v7995_v3, %v610_v15  ;;  %v6974_v17 = vpop.f32.mrb[18].mxu0  ;;  %v7418_v15 = vld [vmem:[#allocation5 + $0x1a0] ss:$16 sps:$4 sm:$0xff]  }
 0x16f   : > { %901 = vmatprep.mubr.bf16.mxu1 %v7736_v2  ;;  %v691_v18 = vmax.f32 %v619_v14, 0.0  ;;  %v622_v19 = vadd.f32 %v6974_v17, %v7995_v3  ;;  %v613_v20 = vpop.f32.mrb[19].mxu0  ;;  %2042 = vmatpush1.bf16.msra.mxu1 %v7397_v10 }
 0x170   : > { %v689_v22 = vmax.f32 %v611_v16, 0.0  ;;  %v614_v23 = vadd.f32 %v7995_v3, %v613_v20  ;;  %2043 = vmatprep.subr.bf16.mxu1 %v7402_v13 }
 0x171   : > { %v692_v25 = vmax.f32 %v622_v19, 0.0 }
 0x172   : > { %v690_v26 = vmax.f32 %v614_v23, 0.0  ;;  %v7424_v23 = vld [vmem:[#allocation5 + $0x1e0] ss:$16 sps:$4 sm:$0xff]  }
 0x173   : > { %v8027_v27 = vpack.c.bf16 %v692_v25, %v691_v18  ;;  %2044 = vmatpush1.bf16.msra.mxu1 %v7400_v21  ;;  %v7421_v21 = vld [vmem:[#allocation5 + $0x1c0] ss:$16 sps:$4 sm:$0xff]   ;;  %v7432_v25 = vld [vmem:[%s9799_s5 + $0x24] ss:$16 sps:$4 sm:$0xff]  }
 0x174   : > { %v8029_v29 = vpack.c.bf16 %v690_v26, %v689_v22  ;;  %v6977_v30 = vpop.f32.mrb[20].mxu0  ;;  %2045 = vmatprep.subr.bf16.mxu1 %v7405_v24  ;;  %v7426_v22 = vld [vmem:[#allocation5 + $0x1e4] ss:$16 sps:$4 sm:$0xff]   ;;  %v7427_v24 = vld [vmem:[%s9799_s5] ss:$16 sps:$4 sm:$0xff]  }
 0x175   : > { %v635_v32 = vadd.f32 %v6977_v30, %v7995_v3  ;;  %v626_v33 = vpop.f32.mrb[21].mxu0  ;;  %v7430_v26 = vld [vmem:[%s9799_s5 + $0x20] ss:$16 sps:$4 sm:$0xff]   ;;  %v7441_v30 = vld [vmem:[%s9799_s5 + $0x84] ss:$16 sps:$4 sm:$0xff]  }
 0x176   : > { %902 = vmatmul.mubr.bf16.gmra.mrb[16].mxu1 %v709_v55  ;;  %v627_v34 = vadd.f32 %v7995_v3, %v626_v33  ;;  %v6978_v35 = vpop.f32.mrb[22].mxu0  ;;  %v7442_v33 = vld [vmem:[%s9799_s5 + $0xa0] ss:$16 sps:$4 sm:$0xff]  }
 0x177   : > { %911 = vmatprep.mubr.bf16.mxu1 %v7736_v2  ;;  %v695_v36 = vmax.f32 %v635_v32, 0.0  ;;  %v638_v37 = vadd.f32 %v6978_v35, %v7995_v3  ;;  %v629_v38 = vpop.f32.mrb[23].mxu0  ;;  %2046 = vmatpush1.bf16.msra.mxu1 %v7403_v28  ;;  %v7438_v28 = vld [vmem:[%s9799_s5 + $0x64] ss:$16 sps:$4 sm:$0xff]   ;;  %v7445_v35 = vld [vmem:[%s9799_s5 + $0xc0] ss:$16 sps:$4 sm:$0xff]  }
 0x178   : > { %v693_v40 = vmax.f32 %v627_v34, 0.0  ;;  %v630_v41 = vadd.f32 %v7995_v3, %v629_v38  ;;  %2047 = vmatprep.subr.bf16.mxu1 %v7408_v31  ;;  %v7439_v31 = vld [vmem:[%s9799_s5 + $0x80] ss:$16 sps:$4 sm:$0xff]   ;;  %v7444_v32 = vld [vmem:[%s9799_s5 + $0xa4] ss:$16 sps:$4 sm:$0xff]  }
 0x179   : > { %v696_v43 = vmax.f32 %v638_v37, 0.0  ;;  %v7447_v34 = vld [vmem:[%s9799_s5 + $0xc4] ss:$16 sps:$4 sm:$0xff]   ;;  %v7448_v37 = vld [vmem:[%s9799_s5 + $0xe0] ss:$16 sps:$4 sm:$0xff]  }
 0x17a   : > { %v694_v44 = vmax.f32 %v630_v41, 0.0  ;;  %v7453_v38 = vld [vmem:[%s9799_s5 + $0x104] ss:$16 sps:$4 sm:$0xff]  }
 0x17b   : > { %v8036_v45 = vpack.c.bf16 %v696_v43, %v695_v36  ;;  %2048 = vmatpush1.bf16.msra.mxu1 %v7406_v39  ;;  %v7450_v36 = vld [vmem:[%s9799_s5 + $0xe4] ss:$16 sps:$4 sm:$0xff]   ;;  %v7451_v39 = vld [vmem:[%s9799_s5 + $0x100] ss:$16 sps:$4 sm:$0xff]  }
 0x17c   : > { %v715_v47 = vpack.c.bf16 %v694_v44, %v693_v40  ;;  %v6981_v48 = vpop.f32.mrb[24].mxu0  ;;  %2049 = vmatprep.subr.bf16.mxu1 %v7411_v42  ;;  %v739_v40 = vlaneseq  ;;  %v7456_v41 = vld [vmem:[%s9799_s5 + $0x124] ss:$16 sps:$4 sm:$0xff]   ;;  %v7454_v42 = vld [vmem:[%s9799_s5 + $0x120] ss:$16 sps:$4 sm:$0xff]  }
 0x17d   : > { %v651_v50 = vadd.f32 %v6981_v48, %v7995_v3  ;;  %v642_v51 = vpop.f32.mrb[25].mxu0  ;;  %v7459_v44 = vld [vmem:[%s9799_s5 + $0x144] ss:$16 sps:$4 sm:$0xff]  }
 0x17e   : > { %912 = vmatmul.mubr.bf16.gmra.mrb[20].mxu1 %v8011_v53  ;;  %v643_v52 = vadd.f32 %v7995_v3, %v642_v51  ;;  %v6982_v54 = vpop.f32.mrb[26].mxu0  ;;  %v7415_v53 = vld [vmem:[#allocation5 + $0x180] ss:$16 sps:$4 sm:$0xff]   ;;  %v8122_v43 = vshrl.u32 %v739_v40, 7 }
 0x17f   : > { %921 = vmatprep.mubr.bf16.mxu1 %v7736_v2  ;;  %v699_v55 = vmax.f32 %v651_v50, 0.0  ;;  %v654_v56 = vadd.f32 %v6982_v54, %v7995_v3  ;;  %v645_v57 = vpop.f32.mrb[27].mxu0  ;;  %2050 = vmatpush1.bf16.msra.mxu1 %v7409_v46  ;;  %v7460_v50 = vld [vmem:[%s9799_s5 + $0x160] ss:$16 sps:$4 sm:$0xff]  }
 0x180   : > { %v697_v59 = vmax.f32 %v643_v52, 0.0  ;;  %v646_v60 = vadd.f32 %v7995_v3, %v645_v57  ;;  %2051 = vmatprep.subr.bf16.mxu1 %v7414_v49  ;;  %9950 = vst [vmem:[#allocation17_spill] sm:$0xff] %v8122_v43  ;;  %v8131_v46 = vsub.s32 0, %v8122_v43  ;;  %v8137_v48 = vsub.s32 1, %v8122_v43  ;;  %v7462_v49 = vld [vmem:[%s9799_s5 + $0x164] ss:$16 sps:$4 sm:$0xff]  }
 0x181   : > { %v700_v62 = vmax.f32 %v654_v56, 0.0  ;;  %v7465_v56 = vld [vmem:[%s9799_s5 + $0x184] ss:$16 sps:$4 sm:$0xff]  }
 0x182   : > { %v698_v63 = vmax.f32 %v646_v60, 0.0  ;;  %9951 = vst [vmem:[#allocation18_spill] sm:$0xff] %v8131_v46  ;;  %9952 = vst [vmem:[#allocation19_spill] sm:$0xff] %v8137_v48 }
 0x183   : > { %v718_v0 = vpack.c.bf16 %v700_v62, %v699_v55  ;;  %2052 = vmatpush1.bf16.msra.mxu1 %v7412_v58  ;;  %v7463_v58 = vld [vmem:[%s9799_s5 + $0x180] ss:$16 sps:$4 sm:$0xff]  }
 0x184   : > { %v717_v1 = vpack.c.bf16 %v698_v63, %v697_v59  ;;  %v6985_v4 = vpop.f32.mrb[28].mxu0  ;;  %2053 = vmatprep.subr.bf16.mxu1 %v7417_v61 }
 0x185   : > { %v667_v6 = vadd.f32 %v6985_v4, %v7995_v3  ;;  %v658_v7 = vpop.f32.mrb[29].mxu0 }
 0x186   : > { %922 = vmatmul.mubr.bf16.gmra.mrb[24].mxu1 %v8020_v11  ;;  %v659_v8 = vadd.f32 %v7995_v3, %v658_v7  ;;  %v6986_v10 = vpop.f32.mrb[30].mxu0 }
 0x187   : > { %931 = vmatprep.mubr.bf16.mxu1 %v7736_v2  ;;  %v703_v12 = vmax.f32 %v667_v6, 0.0  ;;  %v670_v13 = vadd.f32 %v6986_v10, %v7995_v3  ;;  %v661_v14 = vpop.f32.mrb[31].mxu0  ;;  %2054 = vmatpush1.bf16.msra.mxu1 %v7415_v53  ;;  %v7466_v6 = vld [vmem:[%s9799_s5 + $0x1a0] ss:$16 sps:$4 sm:$0xff]  }
 0x188   : > { %v701_v16 = vmax.f32 %v659_v8, 0.0  ;;  %v662_v17 = vadd.f32 %v7995_v3, %v661_v14  ;;  %2055 = vmatprep.subr.bf16.mxu1 %v7420_v5  ;;  %v7423_v3 = vld [vmem:[#allocation5 + $0x1c4] ss:$16 sps:$4 sm:$0xff]  }
 0x189   : > { %v704_v18 = vmax.f32 %v670_v13, 0.0 }
 0x18a   : > { %v702_v19 = vmax.f32 %v662_v17, 0.0 }
 0x18b   : > { %v720_v20 = vpack.c.bf16 %v704_v18, %v703_v12  ;;  %2056 = vmatpush1.bf16.msra.mxu1 %v7418_v15  ;;  %v7471_v12 = vld [vmem:[%s9799_s5 + $0x1c4] ss:$16 sps:$4 sm:$0xff]   ;;  %v7469_v15 = vld [vmem:[%s9799_s5 + $0x1c0] ss:$16 sps:$4 sm:$0xff]  }
 0x18c   : > { %v719_v11 = vpack.c.bf16 %v702_v19, %v701_v16  ;;  %2057 = vmatprep.subr.bf16.mxu1 %v7423_v3 }
 0x18e   : > { %932 = vmatmul.mubr.bf16.gmra.mrb[28].mxu1 %v8018_v9  ;;  %v7429_v9 = vld [vmem:[%s9799_s5 + $0x4] ss:$16 sps:$4 sm:$0xff]  }
 0x18f   : > { %941 = vmatprep.mubr.bf16.mxu1 %v7736_v2  ;;  %2058 = vmatpush1.bf16.msra.mxu1 %v7421_v21  ;;  %v7472_v21 = vld [vmem:[%s9799_s5 + $0x1e0] ss:$16 sps:$4 sm:$0xff]  }
 0x190   : > { %2059 = vmatprep.subr.bf16.mxu1 %v7426_v22  ;;  %1531 = vmatprep.subr.bf16.mxu0 %v7429_v9  ;;  %v7474_v22 = vld [vmem:[%s9799_s5 + $0x1e4] ss:$16 sps:$4 sm:$0xff]  }
 0x191   : > { %1532 = vmatpush1.bf16.msra.mxu0 %v7427_v24 }
 0x192   : > { %1533 = vmatprep.subr.bf16.mxu0 %v7432_v25 }
 0x193   : > { %2060 = vmatpush1.bf16.msra.mxu1 %v7424_v23 }
 0x195   : > { %1534 = vmatpush1.bf16.msra.mxu0 %v7430_v26 }
 0x196   : > { %942 = vmatmul.mubr.bf16.gmra.mrb[32].mxu1 %v8029_v29  ;;  %v7436_v29 = vld [vmem:[%s9799_s5 + $0x60] ss:$16 sps:$4 sm:$0xff]  }
 0x197   : > { %951 = vmatprep.mubr.bf16.mxu1 %v7736_v2 }
 0x19e   : > { %952 = vmatmul.mubr.bf16.gmra.mrb[36].mxu1 %v8027_v27  ;;  %v7433_v27 = vld [vmem:[%s9799_s5 + $0x40] ss:$16 sps:$4 sm:$0xff]  }
 0x19f   : > { %961 = vmatprep.mubr.bf16.mxu1 %v7736_v2 }
 0x1a6   : > { %962 = vmatmul.mubr.bf16.gmra.mrb[40].mxu1 %v715_v47  ;;  %v737_v47 = vld [vmem:[%s9798_s4] sm:$0x3] }
 0x1a7   : > { %971 = vmatprep.mubr.bf16.mxu1 %v7736_v2  ;;  %v8146_v51 = vrot.slane %v737_v47, %v8131_v46  ;;  %v8149_v54 = vrot.slane %v737_v47, %v8137_v48 }
 0x1ae   : > { %972 = vmatmul.mubr.bf16.gmra.mrb[44].mxu1 %v8036_v45  ;;  %v7457_v45 = vld [vmem:[%s9799_s5 + $0x140] ss:$16 sps:$4 sm:$0xff]  }
 0x1af   : > { %981 = vmatprep.mubr.bf16.mxu1 %v7736_v2 }
 0x1b6   : > { %982 = vmatmul.mubr.bf16.gmra.mrb[48].mxu1 %v717_v1  ;;  %v7468_v1 = vld [vmem:[%s9799_s5 + $0x1a4] ss:$16 sps:$4 sm:$0xff]  }
 0x1b7   : > { %991 = vmatprep.mubr.bf16.mxu1 %v7736_v2 }
 0x1be   : > { %992 = vmatmul.mubr.bf16.gmra.mrb[52].mxu1 %v718_v0 }
 0x1bf   : > { %1001 = vmatprep.mubr.bf16.mxu1 %v7736_v2 }
 0x1c6   : > { %1002 = vmatmul.mubr.bf16.gmra.mrb[56].mxu1 %v719_v11 }
 0x1c7   : > { %1011 = vmatprep.mubr.bf16.mxu1 %v7736_v2  ;;  %v7435_v2 = vld [vmem:[%s9799_s5 + $0x44] ss:$16 sps:$4 sm:$0xff]  }
 0x1c8   : > { %1535 = vmatprep.subr.bf16.mxu0 %v7435_v2  ;;  %v7477_v2 = vld [vmem:[%s9799_s5 + $0xc] ss:$16 sps:$4 sm:$0xff]  }
 0x1c9   : > { %1536 = vmatpush1.bf16.msra.mxu0 %v7433_v27 }
 0x1ca   : > { %1537 = vmatprep.subr.bf16.mxu0 %v7438_v28 }
 0x1cd   : > { %1538 = vmatpush1.bf16.msra.mxu0 %v7436_v29 }
 0x1ce   : > { %1012 = vmatmul.mubr.bf16.gmra.mrb[60].mxu1 %v720_v20  ;;  %1539 = vmatprep.subr.bf16.mxu0 %v7441_v30 }
 0x1d1   : > { %1540 = vmatpush1.bf16.msra.mxu0 %v7439_v31 }
 0x1d2   : > { %1541 = vmatprep.subr.bf16.mxu0 %v7444_v32 }
 0x1d5   : > { %1542 = vmatpush1.bf16.msra.mxu0 %v7442_v33 }
 0x1d6   : > { %1543 = vmatprep.subr.bf16.mxu0 %v7447_v34 }
 0x1d9   : > { %1544 = vmatpush1.bf16.msra.mxu0 %v7445_v35 }
 0x1da   : > { %1545 = vmatprep.subr.bf16.mxu0 %v7450_v36 }
 0x1dd   : > { %1546 = vmatpush1.bf16.msra.mxu0 %v7448_v37 }
 0x1de   : > { %1547 = vmatprep.subr.bf16.mxu0 %v7453_v38 }
 0x1e1   : > { %1548 = vmatpush1.bf16.msra.mxu0 %v7451_v39 }
 0x1e2   : > { %1549 = vmatprep.subr.bf16.mxu0 %v7456_v41 }
 0x1e5   : > { %1550 = vmatpush1.bf16.msra.mxu0 %v7454_v42 }
 0x1e6   : > { %1551 = vmatprep.subr.bf16.mxu0 %v7459_v44 }
 0x1e9   : > { %1552 = vmatpush1.bf16.msra.mxu0 %v7457_v45 }
 0x1ea   : > { %1553 = vmatprep.subr.bf16.mxu0 %v7462_v49 }
 0x1ed   : > { %1554 = vmatpush1.bf16.msra.mxu0 %v7460_v50 }
 0x1ee   : > { %1555 = vmatprep.subr.bf16.mxu0 %v7465_v56 }
 0x1f1   : > { %1556 = vmatpush1.bf16.msra.mxu0 %v7463_v58 }
 0x1f2   : > { %1557 = vmatprep.subr.bf16.mxu0 %v7468_v1 }
 0x1f5   : > { %1558 = vmatpush1.bf16.msra.mxu0 %v7466_v6 }
 0x1f6   : > { %1559 = vmatprep.subr.bf16.mxu0 %v7471_v12 }
 0x1f9   : > { %1560 = vmatpush1.bf16.msra.mxu0 %v7469_v15 }
 0x1fa   : > { %1561 = vmatprep.subr.bf16.mxu0 %v7474_v22 }
 0x1fd   : > { %1562 = vmatpush1.bf16.msra.mxu0 %v7472_v21 }
 0x1fe   : > { %1572 = vmatprep.subr.bf16.mxu0 %v7477_v2 }
 0x229   : > { %v863_v52 = vpop.f32.mrb[0].mxu1 }
 0x22a   : > { %v865_v55 = vpop.f32.mrb[1].mxu1  ;;  %v864_v59 = vadd.f32 %v863_v52, %v8146_v51 }
 0x22b   : > { %v867_v57 = vpop.f32.mrb[2].mxu1  ;;  %v866_v62 = vadd.f32 %v865_v55, %v8149_v54 }
 0x22c   : > { %v868_v60 = vadd.f32 %v867_v57, %v8146_v51  ;;  %v869_v61 = vpop.f32.mrb[3].mxu1 }
 0x22d   : > { %v870_v63 = vadd.f32 %v869_v61, %v8149_v54 }
 0x22e   : > { %v1022_v0 = vmax.f32 %v864_v59, %v868_v60  ;;  %v8161_v53 = vpack.c.bf16 %v868_v60, %v864_v59 }
 0x22f   : > { %v1043_v4 = vmax.f32 %v866_v62, %v870_v63  ;;  %v8166_v5 = vpack.c.bf16 %v870_v63, %v866_v62 }
 0x231   : > { %v873_v7 = vpop.f32.mrb[4].mxu1  ;;  %2061 = vmatprep.mubr.bf16.mxu1 %v8166_v5 }
 0x232   : > { %v874_v8 = vadd.f32 %v873_v7, %v8146_v51  ;;  %v875_v10 = vpop.f32.mrb[5].mxu1  ;;  %2062 = vmatmul.mubr.bf16.vlgmr.msra.gmra.mrb[64].mxu1 %v8161_v53 }
 0x233   : > { %v876_v13 = vadd.f32 %v875_v10, %v8149_v54  ;;  %v877_v14 = vpop.f32.mrb[6].mxu1 }
 0x234   : > { %v1023_v16 = vmax.f32 %v1022_v0, %v874_v8  ;;  %v878_v17 = vadd.f32 %v877_v14, %v8146_v51  ;;  %v879_v18 = vpop.f32.mrb[7].mxu1 }
 0x235   : > { %v1044_v19 = vmax.f32 %v1043_v4, %v876_v13  ;;  %v880_v20 = vadd.f32 %v879_v18, %v8149_v54 }
 0x236   : > { %v1024_v11 = vmax.f32 %v1023_v16, %v878_v17  ;;  %v8183_v3 = vpack.c.bf16 %v878_v17, %v874_v8 }
 0x237   : > { %v8191_v23 = vpack.c.bf16 %v880_v20, %v876_v13  ;;  %v1045_v9 = vmax.f32 %v1044_v19, %v880_v20 }
 0x239   : > { %v883_v24 = vpop.f32.mrb[8].mxu1  ;;  %2071 = vmatprep.mubr.bf16.mxu1 %v8191_v23 }
 0x23a   : > { %v884_v25 = vadd.f32 %v883_v24, %v8146_v51  ;;  %v885_v26 = vpop.f32.mrb[9].mxu1  ;;  %2072 = vmatmul.mubr.bf16.gmra.mrb[68].mxu1 %v8183_v3 }
 0x23b   : > { %v886_v27 = vadd.f32 %v885_v26, %v8149_v54  ;;  %v887_v28 = vpop.f32.mrb[10].mxu1 }
 0x23c   : > { %v1025_v29 = vmax.f32 %v1024_v11, %v884_v25  ;;  %v888_v30 = vadd.f32 %v887_v28, %v8146_v51  ;;  %v889_v31 = vpop.f32.mrb[11].mxu1 }
 0x23d   : > { %v1046_v32 = vmax.f32 %v1045_v9, %v886_v27  ;;  %v890_v33 = vadd.f32 %v889_v31, %v8149_v54 }
 0x23e   : > { %v1026_v34 = vmax.f32 %v1025_v29, %v888_v30  ;;  %v8202_v35 = vpack.c.bf16 %v888_v30, %v884_v25 }
 0x23f   : > { %v1047_v36 = vmax.f32 %v1046_v32, %v890_v33  ;;  %v8204_v37 = vpack.c.bf16 %v890_v33, %v886_v27 }
 0x241   : > { %v893_v38 = vpop.f32.mrb[12].mxu1  ;;  %2081 = vmatprep.mubr.bf16.mxu1 %v8204_v37 }
 0x242   : > { %v894_v39 = vadd.f32 %v893_v38, %v8146_v51  ;;  %v895_v40 = vpop.f32.mrb[13].mxu1  ;;  %2082 = vmatmul.mubr.bf16.gmra.mrb[72].mxu1 %v8202_v35 }
 0x243   : > { %v896_v41 = vadd.f32 %v895_v40, %v8149_v54  ;;  %v897_v42 = vpop.f32.mrb[14].mxu1 }
 0x244   : > { %v1027_v44 = vmax.f32 %v1026_v34, %v894_v39  ;;  %v898_v45 = vadd.f32 %v897_v42, %v8146_v51  ;;  %v899_v47 = vpop.f32.mrb[15].mxu1 }
 0x245   : > { %v1048_v49 = vmax.f32 %v1047_v36, %v896_v41  ;;  %v900_v50 = vadd.f32 %v899_v47, %v8149_v54 }
 0x246   : > { %v1028_v52 = vmax.f32 %v1027_v44, %v898_v45  ;;  %v8212_v55 = vpack.c.bf16 %v898_v45, %v894_v39 }
 0x247   : > { %v1049_v56 = vmax.f32 %v1048_v49, %v900_v50  ;;  %v8214_v57 = vpack.c.bf16 %v900_v50, %v896_v41 }
 0x249   : > { %v903_v58 = vpop.f32.mrb[16].mxu1  ;;  %2091 = vmatprep.mubr.bf16.mxu1 %v8214_v57 }
 0x24a   : > { %v904_v59 = vadd.f32 %v903_v58, %v8146_v51  ;;  %v905_v60 = vpop.f32.mrb[17].mxu1  ;;  %2092 = vmatmul.mubr.bf16.gmra.mrb[76].mxu1 %v8212_v55 }
 0x24b   : > { %v906_v61 = vadd.f32 %v905_v60, %v8149_v54  ;;  %v907_v62 = vpop.f32.mrb[18].mxu1 }
 0x24c   : > { %v1029_v63 = vmax.f32 %v1028_v52, %v904_v59  ;;  %v908_v0 = vadd.f32 %v907_v62, %v8146_v51  ;;  %v909_v1 = vpop.f32.mrb[19].mxu1 }
 0x24d   : > { %v1050_v4 = vmax.f32 %v1049_v56, %v906_v61  ;;  %v910_v6 = vadd.f32 %v909_v1, %v8149_v54 }
 0x24e   : > { %v1030_v7 = vmax.f32 %v1029_v63, %v908_v0  ;;  %v8222_v8 = vpack.c.bf16 %v908_v0, %v904_v59 }
 0x24f   : > { %v1051_v10 = vmax.f32 %v1050_v4, %v910_v6  ;;  %v8224_v12 = vpack.c.bf16 %v910_v6, %v906_v61 }
 0x251   : > { %v913_v13 = vpop.f32.mrb[20].mxu1  ;;  %2101 = vmatprep.mubr.bf16.mxu1 %v8224_v12 }
 0x252   : > { %v914_v14 = vadd.f32 %v913_v13, %v8146_v51  ;;  %v915_v15 = vpop.f32.mrb[21].mxu1  ;;  %2102 = vmatmul.mubr.bf16.gmra.mrb[80].mxu1 %v8222_v8 }
 0x253   : > { %v916_v16 = vadd.f32 %v915_v15, %v8149_v54  ;;  %v917_v17 = vpop.f32.mrb[22].mxu1 }
 0x254   : > { %v1031_v18 = vmax.f32 %v1030_v7, %v914_v14  ;;  %v918_v19 = vadd.f32 %v917_v17, %v8146_v51  ;;  %v919_v20 = vpop.f32.mrb[23].mxu1 }
 0x255   : > { %v1052_v11 = vmax.f32 %v1051_v10, %v916_v16  ;;  %v920_v21 = vadd.f32 %v919_v20, %v8149_v54 }
 0x256   : > { %v1032_v22 = vmax.f32 %v1031_v18, %v918_v19  ;;  %v8232_v9 = vpack.c.bf16 %v918_v19, %v914_v14 }
 0x257   : > { %v1053_v24 = vmax.f32 %v1052_v11, %v920_v21  ;;  %v8234_v25 = vpack.c.bf16 %v920_v21, %v916_v16 }
 0x259   : > { %v923_v26 = vpop.f32.mrb[24].mxu1  ;;  %2111 = vmatprep.mubr.bf16.mxu1 %v8234_v25 }
 0x25a   : > { %v924_v2 = vadd.f32 %v923_v26, %v8146_v51  ;;  %v925_v27 = vpop.f32.mrb[25].mxu1  ;;  %2112 = vmatmul.mubr.bf16.gmra.mrb[84].mxu1 %v8232_v9 }
 0x25b   : > { %v926_v28 = vadd.f32 %v925_v27, %v8149_v54  ;;  %v927_v29 = vpop.f32.mrb[26].mxu1 }
 0x25c   : > { %v1033_v30 = vmax.f32 %v1032_v22, %v924_v2  ;;  %v928_v31 = vadd.f32 %v927_v29, %v8146_v51  ;;  %v929_v32 = vpop.f32.mrb[27].mxu1 }
 0x25d   : > { %v1054_v33 = vmax.f32 %v1053_v24, %v926_v28  ;;  %v930_v34 = vadd.f32 %v929_v32, %v8149_v54 }
 0x25e   : > { %v1034_v36 = vmax.f32 %v1033_v30, %v928_v31  ;;  %v8242_v38 = vpack.c.bf16 %v928_v31, %v924_v2 }
 0x25f   : > { %v1055_v39 = vmax.f32 %v1054_v33, %v930_v34  ;;  %v8244_v40 = vpack.c.bf16 %v930_v34, %v926_v28 }
 0x261   : > { %v933_v41 = vpop.f32.mrb[28].mxu1  ;;  %2121 = vmatprep.mubr.bf16.mxu1 %v8244_v40 }
 0x262   : > { %v934_v42 = vadd.f32 %v933_v41, %v8146_v51  ;;  %v935_v44 = vpop.f32.mrb[29].mxu1  ;;  %2122 = vmatmul.mubr.bf16.gmra.mrb[88].mxu1 %v8242_v38 }
 0x263   : > { %v936_v45 = vadd.f32 %v935_v44, %v8149_v54  ;;  %v937_v47 = vpop.f32.mrb[30].mxu1 }
 0x264   : > { %v1035_v49 = vmax.f32 %v1034_v36, %v934_v42  ;;  %v938_v50 = vadd.f32 %v937_v47, %v8146_v51  ;;  %v939_v52 = vpop.f32.mrb[31].mxu1 }
 0x265   : > { %v1056_v56 = vmax.f32 %v1055_v39, %v936_v45  ;;  %v940_v58 = vadd.f32 %v939_v52, %v8149_v54 }
 0x266   : > { %v8252_v59 = vmax.f32 %v1035_v49, %v938_v50  ;;  %v8254_v60 = vpack.c.bf16 %v938_v50, %v934_v42 }
 0x267   : > { %v8256_v61 = vmax.f32 %v1056_v56, %v940_v58  ;;  %v8258_v62 = vpack.c.bf16 %v940_v58, %v936_v45 }
 0x269   : > { %v943_v63 = vpop.f32.mrb[32].mxu1  ;;  %2131 = vmatprep.mubr.bf16.mxu1 %v8258_v62 }
 0x26a   : > { %v945_v0 = vpop.f32.mrb[33].mxu1  ;;  %2132 = vmatmul.mubr.bf16.gmra.mrb[92].mxu1 %v8254_v60  ;;  %v944_v4 = vadd.f32 %v943_v63, %v8146_v51 }
 0x26b   : > { %v947_v1 = vpop.f32.mrb[34].mxu1  ;;  %v946_v10 = vadd.f32 %v945_v0, %v8149_v54 }
 0x26c   : > { %v948_v6 = vadd.f32 %v947_v1, %v8146_v51  ;;  %v949_v7 = vpop.f32.mrb[35].mxu1 }
 0x26d   : > { %v950_v13 = vadd.f32 %v949_v7, %v8149_v54 }
 0x26e   : > { %v1064_v14 = vmax.f32 %v944_v4, %v948_v6  ;;  %v8266_v15 = vpack.c.bf16 %v948_v6, %v944_v4 }
 0x26f   : > { %v1085_v16 = vmax.f32 %v946_v10, %v950_v13  ;;  %v8268_v17 = vpack.c.bf16 %v950_v13, %v946_v10 }
 0x271   : > { %v953_v18 = vpop.f32.mrb[36].mxu1  ;;  %2141 = vmatprep.mubr.bf16.mxu1 %v8268_v17 }
 0x272   : > { %v954_v19 = vadd.f32 %v953_v18, %v8146_v51  ;;  %v955_v20 = vpop.f32.mrb[37].mxu1  ;;  %2142 = vmatmul.mubr.bf16.gmra.mrb[96].mxu1 %v8266_v15 }
 0x273   : > { %v956_v11 = vadd.f32 %v955_v20, %v8149_v54  ;;  %v957_v21 = vpop.f32.mrb[38].mxu1 }
 0x274   : > { %v1065_v22 = vmax.f32 %v1064_v14, %v954_v19  ;;  %v958_v24 = vadd.f32 %v957_v21, %v8146_v51  ;;  %v959_v26 = vpop.f32.mrb[39].mxu1 }
 0x275   : > { %v1086_v2 = vmax.f32 %v1085_v16, %v956_v11  ;;  %v960_v27 = vadd.f32 %v959_v26, %v8149_v54 }
 0x276   : > { %v1066_v28 = vmax.f32 %v1065_v22, %v958_v24  ;;  %v8276_v29 = vpack.c.bf16 %v958_v24, %v954_v19 }
 0x277   : > { %v1087_v30 = vmax.f32 %v1086_v2, %v960_v27  ;;  %v8278_v31 = vpack.c.bf16 %v960_v27, %v956_v11 }
 0x279   : > { %v963_v32 = vpop.f32.mrb[40].mxu1  ;;  %2151 = vmatprep.mubr.bf16.mxu1 %v8278_v31 }
 0x27a   : > { %v964_v33 = vadd.f32 %v963_v32, %v8146_v51  ;;  %v965_v34 = vpop.f32.mrb[41].mxu1  ;;  %2152 = vmatmul.mubr.bf16.gmra.mrb[100].mxu1 %v8276_v29 }
 0x27b   : > { %v966_v36 = vadd.f32 %v965_v34, %v8149_v54  ;;  %v967_v39 = vpop.f32.mrb[42].mxu1 }
 0x27c   : > { %v1067_v41 = vmax.f32 %v1066_v28, %v964_v33  ;;  %v968_v42 = vadd.f32 %v967_v39, %v8146_v51  ;;  %v969_v44 = vpop.f32.mrb[43].mxu1 }
 0x27d   : > { %v1088_v45 = vmax.f32 %v1087_v30, %v966_v36  ;;  %v970_v47 = vadd.f32 %v969_v44, %v8149_v54 }
 0x27e   : > { %v1068_v49 = vmax.f32 %v1067_v41, %v968_v42  ;;  %v8286_v50 = vpack.c.bf16 %v968_v42, %v964_v33 }
 0x27f   : > { %v1089_v52 = vmax.f32 %v1088_v45, %v970_v47  ;;  %v8288_v56 = vpack.c.bf16 %v970_v47, %v966_v36 }
 0x281   : > { %v973_v58 = vpop.f32.mrb[44].mxu1  ;;  %2161 = vmatprep.mubr.bf16.mxu1 %v8288_v56 }
 0x282   : > { %v974_v63 = vadd.f32 %v973_v58, %v8146_v51  ;;  %v975_v0 = vpop.f32.mrb[45].mxu1  ;;  %2162 = vmatmul.mubr.bf16.gmra.mrb[104].mxu1 %v8286_v50 }
 0x283   : > { %v976_v1 = vadd.f32 %v975_v0, %v8149_v54  ;;  %v977_v4 = vpop.f32.mrb[46].mxu1 }
 0x284   : > { %v1069_v6 = vmax.f32 %v1068_v49, %v974_v63  ;;  %v978_v7 = vadd.f32 %v977_v4, %v8146_v51  ;;  %v979_v10 = vpop.f32.mrb[47].mxu1 }
 0x285   : > { %v1090_v13 = vmax.f32 %v1089_v52, %v976_v1  ;;  %v980_v14 = vadd.f32 %v979_v10, %v8149_v54 }
 0x286   : > { %v1070_v16 = vmax.f32 %v1069_v6, %v978_v7  ;;  %v8296_v18 = vpack.c.bf16 %v978_v7, %v974_v63 }
 0x287   : > { %v1091_v19 = vmax.f32 %v1090_v13, %v980_v14  ;;  %v8298_v20 = vpack.c.bf16 %v980_v14, %v976_v1  ;;  %v1037_v13 = vrot.slane %v8252_v59, 4 }
 0x289   : > { %v983_v11 = vpop.f32.mrb[48].mxu1  ;;  %2171 = vmatprep.mubr.bf16.mxu1 %v8298_v20 }
 0x28a   : > { %v984_v21 = vadd.f32 %v983_v11, %v8146_v51  ;;  %v985_v22 = vpop.f32.mrb[49].mxu1  ;;  %2172 = vmatmul.mubr.bf16.gmra.mrb[108].mxu1 %v8296_v18 }
 0x28b   : > { %v986_v24 = vadd.f32 %v985_v22, %v8149_v54  ;;  %v987_v26 = vpop.f32.mrb[50].mxu1 }
 0x28c   : > { %v1071_v2 = vmax.f32 %v1070_v16, %v984_v21  ;;  %v988_v27 = vadd.f32 %v987_v26, %v8146_v51  ;;  %v989_v28 = vpop.f32.mrb[51].mxu1 }
 0x28d   : > { %v1092_v30 = vmax.f32 %v1091_v19, %v986_v24  ;;  %v990_v32 = vadd.f32 %v989_v28, %v8149_v54  ;;  %v1058_v19 = vrot.slane %v8256_v61, 4  ;;  %v1038_v28 = vmax.f32 %v8252_v59, %v1037_v13 }
 0x28e   : > { %v1072_v33 = vmax.f32 %v1071_v2, %v988_v27  ;;  %v8306_v34 = vpack.c.bf16 %v988_v27, %v984_v21 }
 0x28f   : > { %v1093_v36 = vmax.f32 %v1092_v30, %v990_v32  ;;  %v8308_v39 = vpack.c.bf16 %v990_v32, %v986_v24 }
 0x291   : > { %v993_v41 = vpop.f32.mrb[52].mxu1  ;;  %2181 = vmatprep.mubr.bf16.mxu1 %v8308_v39 }
 0x292   : > { %v994_v42 = vadd.f32 %v993_v41, %v8146_v51  ;;  %v995_v44 = vpop.f32.mrb[53].mxu1  ;;  %2182 = vmatmul.mubr.bf16.gmra.mrb[112].mxu1 %v8306_v34 }
 0x293   : > { %v996_v45 = vadd.f32 %v995_v44, %v8149_v54  ;;  %v997_v47 = vpop.f32.mrb[54].mxu1  ;;  %v1039_v44 = vrot.slane %v1038_v28, 2 }
 0x294   : > { %v1073_v49 = vmax.f32 %v1072_v33, %v994_v42  ;;  %v998_v52 = vadd.f32 %v997_v47, %v8146_v51  ;;  %v999_v58 = vpop.f32.mrb[55].mxu1  ;;  %v1059_v33 = vmax.f32 %v8256_v61, %v1058_v19 }
 0x295   : > { %v1094_v63 = vmax.f32 %v1093_v36, %v996_v45  ;;  %v1000_v0 = vadd.f32 %v999_v58, %v8149_v54 }
 0x296   : > { %v1074_v1 = vmax.f32 %v1073_v49, %v998_v52  ;;  %v8316_v4 = vpack.c.bf16 %v998_v52, %v994_v42  ;;  %v1060_v49 = vrot.slane %v1059_v33, 2 }
 0x297   : > { %v1095_v6 = vmax.f32 %v1094_v63, %v1000_v0  ;;  %v8318_v7 = vpack.c.bf16 %v1000_v0, %v996_v45 }
 0x299   : > { %v1003_v10 = vpop.f32.mrb[56].mxu1  ;;  %2191 = vmatprep.mubr.bf16.mxu1 %v8318_v7 }
 0x29a   : > { %v1004_v14 = vadd.f32 %v1003_v10, %v8146_v51  ;;  %v1005_v16 = vpop.f32.mrb[57].mxu1  ;;  %2192 = vmatmul.mubr.bf16.gmra.mrb[116].mxu1 %v8316_v4 }
 0x29b   : > { %v1006_v11 = vadd.f32 %v1005_v16, %v8149_v54  ;;  %v1007_v21 = vpop.f32.mrb[58].mxu1 }
 0x29c   : > { %v1075_v22 = vmax.f32 %v1074_v1, %v1004_v14  ;;  %v1008_v24 = vadd.f32 %v1007_v21, %v8146_v51  ;;  %v1009_v26 = vpop.f32.mrb[59].mxu1 }
 0x29d   : > { %v1096_v2 = vmax.f32 %v1095_v6, %v1006_v11  ;;  %v1010_v27 = vadd.f32 %v1009_v26, %v8149_v54  ;;  %v1040_v6 = vmax.f32 %v1038_v28, %v1039_v44 }
 0x29e   : > { %v1076_v30 = vmax.f32 %v1075_v22, %v1008_v24  ;;  %v8329_v32 = vpack.c.bf16 %v1008_v24, %v1004_v14  ;;  %v1061_v14 = vmax.f32 %v1059_v33, %v1060_v49 }
 0x29f   : > { %v1097_v36 = vmax.f32 %v1096_v2, %v1010_v27  ;;  %v8332_v41 = vpack.c.bf16 %v1010_v27, %v1006_v11  ;;  %v1041_v22 = vrot.slane %v1040_v6, 1 }
 0x2a1   : > { %v1013_v42 = vpop.f32.mrb[60].mxu1  ;;  %2201 = vmatprep.mubr.bf16.mxu1 %v8332_v41  ;;  %v1042_v27 = vmax.f32 %v1040_v6, %v1041_v22  ;;  %v7483_v22 = vld [vmem:[%s9799_s5 + $0x4c] ss:$16 sps:$4 sm:$0xff]  }
 0x2a2   : > { %v1014_v45 = vadd.f32 %v1013_v42, %v8146_v51  ;;  %v1015_v47 = vpop.f32.mrb[61].mxu1  ;;  %2202 = vmatmul.mubr.bf16.gmra.mrb[120].mxu1 %v8329_v32 }
 0x2a3   : > { %v1016_v59 = vadd.f32 %v1015_v47, %v8149_v54  ;;  %v1017_v52 = vpop.f32.mrb[62].mxu1  ;;  %v1106_v44 = vpack.c.bf16 %v1042_v27, %v1042_v27  ;;  %v7492_v27 = vld [vmem:[%s9799_s5 + $0xac] ss:$16 sps:$4 sm:$0xff]  }
 0x2a4   : > { %v1077_v58 = vmax.f32 %v1076_v30, %v1014_v45  ;;  %v1018_v63 = vadd.f32 %v1017_v52, %v8146_v51  ;;  %v1019_v61 = vpop.f32.mrb[63].mxu1  ;;  %v1062_v51 = vrot.slane %v1061_v14, 1 }
 0x2a5   : > { %v1098_v0 = vmax.f32 %v1097_v36, %v1016_v59  ;;  %v1020_v1 = vadd.f32 %v1019_v61, %v8149_v54 }
 0x2a6   : > { %v1078_v10 = vmax.f32 %v1077_v58, %v1018_v63  ;;  %v8340_v13 = vpack.c.bf16 %v1018_v63, %v1014_v45  ;;  %v1063_v30 = vmax.f32 %v1061_v14, %v1062_v51  ;;  %v1200_v58 = vunpack.c.l.b16 %v1106_v44  ;;  %v7475_v14 = vld [vmem:[%s9799_s5 + $0x8] ss:$16 sps:$4 sm:$0xff]   ;;  %v7486_v51 = vld [vmem:[%s9799_s5 + $0x6c] ss:$16 sps:$4 sm:$0xff]  }
 0x2a7   : > { %v1099_v16 = vmax.f32 %v1098_v0, %v1020_v1  ;;  %v8342_v19 = vpack.c.bf16 %v1020_v1, %v1016_v59  ;;  %v7501_v44 = vld [vmem:[%s9799_s5 + $0x10c] ss:$16 sps:$4 sm:$0xff]  }
 0x2a8   : > { %v1079_v11 = vrot.slane %v1078_v10, 4  ;;  %v1107_v47 = vpack.c.bf16 %v1063_v30, %v1063_v30  ;;  %v7495_v30 = vld [vmem:[%s9799_s5 + $0xcc] ss:$16 sps:$4 sm:$0xff]  }
 0x2a9   : > { %v1100_v21 = vrot.slane %v1099_v16, 4  ;;  %2211 = vmatprep.mubr.bf16.mxu1 %v8342_v19 }
 0x2aa   : > { %v1080_v24 = vmax.f32 %v1078_v10, %v1079_v11  ;;  %2212 = vmatmul.mubr.bf16.gmra.mrb[124].mxu1 %v8340_v13  ;;  %v1201_v61 = vunpack.c.l.b16 %v1107_v47  ;;  %v7480_v11 = vld [vmem:[%s9799_s5 + $0x2c] ss:$16 sps:$4 sm:$0xff]  }
 0x2ab   : > { %v1101_v26 = vmax.f32 %v1099_v16, %v1100_v21  ;;  %v7478_v21 = vld [vmem:[%s9799_s5 + $0x28] ss:$16 sps:$4 sm:$0xff]   ;;  %v7504_v47 = vld [vmem:[%s9799_s5 + $0x12c] ss:$16 sps:$4 sm:$0xff]  }
 0x2ac   : > { %v1081_v2 = vrot.slane %v1080_v24, 2 }
 0x2ad   : > { %v1102_v54 = vrot.slane %v1101_v26, 2 }
 0x2ae   : > { %v1082_v28 = vmax.f32 %v1080_v24, %v1081_v2  ;;  %v7481_v24 = vld [vmem:[%s9799_s5 + $0x48] ss:$16 sps:$4 sm:$0xff]   ;;  %v7489_v2 = vld [vmem:[%s9799_s5 + $0x8c] ss:$16 sps:$4 sm:$0xff]  }
 0x2af   : > { %v1103_v36 = vmax.f32 %v1101_v26, %v1102_v54  ;;  %v7484_v26 = vld [vmem:[%s9799_s5 + $0x68] ss:$16 sps:$4 sm:$0xff]  }
 0x2b0   : > { %v1083_v33 = vrot.slane %v1082_v28, 1  ;;  %v7487_v54 = vld [vmem:[%s9799_s5 + $0x88] ss:$16 sps:$4 sm:$0xff]  }
 0x2b1   : > { %v1104_v42 = vrot.slane %v1103_v36, 1 }
 0x2b2   : > { %v1084_v45 = vmax.f32 %v1082_v28, %v1083_v33  ;;  %v7490_v28 = vld [vmem:[%s9799_s5 + $0xa8] ss:$16 sps:$4 sm:$0xff]   ;;  %v7498_v33 = vld [vmem:[%s9799_s5 + $0xec] ss:$16 sps:$4 sm:$0xff]  }
 0x2b3   : > { %v1105_v49 = vmax.f32 %v1103_v36, %v1104_v42  ;;  %v7493_v36 = vld [vmem:[%s9799_s5 + $0xc8] ss:$16 sps:$4 sm:$0xff]  }
 0x2b4   : > { %v1108_v59 = vpack.c.bf16 %v1084_v45, %v1084_v45  ;;  %v7496_v42 = vld [vmem:[%s9799_s5 + $0xe8] ss:$16 sps:$4 sm:$0xff]  }
 0x2b5   : > { %v1109_v52 = vpack.c.bf16 %v1105_v49, %v1105_v49  ;;  %v7499_v45 = vld [vmem:[%s9799_s5 + $0x108] ss:$16 sps:$4 sm:$0xff]  }
 0x2b6   : > { %v1202_v63 = vunpack.c.l.b16 %v1108_v59  ;;  %v7502_v49 = vld [vmem:[%s9799_s5 + $0x128] ss:$16 sps:$4 sm:$0xff]   ;;  %v7507_v59 = vld [vmem:[%s9799_s5 + $0x14c] ss:$16 sps:$4 sm:$0xff]  }
 0x2b7   : > { %v1203_v0 = vunpack.c.l.b16 %v1109_v52  ;;  %v2811_v52 = vld [vmem:[#allocation7] sm:$0xff] }
 0x2b8   : > { %v1205_v1 = vsel %vm1204_vm2, %v1202_v63, %v1200_v58  ;;  %v2813_v58 = vld [vmem:[#allocation7 + $0x20] sm:$0xff] }
 0x2b9   : > { %v1206_v6 = vsel %vm1204_vm2, %v1203_v0, %v1201_v61  ;;  %v8351_v16 = vpack.c.b16 %v1205_v1, %v1205_v1  ;;  %v6673_v63 = vcombine.low %v2811_v52, %v2813_v58  ;;  %v6674_v61 = vcombine.high %v2811_v52, %v2813_v58  ;;  %v7505_v0 = vld [vmem:[%s9799_s5 + $0x148] ss:$16 sps:$4 sm:$0xff]   ;;  %v7510_v1 = vld [vmem:[%s9799_s5 + $0x16c] ss:$16 sps:$4 sm:$0xff]  }
 0x2ba   : > { %v1208_v10 = vpack.c.b16 %v1206_v6, %v1206_v6  ;;  %v7508_v6 = vld [vmem:[%s9799_s5 + $0x168] ss:$16 sps:$4 sm:$0xff]   ;;  %v7528_v58 = vld [vmem:[#allocation5 + $0x2c] ss:$16 sps:$4 sm:$0xff]  }
 0x2bb   : > { %3579 = vmatprep.subr.bf16.mxu1 %v6674_v61  ;;  %v7523_v52 = vld [vmem:[#allocation5 + $0x8] ss:$16 sps:$4 sm:$0xff]   ;;  %v7531_v61 = vld [vmem:[#allocation5 + $0x4c] ss:$16 sps:$4 sm:$0xff]  }
 0x2bc   : > { %1563 = vmatprep.mubr.bf16.mxu0 %v1208_v10  ;;  %3580 = vmatpush1.bf16.msra.mxu1 %v6673_v63  ;;  %v7526_v63 = vld [vmem:[#allocation5 + $0x28] ss:$16 sps:$4 sm:$0xff]  }
 0x2bd   : > { %1564 = vmatmul.mubr.bf16.vlgmr.msra.gmra.mrb[32].mxu0 %v8351_v16 }
 0x2be   : > { %1573 = vmatpush1.bf16.msra.mxu0 %v7475_v14  ;;  %1604 = vmatprep.mubr.bf16.mxu0 %v1208_v10  ;;  %v7513_v10 = vld [vmem:[%s9799_s5 + $0x18c] ss:$16 sps:$4 sm:$0xff]   ;;  %v2815_v14 = vld [vmem:[#allocation7 + $0x40] sm:$0xff] }
 0x2bf   : > { %1574 = vmatprep.subr.bf16.mxu0 %v7480_v11  ;;  %v2817_v11 = vld [vmem:[#allocation7 + $0x60] sm:$0xff] }
 0x2c2   : > { %1575 = vmatpush1.bf16.msra.mxu0 %v7478_v21  ;;  %v6677_v21 = vcombine.low %v2815_v14, %v2817_v11 }
 0x2c3   : > { %1576 = vmatprep.subr.bf16.mxu0 %v7483_v22  ;;  %v6678_v22 = vcombine.high %v2815_v14, %v2817_v11  ;;  %v7529_v14 = vld [vmem:[#allocation5 + $0x48] ss:$16 sps:$4 sm:$0xff]   ;;  %v7534_v11 = vld [vmem:[#allocation5 + $0x6c] ss:$16 sps:$4 sm:$0xff]  }
 0x2c5   : > { %3581 = vmatprep.subr.bf16.mxu1 %v6678_v22  ;;  %v7532_v22 = vld [vmem:[#allocation5 + $0x68] ss:$16 sps:$4 sm:$0xff]  }
 0x2c6   : > { %1577 = vmatpush1.bf16.msra.mxu0 %v7481_v24  ;;  %v7511_v24 = vld [vmem:[%s9799_s5 + $0x188] ss:$16 sps:$4 sm:$0xff]   ;;  %3582 = vmatpush1.bf16.msra.mxu1 %v6677_v21 }
 0x2c7   : > { %1578 = vmatprep.subr.bf16.mxu0 %v7486_v51  ;;  %v7516_v51 = vld [vmem:[%s9799_s5 + $0x1ac] ss:$16 sps:$4 sm:$0xff]  }
 0x2ca   : > { %1579 = vmatpush1.bf16.msra.mxu0 %v7484_v26  ;;  %v7514_v26 = vld [vmem:[%s9799_s5 + $0x1a8] ss:$16 sps:$4 sm:$0xff]  }
 0x2cb   : > { %1580 = vmatprep.subr.bf16.mxu0 %v7489_v2  ;;  %v7519_v2 = vld [vmem:[%s9799_s5 + $0x1cc] ss:$16 sps:$4 sm:$0xff]  }
 0x2ce   : > { %1581 = vmatpush1.bf16.msra.mxu0 %v7487_v54  ;;  %v2819_v54 = vld [vmem:[#allocation7 + $0x80] sm:$0xff] }
 0x2cf   : > { %1582 = vmatprep.subr.bf16.mxu0 %v7492_v27  ;;  %v2821_v27 = vld [vmem:[#allocation7 + $0xa0] sm:$0xff] }
 0x2d2   : > { %1583 = vmatpush1.bf16.msra.mxu0 %v7490_v28  ;;  %v6681_v28 = vcombine.low %v2819_v54, %v2821_v27 }
 0x2d3   : > { %1584 = vmatprep.subr.bf16.mxu0 %v7495_v30  ;;  %v6682_v30 = vcombine.high %v2819_v54, %v2821_v27 }
 0x2d5   : > { %3583 = vmatprep.subr.bf16.mxu1 %v6682_v30  ;;  %v7540_v30 = vld [vmem:[#allocation5 + $0xac] ss:$16 sps:$4 sm:$0xff]  }
 0x2d6   : > { %1585 = vmatpush1.bf16.msra.mxu0 %v7493_v36  ;;  %v7517_v36 = vld [vmem:[%s9799_s5 + $0x1c8] ss:$16 sps:$4 sm:$0xff]   ;;  %3584 = vmatpush1.bf16.msra.mxu1 %v6681_v28 }
 0x2d7   : > { %1586 = vmatprep.subr.bf16.mxu0 %v7498_v33  ;;  %v7522_v33 = vld [vmem:[%s9799_s5 + $0x1ec] ss:$16 sps:$4 sm:$0xff]   ;;  %v7535_v28 = vld [vmem:[#allocation5 + $0x88] ss:$16 sps:$4 sm:$0xff]  }
 0x2da   : > { %1587 = vmatpush1.bf16.msra.mxu0 %v7496_v42  ;;  %v7520_v42 = vld [vmem:[%s9799_s5 + $0x1e8] ss:$16 sps:$4 sm:$0xff]  }
 0x2db   : > { %1588 = vmatprep.subr.bf16.mxu0 %v7501_v44  ;;  %v7525_v44 = vld [vmem:[#allocation5 + $0xc] ss:$16 sps:$4 sm:$0xff]  }
 0x2de   : > { %1589 = vmatpush1.bf16.msra.mxu0 %v7499_v45  ;;  %v2823_v45 = vld [vmem:[#allocation7 + $0xc0] sm:$0xff] }
 0x2df   : > { %1590 = vmatprep.subr.bf16.mxu0 %v7504_v47  ;;  %v2825_v47 = vld [vmem:[#allocation7 + $0xe0] sm:$0xff] }
 0x2e2   : > { %1591 = vmatpush1.bf16.msra.mxu0 %v7502_v49  ;;  %v6685_v49 = vcombine.low %v2823_v45, %v2825_v47 }
 0x2e3   : > { %1592 = vmatprep.subr.bf16.mxu0 %v7507_v59  ;;  %v6686_v59 = vcombine.high %v2823_v45, %v2825_v47  ;;  %v7543_v45 = vld [vmem:[#allocation5 + $0xcc] ss:$16 sps:$4 sm:$0xff]  }
 0x2e5   : > { %3585 = vmatprep.subr.bf16.mxu1 %v6686_v59  ;;  %v7546_v59 = vld [vmem:[#allocation5 + $0xec] ss:$16 sps:$4 sm:$0xff]  }
 0x2e6   : > { %1593 = vmatpush1.bf16.msra.mxu0 %v7505_v0  ;;  %3586 = vmatpush1.bf16.msra.mxu1 %v6685_v49  ;;  %v2827_v0 = vld [vmem:[#allocation7 + $0x100] sm:$0xff]  ;;  %v7541_v49 = vld [vmem:[#allocation5 + $0xc8] ss:$16 sps:$4 sm:$0xff]  }
 0x2e7   : > { %1594 = vmatprep.subr.bf16.mxu0 %v7510_v1  ;;  %v2829_v1 = vld [vmem:[#allocation7 + $0x120] sm:$0xff] }
 0x2ea   : > { %1595 = vmatpush1.bf16.msra.mxu0 %v7508_v6  ;;  %v6689_v6 = vcombine.low %v2827_v0, %v2829_v1 }
 0x2eb   : > { %1596 = vmatprep.subr.bf16.mxu0 %v7513_v10  ;;  %v6690_v10 = vcombine.high %v2827_v0, %v2829_v1  ;;  %v2837_v0 = vld [vmem:[#allocation7 + $0x1a0] sm:$0xff] }
 0x2ed   : > { %3587 = vmatprep.subr.bf16.mxu1 %v6690_v10 }
 0x2ee   : > { %1597 = vmatpush1.bf16.msra.mxu0 %v7511_v24  ;;  %3588 = vmatpush1.bf16.msra.mxu1 %v6689_v6  ;;  %v2833_v24 = vld [vmem:[#allocation7 + $0x160] sm:$0xff]  ;;  %v7549_v6 = vld [vmem:[#allocation5 + $0x10c] ss:$16 sps:$4 sm:$0xff]  }
 0x2ef   : > { %1598 = vmatprep.subr.bf16.mxu0 %v7516_v51 }
 0x2f2   : > { %1599 = vmatpush1.bf16.msra.mxu0 %v7514_v26  ;;  %v7537_v26 = vld [vmem:[#allocation5 + $0x8c] ss:$16 sps:$4 sm:$0xff]  }
 0x2f3   : > { %1600 = vmatprep.subr.bf16.mxu0 %v7519_v2 }
 0x2f6   : > { %1601 = vmatpush1.bf16.msra.mxu0 %v7517_v36 }
 0x2f7   : > { %1602 = vmatprep.subr.bf16.mxu0 %v7522_v33 }
 0x2fa   : > { %1603 = vmatpush1.bf16.msra.mxu0 %v7520_v42  ;;  %v7538_v42 = vld [vmem:[#allocation5 + $0xa8] ss:$16 sps:$4 sm:$0xff]  }
 0x2fb   : > { %2222 = vmatprep.subr.bf16.mxu0 %v7525_v44 }
 0x2fd   : > { %1605 = vmatmul.mubr.bf16.vlgmr.msra.gmra.mrb[36].mxu0 %v8351_v16 }
 0x2fe   : > { %2223 = vmatpush1.bf16.msra.mxu0 %v7523_v52  ;;  %2254 = vmatprep.mubr.bf16.mxu0 %v8166_v5  ;;  %v2831_v5 = vld [vmem:[#allocation7 + $0x140] sm:$0xff] }
 0x2ff   : > { %2224 = vmatprep.subr.bf16.mxu0 %v7528_v58  ;;  %v6693_v2 = vcombine.low %v2831_v5, %v2833_v24  ;;  %v6694_v54 = vcombine.high %v2831_v5, %v2833_v24 }
 0x301   : > { %3589 = vmatprep.subr.bf16.mxu1 %v6694_v54  ;;  %v7552_v54 = vld [vmem:[#allocation5 + $0x12c] ss:$16 sps:$4 sm:$0xff]  }
 0x302   : > { %2225 = vmatpush1.bf16.msra.mxu0 %v7526_v63  ;;  %3590 = vmatpush1.bf16.msra.mxu1 %v6693_v2  ;;  %v7544_v63 = vld [vmem:[#allocation5 + $0xe8] ss:$16 sps:$4 sm:$0xff]  }
 0x303   : > { %2226 = vmatprep.subr.bf16.mxu0 %v7531_v61  ;;  %v2835_v61 = vld [vmem:[#allocation7 + $0x180] sm:$0xff] }
 0x304   : > { %v6697_v10 = vcombine.low %v2835_v61, %v2837_v0 }
 0x305   : > { %v8446_v21 = vpop.f32.mrb[64].mxu1 }
 0x306   : > { %2227 = vmatpush1.bf16.msra.mxu0 %v7529_v14  ;;  %v8448_v16 = vpop.f32.mrb[65].mxu1  ;;  %v6698_v14 = vcombine.high %v2835_v61, %v2837_v0  ;;  %v7555_v61 = vld [vmem:[#allocation5 + $0x14c] ss:$16 sps:$4 sm:$0xff]  }
 0x307   : > { %v8450_v51 = vpop.f32.mrb[66].mxu1  ;;  %2228 = vmatprep.subr.bf16.mxu0 %v7534_v11  ;;  %v2839_v11 = vld [vmem:[#allocation7 + $0x1c0] sm:$0xff] }
 0x308   : > { %v8452_v27 = vpop.f32.mrb[67].mxu1  ;;  %3591 = vmatprep.subr.bf16.mxu1 %v6698_v14  ;;  %v7558_v14 = vld [vmem:[#allocation5 + $0x16c] ss:$16 sps:$4 sm:$0xff]  }
 0x309   : > { %3592 = vmatpush1.bf16.msra.mxu1 %v6697_v10 }
 0x30a   : > { %2229 = vmatpush1.bf16.msra.mxu0 %v7532_v22  ;;  %v2841_v22 = vld [vmem:[#allocation7 + $0x1e0] sm:$0xff] }
 0x30b   : > { %2230 = vmatprep.subr.bf16.mxu0 %v7537_v26  ;;  %v6702_v24 = vcombine.high %v2839_v11, %v2841_v22  ;;  %v7547_v26 = vld [vmem:[#allocation5 + $0x108] ss:$16 sps:$4 sm:$0xff]   ;;  %v6701_v2 = vcombine.low %v2839_v11, %v2841_v22 }
 0x30d   : > { %v8454_v36 = vpop.f32.mrb[68].mxu1  ;;  %3593 = vmatprep.subr.bf16.mxu1 %v6702_v24  ;;  %v7556_v24 = vld [vmem:[#allocation5 + $0x168] ss:$16 sps:$4 sm:$0xff]  }
 0x30e   : > { %2231 = vmatpush1.bf16.msra.mxu0 %v7535_v28  ;;  %v8456_v33 = vpop.f32.mrb[69].mxu1  ;;  %3594 = vmatpush1.bf16.msra.mxu1 %v6701_v2  ;;  %v2849_v2 = vld [vmem:[#allocation7 + $0x260] sm:$0xff] }
 0x30f   : > { %v8458_v44 = vpop.f32.mrb[70].mxu1  ;;  %2232 = vmatprep.subr.bf16.mxu0 %v7540_v30 }
 0x310   : > { %v8460_v47 = vpop.f32.mrb[71].mxu1 }
 0x312   : > { %2233 = vmatpush1.bf16.msra.mxu0 %v7538_v42  ;;  %v7550_v42 = vld [vmem:[#allocation5 + $0x128] ss:$16 sps:$4 sm:$0xff]  }
 0x313   : > { %2234 = vmatprep.subr.bf16.mxu0 %v7543_v45  ;;  %v2843_v45 = vld [vmem:[#allocation7 + $0x200] sm:$0xff] }
 0x315   : > { %v8462_v52 = vpop.f32.mrb[72].mxu1 }
 0x316   : > { %9953 = vst [vmem:[#allocation20_spill] sm:$0xff] %v8462_v52  ;;  %2235 = vmatpush1.bf16.msra.mxu0 %v7541_v49  ;;  %v8464_v58 = vpop.f32.mrb[73].mxu1  ;;  %v2845_v49 = vld [vmem:[#allocation7 + $0x220] sm:$0xff] }
 0x317   : > { %v8466_v1 = vpop.f32.mrb[74].mxu1  ;;  %2236 = vmatprep.subr.bf16.mxu0 %v7546_v59  ;;  %v6706_v0 = vcombine.high %v2843_v45, %v2845_v49  ;;  %v2865_v52 = vld [vmem:[#allocation7 + $0x360] sm:$0xff] }
 0x318   : > { %9954 = vst [vmem:[#allocation21_spill] sm:$0xff] %v8466_v1  ;;  %v8468_v5 = vpop.f32.mrb[75].mxu1  ;;  %v2818_v1 = vld [vmem:[#allocation7 + $0x68] sm:$0xff] }
 0x319   : > { %9955 = vst [vmem:[#allocation22_spill] sm:$0xff] %v8468_v5  ;;  %3595 = vmatprep.subr.bf16.mxu1 %v6706_v0  ;;  %v2820_v5 = vld [vmem:[#allocation7 + $0x88] sm:$0xff] }
 0x31a   : > { %2237 = vmatpush1.bf16.msra.mxu0 %v7544_v63  ;;  %v6705_v63 = vcombine.low %v2843_v45, %v2845_v49  ;;  %v7561_v45 = vld [vmem:[#allocation5 + $0x18c] ss:$16 sps:$4 sm:$0xff]  }
 0x31b   : > { %2238 = vmatprep.subr.bf16.mxu0 %v7549_v6  ;;  %v7553_v6 = vld [vmem:[#allocation5 + $0x148] ss:$16 sps:$4 sm:$0xff]  }
 0x31c   : > { %3596 = vmatpush1.bf16.msra.mxu1 %v6705_v63 }
 0x31d   : > { %v8470_v28 = vpop.f32.mrb[76].mxu1 }
 0x31e   : > { %9956 = vst [vmem:[#allocation23_spill] sm:$0xff] %v8470_v28  ;;  %2239 = vmatpush1.bf16.msra.mxu0 %v7547_v26  ;;  %v8472_v30 = vpop.f32.mrb[77].mxu1  ;;  %v2847_v26 = vld [vmem:[#allocation7 + $0x240] sm:$0xff] }
 0x31f   : > { %9957 = vst [vmem:[#allocation24_spill] sm:$0xff] %v8472_v30  ;;  %v8474_v59 = vpop.f32.mrb[78].mxu1  ;;  %2240 = vmatprep.subr.bf16.mxu0 %v7552_v54  ;;  %v6709_v49 = vcombine.low %v2847_v26, %v2849_v2  ;;  %v2857_v28 = vld [vmem:[#allocation7 + $0x2e0] sm:$0xff] }
 0x320   : > { %9958 = vst [vmem:[#allocation25_spill] sm:$0xff] %v8474_v59  ;;  %v8476_v10 = vpop.f32.mrb[79].mxu1  ;;  %v6710_v59 = vcombine.high %v2847_v26, %v2849_v2  ;;  %v7567_v26 = vld [vmem:[#allocation5 + $0x1cc] ss:$16 sps:$4 sm:$0xff]  }
 0x321   : > { %9959 = vst [vmem:[#allocation26_spill] sm:$0xff] %v8476_v10 }
 0x322   : > { %2241 = vmatpush1.bf16.msra.mxu0 %v7550_v42  ;;  %3597 = vmatprep.subr.bf16.mxu1 %v6710_v59  ;;  %v7559_v42 = vld [vmem:[#allocation5 + $0x188] ss:$16 sps:$4 sm:$0xff]  }
 0x323   : > { %2242 = vmatprep.subr.bf16.mxu0 %v7555_v61  ;;  %3598 = vmatpush1.bf16.msra.mxu1 %v6709_v49  ;;  %v7564_v61 = vld [vmem:[#allocation5 + $0x1ac] ss:$16 sps:$4 sm:$0xff]  }
 0x324   : > { %v2812_v49 = vld [vmem:[#allocation7 + $0x8] sm:$0xff] }
 0x325   : > { %v8478_v11 = vpop.f32.mrb[80].mxu1 }
 0x326   : > { %9960 = vst [vmem:[#allocation27_spill] sm:$0xff] %v8478_v11  ;;  %2243 = vmatpush1.bf16.msra.mxu0 %v7553_v6  ;;  %v8480_v22 = vpop.f32.mrb[81].mxu1  ;;  %v7562_v11 = vld [vmem:[#allocation5 + $0x1a8] ss:$16 sps:$4 sm:$0xff]  }
 0x327   : > { %9961 = vst [vmem:[#allocation28_spill] sm:$0xff] %v8480_v22  ;;  %v8482_v54 = vpop.f32.mrb[82].mxu1  ;;  %2244 = vmatprep.subr.bf16.mxu0 %v7558_v14  ;;  %v2851_v22 = vld [vmem:[#allocation7 + $0x280] sm:$0xff] }
 0x328   : > { %9962 = vst [vmem:[#allocation29_spill] sm:$0xff] %v8482_v54  ;;  %v8484_v0 = vpop.f32.mrb[83].mxu1  ;;  %v2853_v54 = vld [vmem:[#allocation7 + $0x2a0] sm:$0xff] }
 0x329   : > { %9963 = vst [vmem:[#allocation30_spill] sm:$0xff] %v8484_v0  ;;  %v6713_v2 = vcombine.low %v2851_v22, %v2853_v54  ;;  %v6714_v0 = vcombine.high %v2851_v22, %v2853_v54  ;;  %v2859_v54 = vld [vmem:[#allocation7 + $0x300] sm:$0xff] }
 0x32a   : > { %2245 = vmatpush1.bf16.msra.mxu0 %v7556_v24  ;;  %v7565_v24 = vld [vmem:[#allocation5 + $0x1c8] ss:$16 sps:$4 sm:$0xff]  }
 0x32b   : > { %2246 = vmatprep.subr.bf16.mxu0 %v7561_v45  ;;  %3599 = vmatprep.subr.bf16.mxu1 %v6714_v0  ;;  %v7570_v45 = vld [vmem:[#allocation5 + $0x1ec] ss:$16 sps:$4 sm:$0xff]  }
 0x32c   : > { %3600 = vmatpush1.bf16.msra.mxu1 %v6713_v2 }
 0x32d   : > { %v8486_v63 = vpop.f32.mrb[84].mxu1 }
 0x32e   : > { %9964 = vst [vmem:[#allocation31_spill] sm:$0xff] %v8486_v63  ;;  %2247 = vmatpush1.bf16.msra.mxu0 %v7559_v42  ;;  %v8488_v6 = vpop.f32.mrb[85].mxu1  ;;  %v2814_v42 = vld [vmem:[#allocation7 + $0x28] sm:$0xff] }
 0x32f   : > { %9965 = vst [vmem:[#allocation32_spill] sm:$0xff] %v8488_v6  ;;  %v8490_v14 = vpop.f32.mrb[86].mxu1  ;;  %2248 = vmatprep.subr.bf16.mxu0 %v7564_v61  ;;  %v2855_v6 = vld [vmem:[#allocation7 + $0x2c0] sm:$0xff]  ;;  %v7568_v61 = vld [vmem:[#allocation5 + $0x1e8] ss:$16 sps:$4 sm:$0xff]  }
 0x330   : > { %9966 = vst [vmem:[#allocation33_spill] sm:$0xff] %v8490_v14  ;;  %v8492_v59 = vpop.f32.mrb[87].mxu1  ;;  %v6717_v10 = vcombine.low %v2855_v6, %v2857_v28  ;;  %v6718_v22 = vcombine.high %v2855_v6, %v2857_v28 }
 0x331   : > { %9967 = vst [vmem:[#allocation34_spill] sm:$0xff] %v8492_v59  ;;  %v2861_v59 = vld [vmem:[#allocation7 + $0x320] sm:$0xff] }
 0x332   : > { %2249 = vmatpush1.bf16.msra.mxu0 %v7562_v11  ;;  %v6676_v11 = vcombine.high %v2812_v49, %v2814_v42  ;;  %v6722_v2 = vcombine.high %v2859_v54, %v2861_v59  ;;  %3601 = vmatprep.subr.bf16.mxu1 %v6718_v22 }
 0x333   : > { %2250 = vmatprep.subr.bf16.mxu0 %v7567_v26  ;;  %v2816_v26 = vld [vmem:[#allocation7 + $0x48] sm:$0xff]  ;;  %3602 = vmatpush1.bf16.msra.mxu1 %v6717_v10 }
 0x334   : > { %3603 = vmatprep.subr.bf16.mxu1 %v6722_v2  ;;  %v6680_v28 = vcombine.high %v2816_v26, %v2818_v1  ;;  %v6679_v10 = vcombine.low %v2816_v26, %v2818_v1 }
 0x335   : > { %v8494_v63 = vpop.f32.mrb[88].mxu1 }
 0x336   : > { %9968 = vst [vmem:[#allocation35_spill] sm:$0xff] %v8494_v63  ;;  %2251 = vmatpush1.bf16.msra.mxu0 %v7565_v24  ;;  %v8496_v14 = vpop.f32.mrb[89].mxu1  ;;  %v2863_v63 = vld [vmem:[#allocation7 + $0x340] sm:$0xff]  ;;  %v6721_v24 = vcombine.low %v2859_v54, %v2861_v59  ;;  %v2826_v54 = vld [vmem:[#allocation7 + $0xe8] sm:$0xff] }
 0x337   : > { %9969 = vst [vmem:[#allocation36_spill] sm:$0xff] %v8496_v14  ;;  %v8498_v0 = vpop.f32.mrb[90].mxu1  ;;  %2252 = vmatprep.subr.bf16.mxu0 %v7570_v45  ;;  %v6675_v14 = vcombine.low %v2812_v49, %v2814_v42  ;;  %v6726_v6 = vcombine.high %v2863_v63, %v2865_v52 }
 0x338   : > { %9970 = vst [vmem:[#allocation37_spill] sm:$0xff] %v8498_v0  ;;  %v8500_v30 = vpop.f32.mrb[91].mxu1  ;;  %v2822_v0 = vld [vmem:[#allocation7 + $0xa8] sm:$0xff]  ;;  %3604 = vmatpush1.bf16.msra.mxu1 %v6721_v24 }
 0x339   : > { %9971 = vst [vmem:[#allocation38_spill] sm:$0xff] %v8500_v30  ;;  %v6725_v30 = vcombine.low %v2863_v63, %v2865_v52  ;;  %v6684_v49 = vcombine.high %v2820_v5, %v2822_v0  ;;  %3605 = vmatprep.subr.bf16.mxu1 %v6726_v6  ;;  %v2828_v63 = vld [vmem:[#allocation7 + $0x108] sm:$0xff] }
 0x33a   : > { %2253 = vmatpush1.bf16.msra.mxu0 %v7568_v61  ;;  %v2824_v61 = vld [vmem:[#allocation7 + $0xc8] sm:$0xff] }
 0x33b   : > { %3965 = vmatprep.subr.bf16.mxu0 %v6676_v11  ;;  %v6688_v52 = vcombine.high %v2824_v61, %v2826_v54  ;;  %v6687_v11 = vcombine.low %v2824_v61, %v2826_v54  ;;  %v2838_v6 = vld [vmem:[#allocation7 + $0x1a8] sm:$0xff] }
 0x33c   : > { %3606 = vmatpush1.bf16.msra.mxu1 %v6725_v30 }
 0x33d   : > { %2255 = vmatmul.mubr.bf16.vlgmr.msra.gmra.mrb[40].mxu0 %v8161_v53  ;;  %v8503_v45 = vpop.f32.mrb[92].mxu1  ;;  %v6683_v53 = vcombine.low %v2820_v5, %v2822_v0  ;;  %v2832_v5 = vld [vmem:[#allocation7 + $0x148] sm:$0xff] }
 0x33e   : > { %2264 = vmatprep.mubr.bf16.mxu0 %v8191_v23  ;;  %v8506_v22 = vpop.f32.mrb[93].mxu1  ;;  %3966 = vmatpush1.bf16.msra.mxu0 %v6675_v14  ;;  %v2830_v23 = vld [vmem:[#allocation7 + $0x128] sm:$0xff] }
 0x33f   : > { %v8508_v59 = vpop.f32.mrb[94].mxu1  ;;  %3967 = vmatprep.subr.bf16.mxu0 %v6680_v28  ;;  %v6692_v30 = vcombine.high %v2828_v63, %v2830_v23  ;;  %v2834_v0 = vld [vmem:[#allocation7 + $0x168] sm:$0xff]  ;;  %v6691_v24 = vcombine.low %v2828_v63, %v2830_v23 }
 0x340   : > { %v8510_v42 = vpop.f32.mrb[95].mxu1  ;;  %v2836_v28 = vld [vmem:[#allocation7 + $0x188] sm:$0xff] }
 0x341   : > { %v6700_v54 = vcombine.high %v2836_v28, %v2838_v6  ;;  %v2842_v63 = vld [vmem:[#allocation7 + $0x1e8] sm:$0xff]  ;;  %v6699_v23 = vcombine.low %v2836_v28, %v2838_v6 }
 0x342   : > { %3968 = vmatpush1.bf16.msra.mxu0 %v6679_v10  ;;  %v2848_v28 = vld [vmem:[#allocation7 + $0x248] sm:$0xff] }
 0x343   : > { %3969 = vmatprep.subr.bf16.mxu0 %v6684_v49  ;;  %v6695_v49 = vcombine.low %v2832_v5, %v2834_v0  ;;  %v2850_v6 = vld [vmem:[#allocation7 + $0x268] sm:$0xff] }
 0x345   : > { %2265 = vmatmul.mubr.bf16.gmra.mrb[44].mxu0 %v8183_v3  ;;  %v8513_v14 = vpop.f32.mrb[96].mxu1  ;;  %v6696_v3 = vcombine.high %v2832_v5, %v2834_v0 }
 0x346   : > { %2274 = vmatprep.mubr.bf16.mxu0 %v8204_v37  ;;  %v8516_v1 = vpop.f32.mrb[97].mxu1  ;;  %3970 = vmatpush1.bf16.msra.mxu0 %v6683_v53 }
 0x347   : > { %v8518_v26 = vpop.f32.mrb[98].mxu1  ;;  %3971 = vmatprep.subr.bf16.mxu0 %v6688_v52  ;;  %v2840_v52 = vld [vmem:[#allocation7 + $0x1c8] sm:$0xff] }
 0x348   : > { %v8520_v2 = vpop.f32.mrb[99].mxu1  ;;  %v6703_v0 = vcombine.low %v2840_v52, %v2842_v63 }
 0x34a   : > { %3972 = vmatpush1.bf16.msra.mxu0 %v6687_v11  ;;  %v2844_v11 = vld [vmem:[#allocation7 + $0x208] sm:$0xff] }
 0x34b   : > { %3973 = vmatprep.subr.bf16.mxu0 %v6692_v30  ;;  %v2846_v30 = vld [vmem:[#allocation7 + $0x228] sm:$0xff] }
 0x34d   : > { %2275 = vmatmul.mubr.bf16.gmra.mrb[48].mxu0 %v8202_v35  ;;  %v8523_v37 = vpop.f32.mrb[100].mxu1  ;;  %v6704_v35 = vcombine.high %v2840_v52, %v2842_v63 }
 0x34e   : > { %9972 = vst [vmem:[#allocation39_spill] sm:$0xff] %v8523_v37  ;;  %2284 = vmatprep.mubr.bf16.mxu0 %v8214_v57  ;;  %v8526_v10 = vpop.f32.mrb[101].mxu1  ;;  %3974 = vmatpush1.bf16.msra.mxu0 %v6691_v24  ;;  %v2852_v37 = vld [vmem:[#allocation7 + $0x288] sm:$0xff] }
 0x34f   : > { %v8528_v61 = vpop.f32.mrb[102].mxu1  ;;  %3975 = vmatprep.subr.bf16.mxu0 %v6696_v3  ;;  %v6708_v3 = vcombine.high %v2844_v11, %v2846_v30 }
 0x350   : > { %9973 = vst [vmem:[#allocation40_spill] sm:$0xff] %v8528_v61  ;;  %v8530_v53 = vpop.f32.mrb[103].mxu1  ;;  %v2867_v61 = vld [vmem:[#allocation7 + $0x380] sm:$0xff] }
 0x351   : > { %9974 = vst [vmem:[#allocation41_spill] sm:$0xff] %v8530_v53 }
 0x352   : > { %3976 = vmatpush1.bf16.msra.mxu0 %v6695_v49 }
 0x353   : > { %3977 = vmatprep.subr.bf16.mxu0 %v6700_v54  ;;  %v6707_v54 = vcombine.low %v2844_v11, %v2846_v30  ;;  %v6711_v11 = vcombine.low %v2848_v28, %v2850_v6 }
 0x355   : > { %2285 = vmatmul.mubr.bf16.gmra.mrb[52].mxu0 %v8212_v55  ;;  %v8533_v57 = vpop.f32.mrb[104].mxu1  ;;  %v6712_v55 = vcombine.high %v2848_v28, %v2850_v6  ;;  %v8552_v28 = vld [vmem:[#allocation7 + $0x400] sm:$0xff] }
 0x356   : > { %9975 = vst [vmem:[#allocation42_spill] sm:$0xff] %v8533_v57  ;;  %2294 = vmatprep.mubr.bf16.mxu0 %v8224_v12  ;;  %v8536_v5 = vpop.f32.mrb[105].mxu1  ;;  %3978 = vmatpush1.bf16.msra.mxu0 %v6699_v23  ;;  %v2869_v57 = vld [vmem:[#allocation7 + $0x3a0] sm:$0xff]  ;;  %v2854_v12 = vld [vmem:[#allocation7 + $0x2a8] sm:$0xff] }
 0x357   : > { %9976 = vst [vmem:[#allocation43_spill] sm:$0xff] %v8536_v5  ;;  %v8538_v24 = vpop.f32.mrb[106].mxu1  ;;  %3979 = vmatprep.subr.bf16.mxu0 %v6704_v35  ;;  %v6730_v53 = vcombine.high %v2867_v61, %v2869_v57  ;;  %v6729_v63 = vcombine.low %v2867_v61, %v2869_v57  ;;  %v2871_v23 = vld [vmem:[#allocation7 + $0x3c0] sm:$0xff]  ;;  %v2858_v5 = vld [vmem:[#allocation7 + $0x2e8] sm:$0xff]  ;;  %v6715_v57 = vcombine.low %v2852_v37, %v2854_v12 }
 0x358   : > { %9977 = vst [vmem:[#allocation44_spill] sm:$0xff] %v8538_v24  ;;  %v8540_v49 = vpop.f32.mrb[107].mxu1  ;;  %v2873_v35 = vld [vmem:[#allocation7 + $0x3e0] sm:$0xff] }
 0x359   : > { %9978 = vst [vmem:[#allocation45_spill] sm:$0xff] %v8540_v49  ;;  %v6734_v30 = vcombine.high %v2871_v23, %v2873_v35  ;;  %3607 = vmatprep.subr.bf16.mxu1 %v6730_v53  ;;  %v6733_v61 = vcombine.low %v2871_v23, %v2873_v35  ;;  %v8554_v6 = vld [vmem:[#allocation7 + $0x420] sm:$0xff] }
 0x35a   : > { %3980 = vmatpush1.bf16.msra.mxu0 %v6703_v0  ;;  %3608 = vmatpush1.bf16.msra.mxu1 %v6729_v63  ;;  %v6738_v63 = vcombine.high %v8552_v28, %v8554_v6 }
 0x35b   : > { %3981 = vmatprep.subr.bf16.mxu0 %v6708_v3  ;;  %v6716_v3 = vcombine.high %v2852_v37, %v2854_v12  ;;  %3609 = vmatprep.subr.bf16.mxu1 %v6734_v30  ;;  %v2866_v30 = vld [vmem:[#allocation7 + $0x368] sm:$0xff] }
 0x35d   : > { %2295 = vmatmul.mubr.bf16.gmra.mrb[56].mxu0 %v8222_v8  ;;  %v8543_v52 = vpop.f32.mrb[108].mxu1  ;;  %v2856_v8 = vld [vmem:[#allocation7 + $0x2c8] sm:$0xff] }
 0x35e   : > { %9979 = vst [vmem:[#allocation46_spill] sm:$0xff] %v8543_v52  ;;  %2304 = vmatprep.mubr.bf16.mxu0 %v8234_v25  ;;  %v8546_v24 = vpop.f32.mrb[109].mxu1  ;;  %3982 = vmatpush1.bf16.msra.mxu0 %v6707_v54  ;;  %v6720_v25 = vcombine.high %v2856_v8, %v2858_v5  ;;  %v2860_v52 = vld [vmem:[#allocation7 + $0x308] sm:$0xff]  ;;  %v6719_v12 = vcombine.low %v2856_v8, %v2858_v5 }
 0x35f   : > { %v8548_v0 = vpop.f32.mrb[110].mxu1  ;;  %3983 = vmatprep.subr.bf16.mxu0 %v6712_v55  ;;  %v2862_v54 = vld [vmem:[#allocation7 + $0x328] sm:$0xff]  ;;  %3610 = vmatpush1.bf16.msra.mxu1 %v6733_v61 }
 0x360   : > { %v8550_v49 = vpop.f32.mrb[111].mxu1  ;;  %v6724_v35 = vcombine.high %v2860_v52, %v2862_v54  ;;  %3772 = vmatprep.subr.bf16.mxu1 %v6738_v63  ;;  %v2868_v55 = vld [vmem:[#allocation7 + $0x388] sm:$0xff] }
 0x362   : > { %3984 = vmatpush1.bf16.msra.mxu0 %v6711_v11  ;;  %v2864_v11 = vld [vmem:[#allocation7 + $0x348] sm:$0xff] }
 0x363   : > { %3985 = vmatprep.subr.bf16.mxu0 %v6716_v3  ;;  %v6723_v3 = vcombine.low %v2860_v52, %v2862_v54  ;;  %v6728_v61 = vcombine.high %v2864_v11, %v2866_v30  ;;  %v6727_v8 = vcombine.low %v2864_v11, %v2866_v30  ;;  %v2872_v52 = vld [vmem:[#allocation7 + $0x3c8] sm:$0xff] }
 0x364   : > { %v2874_v54 = vld [vmem:[#allocation7 + $0x3e8] sm:$0xff] }
 0x365   : > { %2305 = vmatmul.mubr.bf16.gmra.mrb[60].mxu0 %v8232_v9  ;;  %v8557_v53 = vpop.f32.mrb[112].mxu1  ;;  %v6735_v11 = vcombine.low %v2872_v52, %v2874_v54 }
 0x366   : > { %9980 = vst [vmem:[#allocation47_spill] sm:$0xff] %v8557_v53  ;;  %2314 = vmatprep.mubr.bf16.mxu0 %v8244_v40  ;;  %v8564_v37 = vpop.f32.mrb[113].mxu1  ;;  %3986 = vmatpush1.bf16.msra.mxu0 %v6715_v57  ;;  %v2870_v53 = vld [vmem:[#allocation7 + $0x3a8] sm:$0xff] }
 0x367   : > { %9981 = vst [vmem:[#allocation48_spill] sm:$0xff] %v8564_v37  ;;  %v8566_v23 = vpop.f32.mrb[114].mxu1  ;;  %3987 = vmatprep.subr.bf16.mxu0 %v6720_v25  ;;  %v6732_v25 = vcombine.high %v2868_v55, %v2870_v53 }
 0x368   : > { %9982 = vst [vmem:[#allocation49_spill] sm:$0xff] %v8566_v23  ;;  %v8568_v9 = vpop.f32.mrb[115].mxu1 }
 0x369   : > { %9983 = vst [vmem:[#allocation50_spill] sm:$0xff] %v8568_v9  ;;  %v10010_v9 = vld [vmem:[#allocation22_spill] sm:$0xff] }
 0x36a   : > { %3988 = vmatpush1.bf16.msra.mxu0 %v6719_v12  ;;  %v6731_v12 = vcombine.low %v2868_v55, %v2870_v53  ;;  %v8596_v55 = vld [vmem:[#allocation7 + $0x408] sm:$0xff] }
 0x36b   : > { %3989 = vmatprep.subr.bf16.mxu0 %v6724_v35 }
 0x36d   : > { %2315 = vmatmul.mubr.bf16.gmra.mrb[64].mxu0 %v8242_v38  ;;  %v8571_v40 = vpop.f32.mrb[116].mxu1  ;;  %v6736_v38 = vcombine.high %v2872_v52, %v2874_v54 }
 0x36e   : > { %9984 = vst [vmem:[#allocation51_spill] sm:$0xff] %v8571_v40  ;;  %2324 = vmatprep.mubr.bf16.mxu0 %v8258_v62  ;;  %v8574_v5 = vpop.f32.mrb[117].mxu1  ;;  %3990 = vmatpush1.bf16.msra.mxu0 %v6723_v3 }
 0x36f   : > { %9985 = vst [vmem:[#allocation52_spill] sm:$0xff] %v8574_v5  ;;  %v8576_v57 = vpop.f32.mrb[118].mxu1  ;;  %3991 = vmatprep.subr.bf16.mxu0 %v6728_v61  ;;  %v8600_v61 = vld [vmem:[#allocation7 + $0x428] sm:$0xff] }
 0x370   : > { %9986 = vst [vmem:[#allocation53_spill] sm:$0xff] %v8576_v57  ;;  %v8578_v63 = vpop.f32.mrb[119].mxu1  ;;  %v8717_v5 = vld [vmem:[#allocation7 + $0x568] sm:$0xff] }
 0x371   : > { %9987 = vst [vmem:[#allocation54_spill] sm:$0xff] %v8578_v63  ;;  %v8713_v63 = vld [vmem:[#allocation7 + $0x528] sm:$0xff] }
 0x372   : > { %3992 = vmatpush1.bf16.msra.mxu0 %v6727_v8 }
 0x373   : > { %3993 = vmatprep.subr.bf16.mxu0 %v6732_v25 }
 0x375   : > { %2325 = vmatmul.mubr.bf16.gmra.mrb[68].mxu0 %v8254_v60  ;;  %v8581_v35 = vpop.f32.mrb[120].mxu1 }
 0x376   : > { %9988 = vst [vmem:[#allocation55_spill] sm:$0xff] %v8581_v35  ;;  %2334 = vmatprep.mubr.bf16.mxu0 %v8268_v17  ;;  %v8584_v62 = vpop.f32.mrb[121].mxu1  ;;  %3994 = vmatpush1.bf16.msra.mxu0 %v6731_v12  ;;  %v8693_v35 = vld [vmem:[#allocation7 + $0x4e8] sm:$0xff] }
 0x377   : > { %9989 = vst [vmem:[#allocation56_spill] sm:$0xff] %v8584_v62  ;;  %v8586_v30 = vpop.f32.mrb[122].mxu1  ;;  %3995 = vmatprep.subr.bf16.mxu0 %v6736_v38  ;;  %v8707_v62 = vld [vmem:[#allocation7 + $0x508] sm:$0xff] }
 0x378   : > { %9990 = vst [vmem:[#allocation57_spill] sm:$0xff] %v8586_v30  ;;  %v8588_v3 = vpop.f32.mrb[123].mxu1  ;;  %v8689_v30 = vld [vmem:[#allocation7 + $0x5e0] sm:$0xff] }
 0x379   : > { %9991 = vst [vmem:[#allocation58_spill] sm:$0xff] %v8588_v3  ;;  %10001 = vst [vmem:[#allocation68_spill] sm:$0xff] %v8689_v30  ;;  %v8729_v3 = vld [vmem:[#allocation7 + $0x5a8] sm:$0xff] }
 0x37a   : > { %3996 = vmatpush1.bf16.msra.mxu0 %v6735_v11  ;;  %10005 = vst [vmem:[#allocation72_spill] sm:$0xff] %v8729_v3  ;;  %v8739_v30 = vld [vmem:[#allocation7 + $0x5c8] sm:$0xff] }
 0x37b   : > { %10008 = vst [vmem:[#allocation75_spill] sm:$0xff] %v8739_v30 }
 0x37d   : > { %2335 = vmatmul.mubr.bf16.gmra.mrb[72].mxu0 %v8266_v15  ;;  %v8591_v53 = vpop.f32.mrb[124].mxu1  ;;  %v6740_v15 = vcombine.high %v8596_v55, %v8600_v61 }
 0x37e   : > { %9992 = vst [vmem:[#allocation59_spill] sm:$0xff] %v8591_v53  ;;  %2344 = vmatprep.mubr.bf16.mxu0 %v8278_v31  ;;  %v8594_v60 = vpop.f32.mrb[125].mxu1  ;;  %v1174_v31 = vld [vmem:[%s9801_s7] sm:$0xf] }
 0x37f   : > { %9993 = vst [vmem:[#allocation60_spill] sm:$0xff] %v8594_v60  ;;  %v8598_v17 = vpop.f32.mrb[126].mxu1  ;;  %4158 = vmatprep.subr.bf16.mxu0 %v6740_v15  ;;  %v1179_v52 = vrot.slane %v1174_v31, %v8131_v46  ;;  %v1183_v54 = vrot.slane %v1174_v31, %v8137_v48  ;;  %v8683_v53 = vld [vmem:[#allocation7 + $0x5c0] sm:$0xff] }
 0x380   : > { %9994 = vst [vmem:[#allocation61_spill] sm:$0xff] %v8598_v17  ;;  %v8602_v8 = vpop.f32.mrb[127].mxu1  ;;  %10000 = vst [vmem:[#allocation67_spill] sm:$0xff] %v8683_v53 }
 0x381   : > { %9995 = vst [vmem:[#allocation62_spill] sm:$0xff] %v8602_v8 }
 0x385   : > { %2345 = vmatmul.mubr.bf16.gmra.mrb[76].mxu0 %v8276_v29 }
 0x386   : > { %2354 = vmatprep.mubr.bf16.mxu0 %v8288_v56  ;;  %v7737_v56 = vmov 1966171168  }
 0x38d   : > { %2355 = vmatmul.mubr.bf16.gmra.mrb[80].mxu0 %v8286_v50  ;;  %v8627_v50 = vsub.s32 2, %v8122_v43 }
 0x38e   : > { %2364 = vmatprep.mubr.bf16.mxu0 %v8298_v20  ;;  %v8630_v20 = vsub.s32 3, %v8122_v43 }
 0x38f   : > { %9996 = vst [vmem:[#allocation63_spill] sm:$0xff] %v8627_v50 }
 0x390   : > { %v1565_v12 = vpop.f32.mrb[32].mxu0  ;;  %9997 = vst [vmem:[#allocation64_spill] sm:$0xff] %v8630_v20 }
 0x391   : > { %v1566_v38 = vadd.f32 %v1565_v12, %v1179_v52  ;;  %v1567_v11 = vpop.f32.mrb[33].mxu0  ;;  %v8640_v52 = vld [vmem:[#allocation7 + $0x4a0] sm:$0xff] }
 0x392   : > { %v1568_v15 = vadd.f32 %v1567_v11, %v1183_v54  ;;  %v1569_v25 = vpop.f32.mrb[34].mxu0  ;;  %v8642_v54 = vld [vmem:[#allocation7 + $0x4c0] sm:$0xff] }
 0x393   : > { %v1570_v29 = vpop.f32.mrb[35].mxu0  ;;  %v8638_v25 = vld [vmem:[#allocation7 + $0x480] sm:$0xff] }
 0x394   : > { %v2419_v17 = vcombine.low %v1566_v38, %v1568_v15  ;;  %v8645_v15 = vld [vmem:[#allocation7 + $0x4e0] sm:$0xff] }
 0x395   : > { %2365 = vmatmul.mubr.bf16.gmra.mrb[84].mxu0 %v8296_v18  ;;  %v2422_v18 = vunpack.c.l.s4 %v7737_v56  ;;  %v8649_v29 = vld [vmem:[#allocation7 + $0x520] sm:$0xff] }
 0x396   : > { %2374 = vmatprep.mubr.bf16.mxu0 %v8308_v39 }
 0x397   : > { %v2423_v39 = vunpack.c.0.s8 %v2422_v18  ;;  %v8669_v18 = vld [vmem:[#allocation7 + $0x5a0] sm:$0xff] }
 0x398   : > { %9999 = vst [vmem:[#allocation66_spill] sm:$0xff] %v8669_v18 }
 0x399   : > { %v2426_v12 = vsub.s32 %v2423_v39, %v8122_v43  ;;  %v8679_v39 = vld [vmem:[#allocation7 + $0x488] sm:$0xff]  ;;  %v8703_v43 = vld [vmem:[#allocation7 + $0x600] sm:$0xff] }
 0x39a   : > { %10002 = vst [vmem:[#allocation69_spill] sm:$0xff] %v8703_v43 }
 0x39b   : > { %v2427_v8 = vrot.slane %v2419_v17, %v2426_v12  ;;  %v8715_v17 = vld [vmem:[#allocation7 + $0x548] sm:$0xff] }
 0x39d   : > { %2375 = vmatmul.mubr.bf16.gmra.mrb[88].mxu0 %v8306_v34  ;;  %v1187_v34 = vrot.slane %v1174_v31, %v8627_v50 }
 0x39e   : > { %2384 = vmatprep.mubr.bf16.mxu0 %v8318_v7 }
 0x3a5   : > { %2385 = vmatmul.mubr.bf16.gmra.mrb[92].mxu0 %v8316_v4  ;;  %v1191_v4 = vrot.slane %v1174_v31, %v8630_v20  ;;  %v8647_v31 = vld [vmem:[#allocation7 + $0x500] sm:$0xff]  ;;  %v8657_v20 = vld [vmem:[#allocation7 + $0x448] sm:$0xff] }
 0x3a6   : > { %2394 = vmatprep.mubr.bf16.mxu0 %v8332_v41  ;;  %v8634_v41 = vld [vmem:[#allocation7 + $0x440] sm:$0xff] }
 0x3ad   : > { %2395 = vmatmul.mubr.bf16.gmra.mrb[96].mxu0 %v8329_v32  ;;  %v8636_v32 = vld [vmem:[#allocation7 + $0x460] sm:$0xff] }
 0x3ae   : > { %2404 = vmatprep.mubr.bf16.mxu0 %v8342_v19 }
 0x3b5   : > { %2405 = vmatmul.mubr.bf16.gmra.mrb[100].mxu0 %v8340_v13 }
 0x3d0   : > { %v1606_v7 = vpop.f32.mrb[36].mxu0 }
 0x3d1   : > { %v1607_v19 = vadd.f32 %v1606_v7, %v1187_v34  ;;  %v1608_v13 = vpop.f32.mrb[37].mxu0  ;;  %v8653_v34 = vld [vmem:[#allocation7 + $0x540] sm:$0xff] }
 0x3d2   : > { %v1609_v38 = vadd.f32 %v1608_v13, %v1191_v4  ;;  %v1610_v11 = vpop.f32.mrb[38].mxu0  ;;  %v8655_v7 = vld [vmem:[#allocation7 + $0x560] sm:$0xff]  ;;  %v8681_v13 = vld [vmem:[#allocation7 + $0x4a8] sm:$0xff] }
 0x3d3   : > { %v1611_v56 = vpop.f32.mrb[39].mxu0  ;;  %v8665_v11 = vld [vmem:[#allocation7 + $0x468] sm:$0xff] }
 0x3d4   : > { %v2420_v50 = vcombine.low %v1607_v19, %v1609_v38  ;;  %v8667_v56 = vld [vmem:[#allocation7 + $0x580] sm:$0xff]  ;;  %v8691_v38 = vld [vmem:[#allocation7 + $0x4c8] sm:$0xff] }
 0x3d5   : > { %9998 = vst [vmem:[#allocation65_spill] sm:$0xff] %v8667_v56  ;;  %v8705_v19 = vld [vmem:[#allocation7 + $0x620] sm:$0xff]  ;;  %v8727_v4 = vld [vmem:[#allocation7 + $0x588] sm:$0xff] }
 0x3d6   : > { %v2434_v60 = vrot.slane %v2420_v50, %v2426_v12  ;;  %10003 = vst [vmem:[#allocation70_spill] sm:$0xff] %v8705_v19  ;;  %10004 = vst [vmem:[#allocation71_spill] sm:$0xff] %v8727_v4 }
 0x3d8   : > { %v2435_v57 = vcombine.low %v2427_v8, %v2434_v60  ;;  %v2436_v40 = vcombine.high %v2427_v8, %v2434_v60  ;;  %v8741_v60 = vld [vmem:[#allocation7 + $0x5e8] sm:$0xff] }
 0x3d9   : > { %10009 = vst [vmem:[#allocation76_spill] sm:$0xff] %v8741_v60 }
 0x3da   : > { %v8731_v18 = vrot.slane %v2435_v57, %v2426_v12  ;;  %v8733_v56 = vrot.slane %v2436_v40, %v2426_v12 }
 0x3dc   : > { %10006 = vst [vmem:[#allocation73_spill] sm:$0xff] %v8731_v18  ;;  %10007 = vst [vmem:[#allocation74_spill] sm:$0xff] %v8733_v56  ;;  %v8753_v12 = vrot.slane %v8731_v18, %v8131_v46  ;;  %v8757_v50 = vrot.slane %v8731_v18, %v8137_v48  ;;  %v8765_v40 = vrot.slane %v8733_v56, %v8131_v46 }
 0x3dd   : > { %v8769_v57 = vrot.slane %v8733_v56, %v8137_v48 }
 0x3de   : > { %v2492_v23 = vadd.f32 %v8757_v50, %v8448_v16  ;;  %v2496_v8 = vadd.f32 %v8757_v50, %v8452_v27  ;;  %v2491_v46 = vadd.f32 %v8753_v12, %v8446_v21  ;;  %v2495_v19 = vadd.f32 %v8753_v12, %v8450_v51 }
 0x3df   : > { %v2500_v48 = vadd.f32 %v8757_v50, %v8456_v33  ;;  %v2504_v53 = vadd.f32 %v8757_v50, %v8460_v47  ;;  %v2499_v18 = vadd.f32 %v8753_v12, %v8454_v36  ;;  %v2503_v16 = vadd.f32 %v8753_v12, %v8458_v44 }
 0x3e0   : > { %v2620_v56 = vmax.f32 %v2492_v23, 0.0  ;;  %v2624_v27 = vmax.f32 %v2496_v8, 0.0  ;;  %v2619_v43 = vmax.f32 %v2491_v46, 0.0  ;;  %v2623_v60 = vmax.f32 %v2495_v19, 0.0  ;;  %v10011_v46 = vld [vmem:[#allocation20_spill] sm:$0xff]  ;;  %v10012_v23 = vld [vmem:[#allocation21_spill] sm:$0xff] }
 0x3e1   : > { %v2628_v21 = vmax.f32 %v2500_v48, 0.0  ;;  %v2632_v30 = vmax.f32 %v2504_v53, 0.0  ;;  %v2627_v3 = vmax.f32 %v2499_v18, 0.0  ;;  %v2631_v51 = vmax.f32 %v2503_v16, 0.0  ;;  %v10016_v16 = vld [vmem:[#allocation25_spill] sm:$0xff] }
 0x3e2   : > { %v8791_v4 = vpack.c.bf16 %v2624_v27, %v2620_v56  ;;  %v8793_v33 = vpack.c.bf16 %v2623_v60, %v2619_v43  ;;  %v2508_v47 = vadd.f32 %v8757_v50, %v8464_v58  ;;  %v2512_v36 = vadd.f32 %v8757_v50, %v10010_v9  ;;  %v10013_v58 = vld [vmem:[#allocation24_spill] sm:$0xff]  ;;  %v10014_v9 = vld [vmem:[#allocation26_spill] sm:$0xff]  ;;  %v10015_v60 = vld [vmem:[#allocation23_spill] sm:$0xff] }
 0x3e3   : > { %v8799_v37 = vpack.c.bf16 %v2632_v30, %v2628_v21  ;;  %v8801_v44 = vpack.c.bf16 %v2631_v51, %v2627_v3  ;;  %v2507_v48 = vadd.f32 %v8753_v12, %v10011_v46  ;;  %v2511_v53 = vadd.f32 %v8753_v12, %v10012_v23  ;;  %v10018_v46 = vld [vmem:[#allocation28_spill] sm:$0xff] }
 0x3e4   : > { %3611 = vmatprep.mubr.bf16.mxu1 %v8791_v4  ;;  %3997 = vmatprep.mubr.bf16.mxu0 %v8791_v4  ;;  %v2636_v43 = vmax.f32 %v2508_v47, 0.0  ;;  %v2640_v18 = vmax.f32 %v2512_v36, 0.0  ;;  %v2516_v56 = vadd.f32 %v8757_v50, %v10013_v58  ;;  %v2520_v30 = vadd.f32 %v8757_v50, %v10014_v9 }
 0x3e5   : > { %3612 = vmatmul.mubr.bf16.vlgmr.msra.gmra.mrb[128].mxu1 %v8793_v33  ;;  %3998 = vmatmul.mubr.bf16.vlgmr.msra.gmra.mrb[104].mxu0 %v8793_v33  ;;  %v2635_v3 = vmax.f32 %v2507_v48, 0.0  ;;  %v2639_v19 = vmax.f32 %v2511_v53, 0.0  ;;  %v2515_v8 = vadd.f32 %v8753_v12, %v10015_v60  ;;  %v2519_v27 = vadd.f32 %v8753_v12, %v10016_v16  ;;  %v10022_v60 = vld [vmem:[#allocation29_spill] sm:$0xff] }
 0x3e6   : > { %v10017_v21 = vcombine.low %v8552_v28, %v8554_v6  ;;  %3621 = vmatprep.mubr.bf16.mxu1 %v8799_v37  ;;  %v8823_v51 = vpack.c.bf16 %v2640_v18, %v2636_v43  ;;  %v2644_v47 = vmax.f32 %v2516_v56, 0.0  ;;  %v2648_v36 = vmax.f32 %v2520_v30, 0.0  ;;  %4007 = vmatprep.mubr.bf16.mxu0 %v8799_v37  ;;  %v10020_v6 = vld [vmem:[#allocation30_spill] sm:$0xff]  ;;  %v10021_v56 = vld [vmem:[#allocation27_spill] sm:$0xff] }
 0x3e7   : > { %v2524_v48 = vadd.f32 %v8757_v50, %v10018_v46  ;;  %v10019_v23 = vcombine.high %v8634_v41, %v8636_v32  ;;  %v8831_v53 = vpack.c.bf16 %v2639_v19, %v2635_v3  ;;  %v2643_v58 = vmax.f32 %v2515_v8, 0.0  ;;  %v10024_v8 = vld [vmem:[#allocation32_spill] sm:$0xff]  ;;  %v10025_v46 = vld [vmem:[#allocation34_spill] sm:$0xff] }
 0x3e8   : > { %3773 = vmatpush1.bf16.msra.mxu1 %v10017_v21  ;;  %v2647_v28 = vmax.f32 %v2519_v27, 0.0  ;;  %v2528_v9 = vadd.f32 %v8757_v50, %v10020_v6  ;;  %v8835_v43 = vpack.c.bf16 %v2648_v36, %v2644_v47  ;;  %v2523_v30 = vadd.f32 %v8753_v12, %v10021_v56 }
 0x3e9   : > { %3774 = vmatprep.subr.bf16.mxu1 %v10019_v23  ;;  %v2652_v18 = vmax.f32 %v2524_v48, 0.0  ;;  %v2527_v16 = vadd.f32 %v8753_v12, %v10022_v60  ;;  %v10023_v21 = vcombine.low %v8596_v55, %v8600_v61  ;;  %v2532_v27 = vadd.f32 %v8757_v50, %v10024_v8  ;;  %v10028_v61 = vld [vmem:[#allocation31_spill] sm:$0xff]  ;;  %v10031_v8 = vld [vmem:[#allocation36_spill] sm:$0xff] }
 0x3ea   : > { %v8844_v3 = vpack.c.bf16 %v2647_v28, %v2643_v58  ;;  %v2656_v19 = vmax.f32 %v2528_v9, 0.0  ;;  %v2536_v47 = vadd.f32 %v8757_v50, %v10025_v46  ;;  %v10026_v36 = vcombine.high %v8657_v20, %v8665_v11  ;;  %v10029_v28 = vld [vmem:[#allocation33_spill] sm:$0xff] }
 0x3eb   : > { %4159 = vmatpush1.bf16.msra.mxu0 %v10023_v21  ;;  %v10027_v48 = vcombine.low %v8634_v41, %v8636_v32  ;;  %v2651_v23 = vmax.f32 %v2523_v30, 0.0  ;;  %v2655_v55 = vmax.f32 %v2527_v16, 0.0  ;;  %v2531_v58 = vadd.f32 %v8753_v12, %v10028_v61 }
 0x3ec   : > { %4160 = vmatprep.subr.bf16.mxu0 %v10026_v36  ;;  %v2535_v6 = vadd.f32 %v8753_v12, %v10029_v28  ;;  %v10030_v9 = vcombine.high %v8638_v25, %v8640_v52  ;;  %v8863_v56 = vpack.c.bf16 %v2656_v19, %v2652_v18  ;;  %v2660_v60 = vmax.f32 %v2532_v27, 0.0  ;;  %v10034_v36 = vld [vmem:[#allocation38_spill] sm:$0xff]  ;;  %v10036_v27 = vld [vmem:[#allocation35_spill] sm:$0xff] }
 0x3ed   : > { %3775 = vmatpush1.bf16.msra.mxu1 %v10027_v48  ;;  %v2664_v21 = vmax.f32 %v2536_v47, 0.0  ;;  %v2540_v41 = vadd.f32 %v8757_v50, %v10031_v8  ;;  %v8867_v32 = vpack.c.bf16 %v2655_v55, %v2651_v23  ;;  %v2659_v30 = vmax.f32 %v2531_v58, 0.0  ;;  %4008 = vmatmul.mubr.bf16.gmra.mrb[108].mxu0 %v8801_v44  ;;  %v10037_v23 = vld [vmem:[#allocation37_spill] sm:$0xff] }
 0x3ee   : > { %3776 = vmatprep.subr.bf16.mxu1 %v10030_v9  ;;  %v2663_v16 = vmax.f32 %v2535_v6, 0.0  ;;  %v10033_v46 = vcombine.low %v8657_v20, %v8665_v11  ;;  %v2544_v48 = vadd.f32 %v8757_v50, %v10034_v36  ;;  %3622 = vmatmul.mubr.bf16.gmra.mrb[132].mxu1 %v8801_v44  ;;  %v2539_v47 = vadd.f32 %v8753_v12, %v10036_v27 }
 0x3ef   : > { %10032 = vst [vmem:[#allocation22_spill] sm:$0xff] %v8867_v32  ;;  %v8876_v18 = vpack.c.bf16 %v2664_v21, %v2660_v60  ;;  %v2668_v19 = vmax.f32 %v2540_v41, 0.0  ;;  %v2543_v55 = vadd.f32 %v8753_v12, %v10037_v23  ;;  %3631 = vmatprep.mubr.bf16.mxu1 %v8823_v51  ;;  %4017 = vmatprep.mubr.bf16.mxu0 %v8823_v51 }
 0x3f0   : > { %4161 = vmatpush1.bf16.msra.mxu0 %v10033_v46  ;;  %v8884_v20 = vpack.c.bf16 %v2663_v16, %v2659_v30  ;;  %v2672_v11 = vmax.f32 %v2544_v48, 0.0  ;;  %v2548_v61 = vadd.f32 %v8757_v50, %v8506_v22  ;;  %v2552_v58 = vadd.f32 %v8757_v50, %v8510_v42 }
 0x3f1   : > { %10035 = vst [vmem:[#allocation20_spill] sm:$0xff] %v8876_v18  ;;  %v10039_v28 = vcombine.low %v8638_v25, %v8640_v52  ;;  %v10040_v6 = vcombine.high %v8679_v39, %v8681_v13  ;;  %v2667_v9 = vmax.f32 %v2539_v47, 0.0  ;;  %v2671_v60 = vmax.f32 %v2543_v55, 0.0 }
 0x3f2   : > { %10038 = vst [vmem:[#allocation21_spill] sm:$0xff] %v8884_v20  ;;  %v2547_v21 = vadd.f32 %v8753_v12, %v8503_v45  ;;  %v2551_v8 = vadd.f32 %v8753_v12, %v8508_v59  ;;  %v10041_v22 = vcombine.high %v8642_v54, %v8645_v15  ;;  %v8903_v42 = vpack.c.bf16 %v2672_v11, %v2668_v19  ;;  %v10051_v11 = vld [vmem:[#allocation40_spill] sm:$0xff] }
 0x3f3   : > { %3777 = vmatpush1.bf16.msra.mxu1 %v10039_v28  ;;  %4162 = vmatprep.subr.bf16.mxu0 %v10040_v6  ;;  %v10043_v25 = vcombine.low %v8679_v39, %v8681_v13  ;;  %v2676_v52 = vmax.f32 %v2548_v61, 0.0  ;;  %v2680_v50 = vmax.f32 %v2552_v58, 0.0  ;;  %v2556_v41 = vadd.f32 %v8769_v57, %v8516_v1  ;;  %v10052_v6 = vld [vmem:[#allocation43_spill] sm:$0xff] }
 0x3f4   : > { %3778 = vmatprep.subr.bf16.mxu1 %v10041_v22  ;;  %10042 = vst [vmem:[#allocation24_spill] sm:$0xff] %v8903_v42  ;;  %v8910_v30 = vpack.c.bf16 %v2671_v60, %v2667_v9  ;;  %v10044_v45 = vcombine.high %v8691_v38, %v8693_v35  ;;  %v2675_v59 = vmax.f32 %v2547_v21, 0.0  ;;  %v2679_v12 = vmax.f32 %v2551_v8, 0.0  ;;  %v10053_v21 = vld [vmem:[#allocation45_spill] sm:$0xff] }
 0x3f5   : > { %4163 = vmatpush1.bf16.msra.mxu0 %v10043_v25  ;;  %v2560_v16 = vadd.f32 %v8769_v57, %v8520_v2  ;;  %v8917_v46 = vpack.c.bf16 %v2680_v50, %v2676_v52  ;;  %v2684_v39 = vmax.f32 %v2556_v41, 0.0  ;;  %v2555_v13 = vadd.f32 %v8765_v40, %v8513_v14  ;;  %v10047_v2 = vld [vmem:[#allocation41_spill] sm:$0xff]  ;;  %v10056_v41 = vld [vmem:[#allocation42_spill] sm:$0xff] }
 0x3f6   : > { %4164 = vmatprep.subr.bf16.mxu0 %v10044_v45  ;;  %v2559_v1 = vadd.f32 %v8765_v40, %v8518_v26  ;;  %v10046_v36 = vcombine.low %v8642_v54, %v8645_v15  ;;  %v8926_v48 = vpack.c.bf16 %v2679_v12, %v2675_v59  ;;  %v2564_v27 = vadd.f32 %v8769_v57, %v8526_v10  ;;  %v10050_v15 = vld [vmem:[#allocation39_spill] sm:$0xff]  ;;  %v10057_v59 = vld [vmem:[#allocation44_spill] sm:$0xff] }
 0x3f7   : > { %10045 = vst [vmem:[#allocation26_spill] sm:$0xff] %v8917_v46  ;;  %v2688_v19 = vmax.f32 %v2560_v16, 0.0  ;;  %v2568_v47 = vadd.f32 %v8769_v57, %v10047_v2  ;;  %v10048_v23 = vcombine.high %v8647_v31, %v8649_v29  ;;  %v10049_v14 = vcombine.low %v8691_v38, %v8693_v35  ;;  %3632 = vmatmul.mubr.bf16.gmra.mrb[136].mxu1 %v8831_v53  ;;  %v10062_v2 = vld [vmem:[#allocation46_spill] sm:$0xff] }
 0x3f8   : > { %3779 = vmatpush1.bf16.msra.mxu1 %v10046_v36  ;;  %v2683_v26 = vmax.f32 %v2555_v13, 0.0  ;;  %v2687_v54 = vmax.f32 %v2559_v1, 0.0  ;;  %v2563_v55 = vadd.f32 %v8765_v40, %v10050_v15  ;;  %v2567_v61 = vadd.f32 %v8765_v40, %v10051_v11  ;;  %4018 = vmatmul.mubr.bf16.gmra.mrb[112].mxu0 %v8831_v53  ;;  %v10067_v11 = vld [vmem:[#allocation50_spill] sm:$0xff] }
 0x3f9   : > { %3780 = vmatprep.subr.bf16.mxu1 %v10048_v23  ;;  %4165 = vmatpush1.bf16.msra.mxu0 %v10049_v14  ;;  %v8944_v10 = vpack.c.bf16 %v2688_v19, %v2684_v39  ;;  %v2692_v58 = vmax.f32 %v2564_v27, 0.0  ;;  %v2696_v28 = vmax.f32 %v2568_v47, 0.0  ;;  %v2572_v35 = vadd.f32 %v8769_v57, %v10052_v6 }
 0x3fa   : > { %3641 = vmatprep.mubr.bf16.mxu1 %v8835_v43  ;;  %4027 = vmatprep.mubr.bf16.mxu0 %v8835_v43  ;;  %v8950_v38 = vpack.c.bf16 %v2687_v54, %v2683_v26  ;;  %v2691_v9 = vmax.f32 %v2563_v55, 0.0  ;;  %v2695_v60 = vmax.f32 %v2567_v61, 0.0  ;;  %v2576_v8 = vadd.f32 %v8769_v57, %v10053_v21 }
 0x3fb   : > { %v10054_v22 = vcombine.low %v8647_v31, %v8649_v29  ;;  %v10055_v25 = vcombine.high %v8707_v62, %v8713_v63  ;;  %v8960_v52 = vpack.c.bf16 %v2696_v28, %v2692_v58  ;;  %v2700_v50 = vmax.f32 %v2572_v35, 0.0  ;;  %v10068_v58 = vld [vmem:[#allocation65_spill] sm:$0xff] }
 0x3fc   : > { %v2571_v45 = vadd.f32 %v8765_v40, %v10056_v41  ;;  %v2575_v12 = vadd.f32 %v8765_v40, %v10057_v59  ;;  %v10058_v16 = vcombine.high %v8653_v34, %v8655_v7  ;;  %v10059_v31 = vcombine.low %v8707_v62, %v8713_v63  ;;  %v10078_v59 = vld [vmem:[#allocation51_spill] sm:$0xff] }
 0x3fd   : > { %3781 = vmatpush1.bf16.msra.mxu1 %v10054_v22  ;;  %4166 = vmatprep.subr.bf16.mxu0 %v10055_v25  ;;  %v8972_v29 = vpack.c.bf16 %v2695_v60, %v2691_v9  ;;  %v2704_v39 = vmax.f32 %v2576_v8, 0.0  ;;  %v2580_v13 = vadd.f32 %v8769_v57, %v8546_v24  ;;  %v2584_v1 = vadd.f32 %v8769_v57, %v8550_v49  ;;  %v10064_v24 = vld [vmem:[#allocation48_spill] sm:$0xff]  ;;  %v10074_v60 = vld [vmem:[#allocation49_spill] sm:$0xff] }
 0x3fe   : > { %3782 = vmatprep.subr.bf16.mxu1 %v10058_v16  ;;  %4167 = vmatpush1.bf16.msra.mxu0 %v10059_v31  ;;  %v10061_v36 = vcombine.high %v8715_v17, %v8717_v5  ;;  %v2699_v19 = vmax.f32 %v2571_v45, 0.0  ;;  %v2703_v27 = vmax.f32 %v2575_v12, 0.0  ;;  %v2579_v47 = vadd.f32 %v8765_v40, %v10062_v2  ;;  %v10076_v25 = vld [vmem:[#allocation52_spill] sm:$0xff]  ;;  %v10079_v16 = vld [vmem:[#allocation53_spill] sm:$0xff] }
 0x3ff   : > { %10060 = vst [vmem:[#allocation23_spill] sm:$0xff] %v8972_v29  ;;  %v2583_v63 = vadd.f32 %v8765_v40, %v8548_v0  ;;  %v8985_v62 = vpack.c.bf16 %v2704_v39, %v2700_v50  ;;  %v2708_v23 = vmax.f32 %v2580_v13, 0.0  ;;  %v2712_v14 = vmax.f32 %v2584_v1, 0.0  ;;  %v10069_v0 = vld [vmem:[#allocation66_spill] sm:$0xff]  ;;  %3642 = vmatmul.mubr.bf16.gmra.mrb[140].mxu1 %v8844_v3  ;;  %v9025_v13 = vld [vmem:[#allocation7 + $0x640] sm:$0xff]  ;;  %v10081_v1 = vld [vmem:[#allocation71_spill] sm:$0xff] }
 0x400   : > { %4168 = vmatprep.subr.bf16.mxu0 %v10061_v36  ;;  %v2588_v26 = vadd.f32 %v8769_v57, %v10064_v24  ;;  %v10065_v49 = vcombine.low %v8653_v34, %v8655_v7  ;;  %v8992_v54 = vpack.c.bf16 %v2703_v27, %v2699_v19  ;;  %v2707_v15 = vmax.f32 %v2579_v47, 0.0  ;;  %v10073_v34 = vld [vmem:[#allocation47_spill] sm:$0xff]  ;;  %4028 = vmatmul.mubr.bf16.gmra.mrb[116].mxu0 %v8844_v3  ;;  %v10082_v36 = vld [vmem:[#allocation72_spill] sm:$0xff] }
 0x401   : > { %10063 = vst [vmem:[#allocation25_spill] sm:$0xff] %v8985_v62  ;;  %v2711_v55 = vmax.f32 %v2583_v63, 0.0  ;;  %v2592_v61 = vadd.f32 %v8769_v57, %v10067_v11  ;;  %v10070_v28 = vcombine.high %v10068_v58, %v10069_v0  ;;  %v10071_v6 = vcombine.low %v8715_v17, %v8717_v5  ;;  %v10077_v17 = vld [vmem:[#allocation54_spill] sm:$0xff]  ;;  %3651 = vmatprep.mubr.bf16.mxu1 %v8863_v56  ;;  %v10085_v63 = vld [vmem:[#allocation56_spill] sm:$0xff] }
 0x402   : > { %3783 = vmatpush1.bf16.msra.mxu1 %v10065_v49  ;;  %10066 = vst [vmem:[#allocation28_spill] sm:$0xff] %v8992_v54  ;;  %v9002_v35 = vpack.c.bf16 %v2712_v14, %v2708_v23  ;;  %v2716_v9 = vmax.f32 %v2588_v26, 0.0  ;;  %v2587_v7 = vadd.f32 %v8765_v40, %v10073_v34  ;;  %v2591_v21 = vadd.f32 %v8765_v40, %v10074_v60  ;;  %v10086_v14 = vld [vmem:[#allocation67_spill] sm:$0xff]  ;;  %v10087_v24 = vld [vmem:[#allocation68_spill] sm:$0xff]  ;;  %v9037_v49 = vld [vmem:[#allocation7 + $0x660] sm:$0xff] }
 0x403   : > { %3784 = vmatprep.subr.bf16.mxu1 %v10070_v28  ;;  %4169 = vmatpush1.bf16.msra.mxu0 %v10071_v6  ;;  %v9010_v8 = vpack.c.bf16 %v2711_v55, %v2707_v15  ;;  %v2720_v22 = vmax.f32 %v2592_v61, 0.0  ;;  %v2596_v5 = vadd.f32 %v8769_v57, %v10076_v25  ;;  %v2600_v50 = vadd.f32 %v8769_v57, %v10077_v17  ;;  %v2908_v55 = vld [vmem:[#allocation7 + $0x608] sm:$0xff]  ;;  %v10093_v34 = vld [vmem:[#allocation76_spill] sm:$0xff] }
 0x404   : > { %10072 = vst [vmem:[#allocation30_spill] sm:$0xff] %v9002_v35  ;;  %4037 = vmatprep.mubr.bf16.mxu0 %v8863_v56  ;;  %v2715_v41 = vmax.f32 %v2587_v7, 0.0  ;;  %v2719_v45 = vmax.f32 %v2591_v21, 0.0  ;;  %v2595_v12 = vadd.f32 %v8765_v40, %v10078_v59  ;;  %v2599_v31 = vadd.f32 %v8765_v40, %v10079_v16  ;;  %v2910_v11 = vld [vmem:[#allocation7 + $0x628] sm:$0xff] }
 0x405   : > { %10075 = vst [vmem:[#allocation27_spill] sm:$0xff] %v9010_v8  ;;  %v10080_v39 = vcombine.low %v10068_v58, %v10069_v0  ;;  %v10083_v19 = vcombine.high %v10081_v1, %v10082_v36  ;;  %v9030_v27 = vpack.c.bf16 %v2720_v22, %v2716_v9  ;;  %v2724_v2 = vmax.f32 %v2596_v5, 0.0  ;;  %v10091_v28 = vld [vmem:[#allocation58_spill] sm:$0xff]  ;;  %v10092_v9 = vld [vmem:[#allocation75_spill] sm:$0xff]  ;;  %v10097_v5 = vld [vmem:[#allocation57_spill] sm:$0xff] }
 0x406   : > { %v2728_v47 = vmax.f32 %v2600_v50, 0.0  ;;  %v2604_v23 = vadd.f32 %v8769_v57, %v10085_v63  ;;  %v10088_v26 = vcombine.high %v10086_v14, %v10087_v24  ;;  %v10089_v15 = vcombine.low %v10081_v1, %v10082_v36  ;;  %v10096_v22 = vld [vmem:[#allocation55_spill] sm:$0xff]  ;;  %v2912_v50 = vld [vmem:[#allocation7 + $0x648] sm:$0xff]  ;;  %v10102_v63 = vld [vmem:[#allocation69_spill] sm:$0xff] }
 0x407   : > { %3785 = vmatpush1.bf16.msra.mxu1 %v10080_v39  ;;  %4170 = vmatprep.subr.bf16.mxu0 %v10083_v19  ;;  %10084 = vst [vmem:[#allocation29_spill] sm:$0xff] %v9030_v27  ;;  %v9042_v61 = vpack.c.bf16 %v2719_v45, %v2715_v41  ;;  %v2723_v58 = vmax.f32 %v2595_v12, 0.0  ;;  %v2727_v0 = vmax.f32 %v2599_v31, 0.0  ;;  %v2608_v6 = vadd.f32 %v8769_v57, %v10091_v28  ;;  %v2914_v41 = vld [vmem:[#allocation7 + $0x668] sm:$0xff]  ;;  %v10099_v12 = vld [vmem:[#allocation60_spill] sm:$0xff]  ;;  %v2917_v28 = vld [vmem:[#allocation7 + $0x6a0] sm:$0xff] }
 0x408   : > { %3786 = vmatprep.subr.bf16.mxu1 %v10088_v26  ;;  %4171 = vmatpush1.bf16.msra.mxu0 %v10089_v15  ;;  %v10094_v7 = vcombine.high %v10092_v9, %v10093_v34  ;;  %v9049_v60 = vpack.c.bf16 %v2728_v47, %v2724_v2  ;;  %v2732_v21 = vmax.f32 %v2604_v23, 0.0  ;;  %v2603_v25 = vadd.f32 %v8765_v40, %v10096_v22  ;;  %v10100_v31 = vld [vmem:[#allocation62_spill] sm:$0xff]  ;;  %v2915_v15 = vld [vmem:[#allocation7 + $0x680] sm:$0xff]  ;;  %v10108_v22 = vld [vmem:[#allocation59_spill] sm:$0xff] }
 0x409   : > { %10090 = vst [vmem:[#allocation32_spill] sm:$0xff] %v9042_v61  ;;  %v2607_v17 = vadd.f32 %v8765_v40, %v10097_v5  ;;  %v9055_v45 = vpack.c.bf16 %v2727_v0, %v2723_v58  ;;  %v2736_v59 = vmax.f32 %v2608_v6, 0.0  ;;  %v2612_v16 = vadd.f32 %v8769_v57, %v10099_v12  ;;  %v10103_v23 = vld [vmem:[#allocation70_spill] sm:$0xff]  ;;  %3652 = vmatmul.mubr.bf16.gmra.mrb[144].mxu1 %v8867_v32  ;;  %v9080_v5 = vld [vmem:[#allocation7 + $0x10] sm:$0xff] }
 0x40a   : > { %4172 = vmatprep.subr.bf16.mxu0 %v10094_v7  ;;  %10095 = vst [vmem:[#allocation34_spill] sm:$0xff] %v9049_v60  ;;  %v2616_v39 = vadd.f32 %v8769_v57, %v10100_v31  ;;  %v10101_v1 = vcombine.low %v10086_v14, %v10087_v24  ;;  %v6774_v36 = vcombine.high %v9025_v13, %v9037_v49  ;;  %v2731_v2 = vmax.f32 %v2603_v25, 0.0  ;;  %v2916_v31 = vld [vmem:[#allocation7 + $0x688] sm:$0xff] }
 0x40b   : > { %10098 = vst [vmem:[#allocation31_spill] sm:$0xff] %v9055_v45  ;;  %v6772_v19 = vcombine.high %v2908_v55, %v2910_v11  ;;  %v2735_v47 = vmax.f32 %v2607_v17, 0.0  ;;  %v10104_v26 = vcombine.high %v10102_v63, %v10103_v23  ;;  %v10105_v58 = vcombine.low %v10092_v9, %v10093_v34  ;;  %4038 = vmatmul.mubr.bf16.gmra.mrb[120].mxu0 %v8867_v32  ;;  %v9082_v9 = vld [vmem:[#allocation7 + $0x30] sm:$0xff] }
 0x40c   : > { %3787 = vmatpush1.bf16.msra.mxu1 %v10101_v1  ;;  %v6771_v57 = vcombine.low %v2908_v55, %v2910_v11  ;;  %v9072_v0 = vpack.c.bf16 %v2736_v59, %v2732_v21  ;;  %v2740_v14 = vmax.f32 %v2612_v16, 0.0  ;;  %v2744_v24 = vmax.f32 %v2616_v39, 0.0  ;;  %3661 = vmatprep.mubr.bf16.mxu1 %v8876_v18  ;;  %v10110_v11 = vld [vmem:[#allocation61_spill] sm:$0xff]  ;;  %v2918_v39 = vld [vmem:[#allocation7 + $0x6a8] sm:$0xff] }
 0x40d   : > { %3788 = vmatprep.subr.bf16.mxu1 %v10104_v26  ;;  %4173 = vmatpush1.bf16.msra.mxu0 %v10105_v58  ;;  %v6776_v6 = vcombine.high %v2912_v50, %v2914_v41  ;;  %v9076_v7 = vpack.c.bf16 %v2735_v47, %v2731_v2  ;;  %v2611_v25 = vadd.f32 %v8765_v40, %v10108_v22  ;;  %v2919_v47 = vld [vmem:[#allocation7 + $0x6c0] sm:$0xff] }
 0x40e   : > { %10106 = vst [vmem:[#allocation33_spill] sm:$0xff] %v9072_v0  ;;  %4047 = vmatprep.mubr.bf16.mxu0 %v8876_v18  ;;  %v9086_v55 = vpack.c.bf16 %v2744_v24, %v2740_v14  ;;  %v2615_v34 = vadd.f32 %v8765_v40, %v10110_v11  ;;  %v10111_v21 = vcombine.low %v10102_v63, %v10103_v23  ;;  %v9097_v40 = vld [vmem:[#allocation7 + $0x18] sm:$0xff]  ;;  %v2921_v63 = vld [vmem:[#allocation7 + $0x6e0] sm:$0xff] }
 0x40f   : > { %10107 = vst [vmem:[#allocation36_spill] sm:$0xff] %v9076_v7  ;;  %v6773_v17 = vcombine.low %v9025_v13, %v9037_v49  ;;  %4174 = vmatprep.subr.bf16.mxu0 %v6772_v19  ;;  %v2739_v59 = vmax.f32 %v2611_v25, 0.0  ;;  %v6778_v12 = vcombine.high %v2915_v15, %v2917_v28  ;;  %v6775_v16 = vcombine.low %v2912_v50, %v2914_v41  ;;  %v9099_v23 = vld [vmem:[#allocation7 + $0x38] sm:$0xff]  ;;  %v2920_v13 = vld [vmem:[#allocation7 + $0x6c8] sm:$0xff]  ;;  %v2925_v14 = vld [vmem:[#allocation7 + $0x720] sm:$0xff] }
 0x410   : > { %10109 = vst [vmem:[#allocation38_spill] sm:$0xff] %v9086_v55  ;;  %3789 = vmatpush1.bf16.msra.mxu1 %v10111_v21  ;;  %v2743_v1 = vmax.f32 %v2615_v34, 0.0  ;;  %v2922_v49 = vld [vmem:[#allocation7 + $0x6e8] sm:$0xff]  ;;  %v6780_v50 = vcombine.high %v2916_v31, %v2918_v39  ;;  %v9105_v41 = vcombine.low %v9097_v40, %v9099_v23  ;;  %v6782_v26 = vcombine.high %v2919_v47, %v2921_v63  ;;  %v10116_v25 = vld [vmem:[#allocation64_spill] sm:$0xff]  ;;  %v2256_v34 = vpop.f32.mrb[40].mxu0 }
 0x411   : > { %3790 = vmatprep.subr.bf16.mxu1 %v6774_v36  ;;  %4175 = vmatpush1.bf16.msra.mxu0 %v6771_v57  ;;  %v6777_v36 = vcombine.low %v2915_v15, %v2917_v28  ;;  %v6779_v58 = vcombine.low %v2916_v31, %v2918_v39  ;;  %v2923_v57 = vld [vmem:[#allocation7 + $0x700] sm:$0xff]  ;;  %v6784_v24 = vcombine.high %v2920_v13, %v2922_v49  ;;  %v10114_v15 = vld [vmem:[#allocation63_spill] sm:$0xff]  ;;  %v2258_v31 = vpop.f32.mrb[41].mxu0 }
 0x412   : > { %4176 = vmatprep.subr.bf16.mxu0 %v6776_v6  ;;  %v9101_v19 = vpack.c.bf16 %v2743_v1, %v2739_v59  ;;  %10113 = vst [vmem:[#allocation37_spill] sm:$0xff] %v9105_v41  ;;  %3662 = vmatmul.mubr.bf16.gmra.mrb[148].mxu1 %v8884_v20  ;;  %v10115_v28 = vld [vmem:[#allocation73_spill] sm:$0xff]  ;;  %v6781_v22 = vcombine.low %v2919_v47, %v2921_v63  ;;  %v2924_v59 = vld [vmem:[#allocation7 + $0x708] sm:$0xff]  ;;  %v2260_v63 = vpop.f32.mrb[42].mxu0 }
 0x413   : > { %4048 = vmatmul.mubr.bf16.gmra.mrb[124].mxu0 %v8884_v20  ;;  %3671 = vmatprep.mubr.bf16.mxu1 %v8903_v42  ;;  %v9113_v6 = vrot.slane %v10115_v28, %v10114_v15  ;;  %v9117_v11 = vrot.slane %v10115_v28, %v10116_v25  ;;  %v6786_v21 = vcombine.high %v2923_v57, %v2925_v14  ;;  %v2927_v39 = vld [vmem:[#allocation7 + $0x740] sm:$0xff]  ;;  %v2262_v2 = vpop.f32.mrb[43].mxu0 }
 0x414   : > { %10112 = vst [vmem:[#allocation35_spill] sm:$0xff] %v9101_v19  ;;  %3791 = vmatpush1.bf16.msra.mxu1 %v6773_v17  ;;  %4057 = vmatprep.mubr.bf16.mxu0 %v8903_v42  ;;  %v6783_v17 = vcombine.low %v2920_v13, %v2922_v49  ;;  %v2929_v1 = vld [vmem:[#allocation7 + $0x760] sm:$0xff] }
 0x415   : > { %3792 = vmatprep.subr.bf16.mxu1 %v6778_v12  ;;  %4177 = vmatpush1.bf16.msra.mxu0 %v6775_v16  ;;  %v2926_v12 = vld [vmem:[#allocation7 + $0x728] sm:$0xff]  ;;  %v2493_v16 = vadd.f32 %v9113_v6, %v2256_v34  ;;  %v2494_v47 = vadd.f32 %v9117_v11, %v2258_v31  ;;  %v2497_v28 = vadd.f32 %v9113_v6, %v2260_v63  ;;  %v2933_v31 = vld [vmem:[#allocation7 + $0x7a0] sm:$0xff] }
 0x416   : > { %4178 = vmatprep.subr.bf16.mxu0 %v6780_v50  ;;  %v2930_v50 = vld [vmem:[#allocation7 + $0x768] sm:$0xff]  ;;  %v2498_v13 = vadd.f32 %v9117_v11, %v2262_v2  ;;  %v6790_v49 = vcombine.high %v2927_v39, %v2929_v1  ;;  %v6787_v34 = vcombine.low %v2924_v59, %v2926_v12 }
 0x417   : > { %v2621_v42 = vmax.f32 %v2493_v16, 0.0  ;;  %v2625_v20 = vmax.f32 %v2497_v28, 0.0  ;;  %v2622_v63 = vmax.f32 %v2494_v47, 0.0  ;;  %v2935_v28 = vld [vmem:[#allocation7 + $0x7c0] sm:$0xff] }
 0x418   : > { %3793 = vmatpush1.bf16.msra.mxu1 %v6777_v36  ;;  %v2928_v36 = vld [vmem:[#allocation7 + $0x748] sm:$0xff]  ;;  %v2626_v32 = vmax.f32 %v2498_v13, 0.0  ;;  %v2937_v13 = vld [vmem:[#allocation7 + $0x7e0] sm:$0xff] }
 0x419   : > { %3794 = vmatprep.subr.bf16.mxu1 %v6782_v26  ;;  %4179 = vmatpush1.bf16.msra.mxu0 %v6779_v58  ;;  %v6785_v26 = vcombine.low %v2923_v57, %v2925_v14  ;;  %v6788_v58 = vcombine.high %v2924_v59, %v2926_v12  ;;  %v6792_v18 = vcombine.high %v2928_v36, %v2930_v50  ;;  %v2932_v59 = vld [vmem:[#allocation7 + $0x788] sm:$0xff] }
 0x41a   : > { %4180 = vmatprep.subr.bf16.mxu0 %v6784_v24  ;;  %3672 = vmatmul.mubr.bf16.gmra.mrb[152].mxu1 %v8910_v30  ;;  %v2931_v24 = vld [vmem:[#allocation7 + $0x780] sm:$0xff]  ;;  %v9127_v2 = vpack.c.bf16 %v2625_v20, %v2621_v42  ;;  %v6789_v57 = vcombine.low %v2927_v39, %v2929_v1  ;;  %v9129_v14 = vpack.c.bf16 %v2626_v32, %v2622_v63  ;;  %v2934_v12 = vld [vmem:[#allocation7 + $0x7a8] sm:$0xff] }
 0x41b   : > { %4058 = vmatmul.mubr.bf16.gmra.mrb[128].mxu0 %v8910_v30  ;;  %3681 = vmatprep.mubr.bf16.mxu1 %v8917_v46  ;;  %v2936_v39 = vld [vmem:[#allocation7 + $0x7c8] sm:$0xff] }
 0x41c   : > { %3795 = vmatpush1.bf16.msra.mxu1 %v6781_v22  ;;  %4067 = vmatprep.mubr.bf16.mxu0 %v8917_v46  ;;  %10117 = vst [vmem:[#allocation41_spill] sm:$0xff] %v9127_v2  ;;  %10118 = vst [vmem:[#allocation39_spill] sm:$0xff] %v9129_v14  ;;  %v2266_v22 = vpop.f32.mrb[44].mxu0  ;;  %v2938_v1 = vld [vmem:[#allocation7 + $0x7e8] sm:$0xff] }
 0x41d   : > { %3796 = vmatprep.subr.bf16.mxu1 %v6786_v21  ;;  %4181 = vmatpush1.bf16.msra.mxu0 %v6783_v17  ;;  %v6794_v21 = vcombine.high %v2931_v24, %v2933_v31  ;;  %v6791_v17 = vcombine.low %v2928_v36, %v2930_v50  ;;  %v2501_v16 = vadd.f32 %v9113_v6, %v2266_v22  ;;  %v2268_v47 = vpop.f32.mrb[45].mxu0 }
 0x41e   : > { %4182 = vmatprep.subr.bf16.mxu0 %v6788_v58  ;;  %v2502_v20 = vadd.f32 %v9117_v11, %v2268_v47  ;;  %v2270_v42 = vpop.f32.mrb[46].mxu0  ;;  %v6793_v58 = vcombine.low %v2931_v24, %v2933_v31  ;;  %v6798_v50 = vcombine.high %v2935_v28, %v2937_v13  ;;  %v6800_v22 = vcombine.high %v2936_v39, %v2938_v1 }
 0x41f   : > { %v2505_v32 = vadd.f32 %v9113_v6, %v2270_v42  ;;  %v6797_v31 = vcombine.low %v2935_v28, %v2937_v13 }
 0x420   : > { %3797 = vmatpush1.bf16.msra.mxu1 %v6785_v26  ;;  %v2272_v26 = vpop.f32.mrb[47].mxu0  ;;  %v2630_v47 = vmax.f32 %v2502_v20, 0.0 }
 0x421   : > { %3798 = vmatprep.subr.bf16.mxu1 %v6790_v49  ;;  %4183 = vmatpush1.bf16.msra.mxu0 %v6787_v34  ;;  %v6796_v49 = vcombine.high %v2932_v59, %v2934_v12  ;;  %v2506_v36 = vadd.f32 %v9117_v11, %v2272_v26  ;;  %v6795_v34 = vcombine.low %v2932_v59, %v2934_v12  ;;  %v2633_v63 = vmax.f32 %v2505_v32, 0.0 }
 0x422   : > { %4184 = vmatprep.subr.bf16.mxu0 %v6792_v18  ;;  %v2629_v18 = vmax.f32 %v2501_v16, 0.0  ;;  %3682 = vmatmul.mubr.bf16.gmra.mrb[156].mxu1 %v8926_v48  ;;  %v6802_v59 = vcombine.high %v9080_v5, %v9082_v9 }
 0x423   : > { %4068 = vmatmul.mubr.bf16.gmra.mrb[132].mxu0 %v8926_v48  ;;  %v2634_v46 = vmax.f32 %v2506_v36, 0.0  ;;  %3691 = vmatprep.mubr.bf16.mxu1 %v8944_v10 }
 0x424   : > { %3799 = vmatpush1.bf16.msra.mxu1 %v6789_v57  ;;  %4077 = vmatprep.mubr.bf16.mxu0 %v8944_v10  ;;  %v9139_v24 = vpack.c.bf16 %v2633_v63, %v2629_v18 }
 0x425   : > { %3800 = vmatprep.subr.bf16.mxu1 %v6794_v21  ;;  %4185 = vmatpush1.bf16.msra.mxu0 %v6791_v17  ;;  %v9141_v57 = vpack.c.bf16 %v2634_v46, %v2630_v47  ;;  %v2276_v21 = vpop.f32.mrb[48].mxu0  ;;  %v6799_v17 = vcombine.low %v2936_v39, %v2938_v1  ;;  %v9150_v46 = vcombine.high %v9097_v40, %v9099_v23 }
 0x426   : > { %10119 = vst [vmem:[#allocation40_spill] sm:$0xff] %v9139_v24  ;;  %4186 = vmatprep.subr.bf16.mxu0 %v6796_v49  ;;  %v2509_v12 = vadd.f32 %v9113_v6, %v2276_v21  ;;  %v2278_v16 = vpop.f32.mrb[49].mxu0 }
 0x427   : > { %10120 = vst [vmem:[#allocation43_spill] sm:$0xff] %v9141_v57  ;;  %v2510_v20 = vadd.f32 %v9117_v11, %v2278_v16  ;;  %v2280_v42 = vpop.f32.mrb[50].mxu0 }
 0x428   : > { %3801 = vmatpush1.bf16.msra.mxu1 %v6793_v58  ;;  %v2513_v32 = vadd.f32 %v9113_v6, %v2280_v42  ;;  %v2282_v28 = vpop.f32.mrb[51].mxu0  ;;  %v2637_v39 = vmax.f32 %v2509_v12, 0.0 }
 0x429   : > { %3802 = vmatprep.subr.bf16.mxu1 %v6798_v50  ;;  %4187 = vmatpush1.bf16.msra.mxu0 %v6795_v34  ;;  %v2514_v13 = vadd.f32 %v9117_v11, %v2282_v28  ;;  %v2638_v26 = vmax.f32 %v2510_v20, 0.0  ;;  %v2286_v23 = vpop.f32.mrb[52].mxu0 }
 0x42a   : > { %4188 = vmatprep.subr.bf16.mxu0 %v6800_v22  ;;  %v2641_v1 = vmax.f32 %v2513_v32, 0.0  ;;  %3692 = vmatmul.mubr.bf16.gmra.mrb[160].mxu1 %v8950_v38  ;;  %v2517_v36 = vadd.f32 %v9113_v6, %v2286_v23  ;;  %v2288_v50 = vpop.f32.mrb[53].mxu0 }
 0x42b   : > { %4078 = vmatmul.mubr.bf16.gmra.mrb[136].mxu0 %v8950_v38  ;;  %v2642_v58 = vmax.f32 %v2514_v13, 0.0  ;;  %3701 = vmatprep.mubr.bf16.mxu1 %v8960_v52  ;;  %v2518_v34 = vadd.f32 %v9117_v11, %v2288_v50  ;;  %v2290_v18 = vpop.f32.mrb[54].mxu0 }
 0x42c   : > { %3803 = vmatpush1.bf16.msra.mxu1 %v6797_v31  ;;  %4087 = vmatprep.mubr.bf16.mxu0 %v8960_v52  ;;  %v9157_v49 = vpack.c.bf16 %v2641_v1, %v2637_v39  ;;  %v2521_v63 = vadd.f32 %v9113_v6, %v2290_v18  ;;  %v2292_v22 = vpop.f32.mrb[55].mxu0  ;;  %v2645_v31 = vmax.f32 %v2517_v36, 0.0 }
 0x42d   : > { %4189 = vmatpush1.bf16.msra.mxu0 %v6799_v17  ;;  %5373 = vmatprep.subr.bf16.mxu1 %v6802_v59  ;;  %v9160_v40 = vpack.c.bf16 %v2642_v58, %v2638_v26  ;;  %v2522_v47 = vadd.f32 %v9117_v11, %v2292_v22  ;;  %v2646_v17 = vmax.f32 %v2518_v34, 0.0 }
 0x42e   : > { %10121 = vst [vmem:[#allocation45_spill] sm:$0xff] %v9157_v49  ;;  %5759 = vmatprep.subr.bf16.mxu0 %v9150_v46  ;;  %v2649_v21 = vmax.f32 %v2521_v63, 0.0 }
 0x42f   : > { %10122 = vst [vmem:[#allocation42_spill] sm:$0xff] %v9160_v40  ;;  %v2650_v59 = vmax.f32 %v2522_v47, 0.0 }
 0x430   : > { %v9170_v12 = vpack.c.bf16 %v2649_v21, %v2645_v31  ;;  %v2296_v20 = vpop.f32.mrb[56].mxu0 }
 0x431   : > { %v9172_v16 = vpack.c.bf16 %v2650_v59, %v2646_v17  ;;  %v2525_v42 = vadd.f32 %v9113_v6, %v2296_v20  ;;  %v2298_v32 = vpop.f32.mrb[57].mxu0 }
 0x432   : > { %3702 = vmatmul.mubr.bf16.gmra.mrb[164].mxu1 %v8972_v29  ;;  %10123 = vst [vmem:[#allocation44_spill] sm:$0xff] %v9170_v12  ;;  %v2526_v28 = vadd.f32 %v9117_v11, %v2298_v32  ;;  %v2300_v13 = vpop.f32.mrb[58].mxu0 }
 0x433   : > { %4088 = vmatmul.mubr.bf16.gmra.mrb[140].mxu0 %v8972_v29  ;;  %3711 = vmatprep.mubr.bf16.mxu1 %v8985_v62  ;;  %10124 = vst [vmem:[#allocation46_spill] sm:$0xff] %v9172_v16  ;;  %v2529_v39 = vadd.f32 %v9113_v6, %v2300_v13  ;;  %v2302_v1 = vpop.f32.mrb[59].mxu0  ;;  %v2653_v58 = vmax.f32 %v2525_v42, 0.0  ;;  %v4647_v29 = vld [vmem:[#allocation7 + $0x2b0] sm:$0xff] }
 0x434   : > { %4097 = vmatprep.mubr.bf16.mxu0 %v8985_v62  ;;  %v2530_v26 = vadd.f32 %v9117_v11, %v2302_v1  ;;  %v2654_v36 = vmax.f32 %v2526_v28, 0.0 }
 0x435   : > { %v2657_v23 = vmax.f32 %v2529_v39, 0.0 }
 0x436   : > { %v2658_v50 = vmax.f32 %v2530_v26, 0.0 }
 0x437   : > { %v9182_v34 = vpack.c.bf16 %v2657_v23, %v2653_v58 }
 0x438   : > { %v9184_v18 = vpack.c.bf16 %v2658_v50, %v2654_v36  ;;  %v2306_v63 = vpop.f32.mrb[60].mxu0 }
 0x439   : > { %v2533_v22 = vadd.f32 %v9113_v6, %v2306_v63  ;;  %v2308_v47 = vpop.f32.mrb[61].mxu0 }
 0x43a   : > { %3712 = vmatmul.mubr.bf16.gmra.mrb[168].mxu1 %v8992_v54  ;;  %10125 = vst [vmem:[#allocation48_spill] sm:$0xff] %v9184_v18  ;;  %v2534_v31 = vadd.f32 %v9117_v11, %v2308_v47  ;;  %v2310_v21 = vpop.f32.mrb[62].mxu0 }
 0x43b   : > { %4098 = vmatmul.mubr.bf16.gmra.mrb[144].mxu0 %v8992_v54  ;;  %3721 = vmatprep.mubr.bf16.mxu1 %v9002_v35  ;;  %v2537_v17 = vadd.f32 %v9113_v6, %v2310_v21  ;;  %v2312_v59 = vpop.f32.mrb[63].mxu0  ;;  %v2661_v42 = vmax.f32 %v2533_v22, 0.0 }
 0x43c   : > { %4107 = vmatprep.mubr.bf16.mxu0 %v9002_v35  ;;  %v2538_v20 = vadd.f32 %v9117_v11, %v2312_v59  ;;  %v2662_v28 = vmax.f32 %v2534_v31, 0.0  ;;  %v4616_v35 = vld [vmem:[#allocation7 + $0xb8] sm:$0xff] }
 0x43d   : > { %v2665_v32 = vmax.f32 %v2537_v17, 0.0 }
 0x43e   : > { %v2666_v13 = vmax.f32 %v2538_v20, 0.0 }
 0x43f   : > { %v9194_v39 = vpack.c.bf16 %v2665_v32, %v2661_v42 }
 0x440   : > { %v9196_v1 = vpack.c.bf16 %v2666_v13, %v2662_v28  ;;  %v2316_v26 = vpop.f32.mrb[64].mxu0 }
 0x441   : > { %v2541_v58 = vadd.f32 %v9113_v6, %v2316_v26  ;;  %v2318_v23 = vpop.f32.mrb[65].mxu0 }
 0x442   : > { %3722 = vmatmul.mubr.bf16.gmra.mrb[172].mxu1 %v9010_v8  ;;  %10126 = vst [vmem:[#allocation50_spill] sm:$0xff] %v9196_v1  ;;  %v2542_v36 = vadd.f32 %v9117_v11, %v2318_v23  ;;  %v2320_v50 = vpop.f32.mrb[66].mxu0 }
 0x443   : > { %4108 = vmatmul.mubr.bf16.gmra.mrb[148].mxu0 %v9010_v8  ;;  %3731 = vmatprep.mubr.bf16.mxu1 %v9030_v27  ;;  %v2545_v63 = vadd.f32 %v9113_v6, %v2320_v50  ;;  %v2322_v22 = vpop.f32.mrb[67].mxu0  ;;  %v2669_v31 = vmax.f32 %v2541_v58, 0.0  ;;  %v10129_v8 = vcombine.low %v9080_v5, %v9082_v9  ;;  %v4617_v9 = vld [vmem:[#allocation7 + $0xd0] sm:$0xff] }
 0x444   : > { %4117 = vmatprep.mubr.bf16.mxu0 %v9030_v27  ;;  %v2546_v47 = vadd.f32 %v9117_v11, %v2322_v22  ;;  %v2670_v17 = vmax.f32 %v2542_v36, 0.0 }
 0x445   : > { %v2673_v21 = vmax.f32 %v2545_v63, 0.0 }
 0x446   : > { %v2674_v59 = vmax.f32 %v2546_v47, 0.0 }
 0x447   : > { %v9206_v20 = vpack.c.bf16 %v2673_v21, %v2669_v31  ;;  %v10127_v21 = vld [vmem:[#allocation74_spill] sm:$0xff] }
 0x448   : > { %v9208_v42 = vpack.c.bf16 %v2674_v59, %v2670_v17  ;;  %v2326_v32 = vpop.f32.mrb[68].mxu0  ;;  %v9220_v17 = vrot.slane %v10127_v21, %v10114_v15 }
 0x449   : > { %v2549_v28 = vadd.f32 %v9113_v6, %v2326_v32  ;;  %v2328_v13 = vpop.f32.mrb[69].mxu0 }
 0x44a   : > { %3732 = vmatmul.mubr.bf16.gmra.mrb[176].mxu1 %v9042_v61  ;;  %v2550_v26 = vadd.f32 %v9117_v11, %v2328_v13  ;;  %v2330_v58 = vpop.f32.mrb[70].mxu0 }
 0x44b   : > { %4118 = vmatmul.mubr.bf16.gmra.mrb[152].mxu0 %v9042_v61  ;;  %3741 = vmatprep.mubr.bf16.mxu1 %v9049_v60  ;;  %v2553_v23 = vadd.f32 %v9113_v6, %v2330_v58  ;;  %v2332_v50 = vpop.f32.mrb[71].mxu0  ;;  %v2677_v63 = vmax.f32 %v2549_v28, 0.0 }
 0x44c   : > { %4127 = vmatprep.mubr.bf16.mxu0 %v9049_v60  ;;  %v2554_v36 = vadd.f32 %v9117_v11, %v2332_v50  ;;  %v2678_v47 = vmax.f32 %v2550_v26, 0.0  ;;  %v9226_v11 = vrot.slane %v10127_v21, %v10116_v25  ;;  %v4615_v60 = vld [vmem:[#allocation7 + $0xb0] sm:$0xff] }
 0x44d   : > { %v2681_v22 = vmax.f32 %v2553_v23, 0.0 }
 0x44e   : > { %v2682_v31 = vmax.f32 %v2554_v36, 0.0 }
 0x44f   : > { %v9222_v6 = vpack.c.bf16 %v2681_v22, %v2677_v63 }
 0x450   : > { %v9228_v59 = vpack.c.bf16 %v2682_v31, %v2678_v47  ;;  %v2336_v32 = vpop.f32.mrb[72].mxu0 }
 0x451   : > { %v2557_v28 = vadd.f32 %v9220_v17, %v2336_v32  ;;  %v2338_v13 = vpop.f32.mrb[73].mxu0 }
 0x452   : > { %3742 = vmatmul.mubr.bf16.gmra.mrb[180].mxu1 %v9055_v45  ;;  %v2558_v26 = vadd.f32 %v9226_v11, %v2338_v13  ;;  %v2340_v58 = vpop.f32.mrb[74].mxu0 }
 0x453   : > { %4128 = vmatmul.mubr.bf16.gmra.mrb[156].mxu0 %v9055_v45  ;;  %3751 = vmatprep.mubr.bf16.mxu1 %v9072_v0  ;;  %v2561_v23 = vadd.f32 %v9220_v17, %v2340_v58  ;;  %v2342_v50 = vpop.f32.mrb[75].mxu0  ;;  %v2685_v63 = vmax.f32 %v2557_v28, 0.0 }
 0x454   : > { %4137 = vmatprep.mubr.bf16.mxu0 %v9072_v0  ;;  %v2562_v36 = vadd.f32 %v9226_v11, %v2342_v50  ;;  %v2686_v47 = vmax.f32 %v2558_v26, 0.0  ;;  %v4612_v0 = vld [vmem:[#allocation7 + $0x78] sm:$0xff] }
 0x455   : > { %v2689_v22 = vmax.f32 %v2561_v23, 0.0 }
 0x456   : > { %v2690_v31 = vmax.f32 %v2562_v36, 0.0 }
 0x457   : > { %v9238_v21 = vpack.c.bf16 %v2689_v22, %v2685_v63 }
 0x458   : > { %v9240_v32 = vpack.c.bf16 %v2690_v31, %v2686_v47  ;;  %v2346_v13 = vpop.f32.mrb[76].mxu0  ;;  %v9250_v47 = vld [vmem:[#allocation7 + $0x410] sm:$0xff] }
 0x459   : > { %v2565_v58 = vadd.f32 %v9220_v17, %v2346_v13  ;;  %v2348_v50 = vpop.f32.mrb[77].mxu0  ;;  %v9254_v13 = vld [vmem:[#allocation7 + $0x430] sm:$0xff] }
 0x45a   : > { %3752 = vmatmul.mubr.bf16.gmra.mrb[184].mxu1 %v9076_v7  ;;  %v2566_v28 = vadd.f32 %v9226_v11, %v2348_v50  ;;  %v2350_v23 = vpop.f32.mrb[78].mxu0 }
 0x45b   : > { %4138 = vmatmul.mubr.bf16.gmra.mrb[160].mxu0 %v9076_v7  ;;  %3761 = vmatprep.mubr.bf16.mxu1 %v9086_v55  ;;  %v2569_v25 = vadd.f32 %v9220_v17, %v2350_v23  ;;  %v2352_v15 = vpop.f32.mrb[79].mxu0  ;;  %v2693_v36 = vmax.f32 %v2565_v58, 0.0  ;;  %v4611_v58 = vld [vmem:[#allocation7 + $0x70] sm:$0xff] }
 0x45c   : > { %4147 = vmatprep.mubr.bf16.mxu0 %v9086_v55  ;;  %v2570_v26 = vadd.f32 %v9226_v11, %v2352_v15  ;;  %v2694_v63 = vmax.f32 %v2566_v28, 0.0 }
 0x45d   : > { %v2697_v7 = vmax.f32 %v2569_v25, 0.0  ;;  %v4609_v25 = vld [vmem:[#allocation7 + $0x50] sm:$0xff] }
 0x45e   : > { %v2698_v22 = vmax.f32 %v2570_v26, 0.0  ;;  %v6806_v45 = vcombine.high %v4609_v25, %v4611_v58 }
 0x45f   : > { %v9252_v31 = vpack.c.bf16 %v2697_v7, %v2693_v36 }
 0x460   : > { %v9256_v50 = vpack.c.bf16 %v2698_v22, %v2694_v63  ;;  %v2356_v15 = vpop.f32.mrb[80].mxu0  ;;  %v4613_v22 = vld [vmem:[#allocation7 + $0x90] sm:$0xff] }
 0x461   : > { %v2573_v28 = vadd.f32 %v9220_v17, %v2356_v15  ;;  %v2358_v26 = vpop.f32.mrb[81].mxu0 }
 0x462   : > { %3762 = vmatmul.mubr.bf16.gmra.mrb[188].mxu1 %v9101_v19  ;;  %v2360_v55 = vpop.f32.mrb[82].mxu0 }
 0x463   : > { %4148 = vmatmul.mubr.bf16.gmra.mrb[164].mxu0 %v9101_v19  ;;  %3804 = vmatprep.mubr.bf16.mxu1 %v9129_v14  ;;  %v2574_v19 = vadd.f32 %v9226_v11, %v2358_v26  ;;  %v2577_v7 = vadd.f32 %v9220_v17, %v2360_v55  ;;  %v2362_v36 = vpop.f32.mrb[83].mxu0  ;;  %v2701_v61 = vmax.f32 %v2573_v28, 0.0  ;;  %v6805_v55 = vcombine.low %v4609_v25, %v4611_v58  ;;  %v4619_v25 = vld [vmem:[#allocation7 + $0xf0] sm:$0xff]  ;;  %v4620_v58 = vld [vmem:[#allocation7 + $0xf8] sm:$0xff] }
 0x464   : > { %4190 = vmatprep.mubr.bf16.mxu0 %v9129_v14  ;;  %v4610_v14 = vld [vmem:[#allocation7 + $0x58] sm:$0xff]  ;;  %v2578_v63 = vadd.f32 %v9226_v11, %v2362_v36  ;;  %v6810_v28 = vcombine.high %v4613_v22, %v4615_v60 }
 0x465   : > { %v2705_v27 = vmax.f32 %v2577_v7, 0.0  ;;  %v9266_v15 = vcombine.high %v4610_v14, %v4612_v0  ;;  %v2702_v26 = vmax.f32 %v2574_v19, 0.0  ;;  %v9278_v19 = vcombine.low %v4610_v14, %v4612_v0 }
 0x466   : > { %v2706_v23 = vmax.f32 %v2578_v63, 0.0  ;;  %v4614_v63 = vld [vmem:[#allocation7 + $0x98] sm:$0xff]  ;;  %v6809_v0 = vcombine.low %v4613_v22, %v4615_v60 }
 0x467   : > { %10128 = vst [vmem:[#allocation65_spill] sm:$0xff] %v9266_v15  ;;  %v9272_v36 = vpack.c.bf16 %v2705_v27, %v2701_v61  ;;  %10130 = vst [vmem:[#allocation66_spill] sm:$0xff] %v9278_v19  ;;  %v9284_v14 = vcombine.high %v4614_v63, %v4616_v35 }
 0x468   : > { %v9275_v7 = vpack.c.bf16 %v2706_v23, %v2702_v26 }
 0x469   : > { %10131 = vst [vmem:[#allocation47_spill] sm:$0xff] %v9284_v14 }
 0x46a   : > { %3805 = vmatmul.mubr.bf16.vlgmr.msra.gmra.mrb[128].mxu1 %v9127_v2 }
 0x46b   : > { %4191 = vmatmul.mubr.bf16.vlgmr.msra.gmra.mrb[104].mxu0 %v9127_v2  ;;  %5374 = vmatpush1.bf16.msra.mxu1 %v10129_v8  ;;  %v2366_v2 = vpop.f32.mrb[84].mxu0 }
 0x46c   : > { %3814 = vmatprep.mubr.bf16.mxu1 %v9141_v57  ;;  %4200 = vmatprep.mubr.bf16.mxu0 %v9141_v57  ;;  %v2581_v8 = vadd.f32 %v9220_v17, %v2366_v2  ;;  %v2368_v5 = vpop.f32.mrb[85].mxu0  ;;  %v9288_v57 = vcombine.low %v4614_v63, %v4616_v35  ;;  %v6813_v35 = vcombine.low %v4617_v9, %v4619_v25 }
 0x46d   : > { %5375 = vmatprep.subr.bf16.mxu1 %v6806_v45  ;;  %5760 = vmatpush1.bf16.msra.mxu0 %v9105_v41  ;;  %v2582_v27 = vadd.f32 %v9226_v11, %v2368_v5  ;;  %v2370_v61 = vpop.f32.mrb[86].mxu0  ;;  %v4618_v45 = vld [vmem:[#allocation7 + $0xd8] sm:$0xff]  ;;  %v6814_v41 = vcombine.high %v4617_v9, %v4619_v25 }
 0x46e   : > { %5761 = vmatprep.subr.bf16.mxu0 %v9266_v15  ;;  %v2585_v23 = vadd.f32 %v9220_v17, %v2370_v61  ;;  %v2372_v26 = vpop.f32.mrb[87].mxu0  ;;  %10132 = vst [vmem:[#allocation49_spill] sm:$0xff] %v9288_v57  ;;  %v2709_v15 = vmax.f32 %v2581_v8, 0.0  ;;  %v4623_v61 = vld [vmem:[#allocation7 + $0x130] sm:$0xff]  ;;  %v9292_v54 = vcombine.high %v4618_v45, %v4620_v58 }
 0x46f   : > { %5376 = vmatpush1.bf16.msra.mxu1 %v6805_v55  ;;  %v2586_v2 = vadd.f32 %v9226_v11, %v2372_v26  ;;  %v4621_v55 = vld [vmem:[#allocation7 + $0x110] sm:$0xff]  ;;  %v2710_v60 = vmax.f32 %v2582_v27, 0.0  ;;  %v9302_v26 = vcombine.low %v4618_v45, %v4620_v58  ;;  %v4622_v27 = vld [vmem:[#allocation7 + $0x118] sm:$0xff] }
 0x470   : > { %5377 = vmatprep.subr.bf16.mxu1 %v6810_v28  ;;  %v2713_v5 = vmax.f32 %v2585_v23, 0.0  ;;  %10133 = vst [vmem:[#allocation52_spill] sm:$0xff] %v9292_v54  ;;  %v2376_v8 = vpop.f32.mrb[88].mxu0  ;;  %v6818_v23 = vcombine.high %v4621_v55, %v4623_v61  ;;  %v6817_v45 = vcombine.low %v4621_v55, %v4623_v61 }
 0x471   : > { %5762 = vmatpush1.bf16.msra.mxu0 %v9278_v19  ;;  %v2714_v22 = vmax.f32 %v2586_v2, 0.0  ;;  %10134 = vst [vmem:[#allocation54_spill] sm:$0xff] %v9302_v26  ;;  %v4624_v2 = vld [vmem:[#allocation7 + $0x138] sm:$0xff]  ;;  %v2589_v19 = vadd.f32 %v9220_v17, %v2376_v8 }
 0x472   : > { %3815 = vmatmul.mubr.bf16.gmra.mrb[132].mxu1 %v9139_v24  ;;  %v9296_v28 = vpack.c.bf16 %v2713_v5, %v2709_v15  ;;  %5763 = vmatprep.subr.bf16.mxu0 %v9284_v14  ;;  %v4625_v15 = vld [vmem:[#allocation7 + $0x150] sm:$0xff]  ;;  %v9308_v58 = vcombine.high %v4622_v27, %v4624_v2  ;;  %v9312_v14 = vcombine.low %v4622_v27, %v4624_v2 }
 0x473   : > { %4201 = vmatmul.mubr.bf16.gmra.mrb[108].mxu0 %v9139_v24  ;;  %3824 = vmatprep.mubr.bf16.mxu1 %v9160_v40  ;;  %v9299_v63 = vpack.c.bf16 %v2714_v22, %v2710_v60  ;;  %v4627_v5 = vld [vmem:[#allocation7 + $0x170] sm:$0xff]  ;;  %v4628_v60 = vld [vmem:[#allocation7 + $0x178] sm:$0xff] }
 0x474   : > { %4210 = vmatprep.mubr.bf16.mxu0 %v9160_v40  ;;  %5378 = vmatpush1.bf16.msra.mxu1 %v6809_v0  ;;  %v2378_v40 = vpop.f32.mrb[89].mxu0  ;;  %v4626_v0 = vld [vmem:[#allocation7 + $0x158] sm:$0xff]  ;;  %10135 = vst [vmem:[#allocation51_spill] sm:$0xff] %v9308_v58  ;;  %v6822_v8 = vcombine.high %v4625_v15, %v4627_v5  ;;  %10136 = vst [vmem:[#allocation53_spill] sm:$0xff] %v9312_v14  ;;  %v4631_v24 = vld [vmem:[#allocation7 + $0x1b0] sm:$0xff]  ;;  %v6821_v27 = vcombine.low %v4625_v15, %v4627_v5 }
 0x475   : > { %5379 = vmatprep.subr.bf16.mxu1 %v6814_v41  ;;  %5764 = vmatpush1.bf16.msra.mxu0 %v9288_v57  ;;  %v2590_v9 = vadd.f32 %v9226_v11, %v2378_v40  ;;  %v2380_v25 = vpop.f32.mrb[90].mxu0 }
 0x476   : > { %5765 = vmatprep.subr.bf16.mxu0 %v9292_v54  ;;  %v2593_v41 = vadd.f32 %v9220_v17, %v2380_v25  ;;  %v2382_v22 = vpop.f32.mrb[91].mxu0  ;;  %v2717_v54 = vmax.f32 %v2589_v19, 0.0  ;;  %v4629_v25 = vld [vmem:[#allocation7 + $0x190] sm:$0xff] }
 0x477   : > { %v2594_v57 = vadd.f32 %v9226_v11, %v2382_v22  ;;  %v2718_v55 = vmax.f32 %v2590_v9, 0.0  ;;  %v9326_v22 = vcombine.low %v4626_v0, %v4628_v60  ;;  %v4632_v9 = vld [vmem:[#allocation7 + $0x1b8] sm:$0xff] }
 0x478   : > { %5380 = vmatpush1.bf16.msra.mxu1 %v6813_v35  ;;  %v2721_v40 = vmax.f32 %v2593_v41, 0.0  ;;  %v9316_v35 = vcombine.high %v4626_v0, %v4628_v60  ;;  %v2386_v2 = vpop.f32.mrb[92].mxu0  ;;  %v6826_v41 = vcombine.high %v4629_v25, %v4631_v24  ;;  %v6825_v0 = vcombine.low %v4629_v25, %v4631_v24 }
 0x479   : > { %5381 = vmatprep.subr.bf16.mxu1 %v6818_v23  ;;  %5766 = vmatpush1.bf16.msra.mxu0 %v9302_v26  ;;  %v2722_v61 = vmax.f32 %v2594_v57, 0.0  ;;  %10138 = vst [vmem:[#allocation72_spill] sm:$0xff] %v9326_v22  ;;  %v4630_v57 = vld [vmem:[#allocation7 + $0x198] sm:$0xff]  ;;  %v2597_v26 = vadd.f32 %v9220_v17, %v2386_v2 }
 0x47a   : > { %3825 = vmatmul.mubr.bf16.gmra.mrb[136].mxu1 %v9157_v49  ;;  %10137 = vst [vmem:[#allocation71_spill] sm:$0xff] %v9316_v35  ;;  %v9320_v23 = vpack.c.bf16 %v2721_v40, %v2717_v54  ;;  %5767 = vmatprep.subr.bf16.mxu0 %v9308_v58  ;;  %v4633_v54 = vld [vmem:[#allocation7 + $0x1d0] sm:$0xff]  ;;  %v9332_v60 = vcombine.high %v4630_v57, %v4632_v9 }
 0x47b   : > { %4211 = vmatmul.mubr.bf16.gmra.mrb[112].mxu0 %v9157_v49  ;;  %3834 = vmatprep.mubr.bf16.mxu1 %v9172_v16  ;;  %v9323_v19 = vpack.c.bf16 %v2722_v61, %v2718_v55  ;;  %v4635_v40 = vld [vmem:[#allocation7 + $0x1f0] sm:$0xff]  ;;  %v4636_v55 = vld [vmem:[#allocation7 + $0x1f8] sm:$0xff] }
 0x47c   : > { %4220 = vmatprep.mubr.bf16.mxu0 %v9172_v16  ;;  %5382 = vmatpush1.bf16.msra.mxu1 %v6817_v45  ;;  %v2388_v16 = vpop.f32.mrb[93].mxu0  ;;  %v4634_v45 = vld [vmem:[#allocation7 + $0x1d8] sm:$0xff]  ;;  %10139 = vst [vmem:[#allocation56_spill] sm:$0xff] %v9332_v60  ;;  %v6830_v2 = vcombine.high %v4633_v54, %v4635_v40  ;;  %v4637_v58 = vld [vmem:[#allocation7 + $0x210] sm:$0xff] }
 0x47d   : > { %5383 = vmatprep.subr.bf16.mxu1 %v6822_v8  ;;  %5768 = vmatpush1.bf16.msra.mxu0 %v9312_v14  ;;  %v2598_v15 = vadd.f32 %v9226_v11, %v2388_v16  ;;  %v2390_v5 = vpop.f32.mrb[94].mxu0  ;;  %v4639_v49 = vld [vmem:[#allocation7 + $0x230] sm:$0xff]  ;;  %v2725_v16 = vmax.f32 %v2597_v26, 0.0 }
 0x47e   : > { %5769 = vmatprep.subr.bf16.mxu0 %v9316_v35  ;;  %v2601_v8 = vadd.f32 %v9220_v17, %v2390_v5  ;;  %v2392_v61 = vpop.f32.mrb[95].mxu0  ;;  %v9336_v35 = vcombine.low %v4630_v57, %v4632_v9  ;;  %v6829_v57 = vcombine.low %v4633_v54, %v4635_v40  ;;  %v6834_v26 = vcombine.high %v4637_v58, %v4639_v49  ;;  %v9349_v9 = vld [vmem:[#allocation7 + $0x438] sm:$0xff] }
 0x47f   : > { %v2602_v14 = vadd.f32 %v9226_v11, %v2392_v61  ;;  %v2726_v24 = vmax.f32 %v2598_v15, 0.0  ;;  %v4638_v15 = vld [vmem:[#allocation7 + $0x218] sm:$0xff] }
 0x480   : > { %5384 = vmatpush1.bf16.msra.mxu1 %v6821_v27  ;;  %10140 = vst [vmem:[#allocation67_spill] sm:$0xff] %v9336_v35  ;;  %v2729_v62 = vmax.f32 %v2601_v8, 0.0  ;;  %v9340_v27 = vcombine.high %v4634_v45, %v4636_v55  ;;  %v2396_v61 = vpop.f32.mrb[96].mxu0 }
 0x481   : > { %5385 = vmatprep.subr.bf16.mxu1 %v6826_v41  ;;  %5770 = vmatpush1.bf16.msra.mxu0 %v9326_v22  ;;  %v2730_v25 = vmax.f32 %v2602_v14, 0.0  ;;  %v9344_v41 = vld [vmem:[#allocation7 + $0x418] sm:$0xff]  ;;  %v9354_v14 = vcombine.low %v4634_v45, %v4636_v55  ;;  %v2605_v54 = vadd.f32 %v9220_v17, %v2396_v61  ;;  %v2398_v40 = vpop.f32.mrb[97].mxu0 }
 0x482   : > { %3835 = vmatmul.mubr.bf16.gmra.mrb[140].mxu1 %v9170_v12  ;;  %10141 = vst [vmem:[#allocation68_spill] sm:$0xff] %v9340_v27  ;;  %v9346_v5 = vpack.c.bf16 %v2729_v62, %v2725_v16  ;;  %5771 = vmatprep.subr.bf16.mxu0 %v9332_v60  ;;  %v4640_v22 = vld [vmem:[#allocation7 + $0x238] sm:$0xff]  ;;  %v4643_v16 = vld [vmem:[#allocation7 + $0x270] sm:$0xff] }
 0x483   : > { %4221 = vmatmul.mubr.bf16.gmra.mrb[116].mxu0 %v9170_v12  ;;  %3844 = vmatprep.mubr.bf16.mxu1 %v9184_v18  ;;  %v9351_v8 = vpack.c.bf16 %v2730_v25, %v2726_v24  ;;  %10142 = vst [vmem:[#allocation58_spill] sm:$0xff] %v9354_v14  ;;  %v2606_v24 = vadd.f32 %v9226_v11, %v2398_v40  ;;  %v2400_v25 = vpop.f32.mrb[98].mxu0  ;;  %v4644_v60 = vld [vmem:[#allocation7 + $0x278] sm:$0xff] }
 0x484   : > { %4230 = vmatprep.mubr.bf16.mxu0 %v9184_v18  ;;  %5386 = vmatpush1.bf16.msra.mxu1 %v6825_v0  ;;  %v4641_v0 = vld [vmem:[#allocation7 + $0x250] sm:$0xff]  ;;  %v2609_v45 = vadd.f32 %v9220_v17, %v2400_v25  ;;  %v2402_v55 = vpop.f32.mrb[99].mxu0  ;;  %v9362_v18 = vcombine.high %v4638_v15, %v4640_v22  ;;  %v9366_v12 = vcombine.low %v4638_v15, %v4640_v22 }
 0x485   : > { %5387 = vmatprep.subr.bf16.mxu1 %v6830_v2  ;;  %5772 = vmatpush1.bf16.msra.mxu0 %v9336_v35  ;;  %v4642_v2 = vld [vmem:[#allocation7 + $0x258] sm:$0xff]  ;;  %v6833_v35 = vcombine.low %v4637_v58, %v4639_v49  ;;  %v2610_v62 = vadd.f32 %v9226_v11, %v2402_v55  ;;  %v6838_v61 = vcombine.high %v4641_v0, %v4643_v16  ;;  %v4645_v25 = vld [vmem:[#allocation7 + $0x290] sm:$0xff]  ;;  %v2734_v49 = vmax.f32 %v2606_v24, 0.0 }
 0x486   : > { %5773 = vmatprep.subr.bf16.mxu0 %v9340_v27  ;;  %10143 = vst [vmem:[#allocation75_spill] sm:$0xff] %v9362_v18  ;;  %10144 = vst [vmem:[#allocation76_spill] sm:$0xff] %v9366_v12  ;;  %v2733_v27 = vmax.f32 %v2605_v54, 0.0  ;;  %v2737_v40 = vmax.f32 %v2609_v45, 0.0  ;;  %v6837_v22 = vcombine.low %v4641_v0, %v4643_v16  ;;  %v6842_v45 = vcombine.high %v4645_v25, %v4647_v29  ;;  %v4648_v24 = vld [vmem:[#allocation7 + $0x2b8] sm:$0xff] }
 0x487   : > { %v2738_v58 = vmax.f32 %v2610_v62, 0.0  ;;  %v9380_v55 = vcombine.low %v4642_v2, %v4644_v60  ;;  %v4646_v62 = vld [vmem:[#allocation7 + $0x298] sm:$0xff] }
 0x488   : > { %5388 = vmatpush1.bf16.msra.mxu1 %v6829_v57  ;;  %v9370_v57 = vcombine.high %v4642_v2, %v4644_v60  ;;  %v2406_v54 = vpop.f32.mrb[100].mxu0  ;;  %v4650_v16 = vld [vmem:[#allocation7 + $0x2d8] sm:$0xff]  ;;  %v6841_v60 = vcombine.low %v4645_v25, %v4647_v29  ;;  %v9386_v2 = vcombine.high %v4646_v62, %v4648_v24 }
 0x489   : > { %5389 = vmatprep.subr.bf16.mxu1 %v6834_v26  ;;  %5774 = vmatpush1.bf16.msra.mxu0 %v9354_v14  ;;  %v9374_v26 = vpack.c.bf16 %v2737_v40, %v2733_v27  ;;  %v9377_v15 = vpack.c.bf16 %v2738_v58, %v2734_v49  ;;  %v2613_v14 = vadd.f32 %v9220_v17, %v2406_v54  ;;  %v4649_v27 = vld [vmem:[#allocation7 + $0x2d0] sm:$0xff]  ;;  %v4652_v49 = vld [vmem:[#allocation7 + $0x2f8] sm:$0xff] }
 0x48a   : > { %3845 = vmatmul.mubr.bf16.gmra.mrb[144].mxu1 %v9182_v34  ;;  %10145 = vst [vmem:[#allocation55_spill] sm:$0xff] %v9370_v57  ;;  %5775 = vmatprep.subr.bf16.mxu0 %v9362_v18  ;;  %v4651_v40 = vld [vmem:[#allocation7 + $0x2f0] sm:$0xff]  ;;  %v9390_v18 = vcombine.low %v4646_v62, %v4648_v24  ;;  %v9404_v24 = vcombine.low %v4650_v16, %v4652_v49 }
 0x48b   : > { %4231 = vmatmul.mubr.bf16.gmra.mrb[120].mxu0 %v9182_v34  ;;  %3854 = vmatprep.mubr.bf16.mxu1 %v9196_v1  ;;  %10146 = vst [vmem:[#allocation57_spill] sm:$0xff] %v9374_v26  ;;  %10147 = vst [vmem:[#allocation60_spill] sm:$0xff] %v9377_v15  ;;  %v6846_v54 = vcombine.high %v4649_v27, %v4651_v40 }
 0x48c   : > { %4240 = vmatprep.mubr.bf16.mxu0 %v9196_v1  ;;  %5390 = vmatpush1.bf16.msra.mxu1 %v6833_v35  ;;  %v2408_v1 = vpop.f32.mrb[101].mxu0  ;;  %10148 = vst [vmem:[#allocation62_spill] sm:$0xff] %v9390_v18  ;;  %10152 = vst [vmem:[#allocation61_spill] sm:$0xff] %v9404_v24 }
 0x48d   : > { %5391 = vmatprep.subr.bf16.mxu1 %v6838_v61  ;;  %5776 = vmatpush1.bf16.msra.mxu0 %v9366_v12  ;;  %v2614_v35 = vadd.f32 %v9226_v11, %v2408_v1  ;;  %v2410_v0 = vpop.f32.mrb[102].mxu0 }
 0x48e   : > { %5777 = vmatprep.subr.bf16.mxu0 %v9370_v57  ;;  %v2617_v61 = vadd.f32 %v9220_v17, %v2410_v0  ;;  %v2412_v58 = vpop.f32.mrb[103].mxu0  ;;  %v2741_v57 = vmax.f32 %v2613_v14, 0.0  ;;  %v4653_v17 = vld [vmem:[#allocation7 + $0x310] sm:$0xff] }
 0x48f   : > { %v2618_v12 = vadd.f32 %v9226_v11, %v2412_v58  ;;  %v4655_v0 = vld [vmem:[#allocation7 + $0x330] sm:$0xff]  ;;  %v2742_v29 = vmax.f32 %v2614_v35, 0.0  ;;  %v4654_v35 = vld [vmem:[#allocation7 + $0x318] sm:$0xff] }
 0x490   : > { %5392 = vmatpush1.bf16.msra.mxu1 %v6837_v22  ;;  %v2745_v1 = vmax.f32 %v2617_v61, 0.0  ;;  %v9394_v22 = vcombine.high %v4650_v16, %v4652_v49  ;;  %v6850_v62 = vcombine.high %v4653_v17, %v4655_v0  ;;  %v4657_v61 = vld [vmem:[#allocation7 + $0x350] sm:$0xff] }
 0x491   : > { %5393 = vmatprep.subr.bf16.mxu1 %v6842_v45  ;;  %5778 = vmatpush1.bf16.msra.mxu0 %v9380_v55  ;;  %v2746_v25 = vmax.f32 %v2618_v12, 0.0  ;;  %v6845_v45 = vcombine.low %v4649_v27, %v4651_v40  ;;  %v4656_v12 = vld [vmem:[#allocation7 + $0x338] sm:$0xff]  ;;  %v4659_v58 = vld [vmem:[#allocation7 + $0x370] sm:$0xff]  ;;  %v6849_v27 = vcombine.low %v4653_v17, %v4655_v0 }
 0x492   : > { %3855 = vmatmul.mubr.bf16.gmra.mrb[148].mxu1 %v9194_v39  ;;  %10149 = vst [vmem:[#allocation69_spill] sm:$0xff] %v9394_v22  ;;  %v9398_v11 = vpack.c.bf16 %v2745_v1, %v2741_v57  ;;  %5779 = vmatprep.subr.bf16.mxu0 %v9386_v2  ;;  %v4658_v57 = vld [vmem:[#allocation7 + $0x358] sm:$0xff]  ;;  %v9407_v40 = vcombine.high %v4654_v35, %v4656_v12  ;;  %v4661_v16 = vld [vmem:[#allocation7 + $0x390] sm:$0xff] }
 0x493   : > { %4241 = vmatmul.mubr.bf16.gmra.mrb[124].mxu0 %v9194_v39  ;;  %3864 = vmatprep.mubr.bf16.mxu1 %v9208_v42  ;;  %v9401_v14 = vpack.c.bf16 %v2746_v25, %v2742_v29  ;;  %v4660_v1 = vld [vmem:[#allocation7 + $0x378] sm:$0xff]  ;;  %v4663_v49 = vld [vmem:[#allocation7 + $0x3b0] sm:$0xff]  ;;  %v6853_v17 = vcombine.low %v4657_v61, %v4659_v58 }
 0x494   : > { %4250 = vmatprep.mubr.bf16.mxu0 %v9208_v42  ;;  %10150 = vst [vmem:[#allocation70_spill] sm:$0xff] %v9398_v11  ;;  %5394 = vmatpush1.bf16.msra.mxu1 %v6841_v60  ;;  %v6854_v60 = vcombine.high %v4657_v61, %v4659_v58  ;;  %v9414_v29 = vcombine.high %v4658_v57, %v4660_v1 }
 0x495   : > { %10151 = vst [vmem:[#allocation59_spill] sm:$0xff] %v9401_v14  ;;  %5395 = vmatprep.subr.bf16.mxu1 %v6846_v54  ;;  %5780 = vmatpush1.bf16.msra.mxu0 %v9390_v18  ;;  %v9410_v54 = vcombine.low %v4654_v35, %v4656_v12  ;;  %v6858_v0 = vcombine.high %v4661_v16, %v4663_v49  ;;  %v4665_v35 = vld [vmem:[#allocation7 + $0x3d0] sm:$0xff] }
 0x496   : > { %5781 = vmatprep.subr.bf16.mxu0 %v9394_v22  ;;  %v9420_v25 = vcombine.low %v4658_v57, %v4660_v1  ;;  %v4667_v12 = vld [vmem:[#allocation7 + $0x3f0] sm:$0xff]  ;;  %v4668_v22 = vld [vmem:[#allocation7 + $0x3f8] sm:$0xff]  ;;  %v6857_v18 = vcombine.low %v4661_v16, %v4663_v49  ;;  %v6866_v16 = vcombine.high %v9250_v47, %v9254_v13  ;;  %v6868_v49 = vcombine.high %v9344_v41, %v9349_v9 }
 0x497   : > { %v6862_v61 = vcombine.high %v4665_v35, %v4667_v12  ;;  %v6861_v1 = vcombine.low %v4665_v35, %v4667_v12  ;;  %v10153_v12 = vcombine.low %v9250_v47, %v9254_v13  ;;  %v4682_v47 = vld [vmem:[#allocation7 + $0x4d8] sm:$0xff] }
 0x498   : > { %5396 = vmatpush1.bf16.msra.mxu1 %v6845_v45  ;;  %v4662_v45 = vld [vmem:[#allocation7 + $0x398] sm:$0xff] }
 0x499   : > { %5397 = vmatprep.subr.bf16.mxu1 %v6850_v62  ;;  %5782 = vmatpush1.bf16.msra.mxu0 %v9404_v24  ;;  %v4664_v62 = vld [vmem:[#allocation7 + $0x3b8] sm:$0xff] }
 0x49a   : > { %3865 = vmatmul.mubr.bf16.gmra.mrb[152].mxu1 %v9206_v20  ;;  %5783 = vmatprep.subr.bf16.mxu0 %v9407_v40  ;;  %v4666_v24 = vld [vmem:[#allocation7 + $0x3d8] sm:$0xff]  ;;  %v9426_v58 = vcombine.low %v4662_v45, %v4664_v62 }
 0x49b   : > { %4251 = vmatmul.mubr.bf16.gmra.mrb[128].mxu0 %v9206_v20  ;;  %3874 = vmatprep.mubr.bf16.mxu1 %v9228_v59  ;;  %v9430_v57 = vcombine.high %v4666_v24, %v4668_v22  ;;  %v4684_v13 = vld [vmem:[#allocation7 + $0x4f8] sm:$0xff] }
 0x49c   : > { %4260 = vmatprep.mubr.bf16.mxu0 %v9228_v59  ;;  %5398 = vmatpush1.bf16.msra.mxu1 %v6849_v27  ;;  %v9423_v27 = vcombine.high %v4662_v45, %v4664_v62  ;;  %v4677_v45 = vld [vmem:[#allocation7 + $0x490] sm:$0xff] }
 0x49d   : > { %5399 = vmatprep.subr.bf16.mxu1 %v6854_v60  ;;  %5784 = vmatpush1.bf16.msra.mxu0 %v9410_v54  ;;  %v9436_v60 = vcombine.low %v4666_v24, %v4668_v22  ;;  %v4675_v22 = vld [vmem:[#allocation7 + $0x470] sm:$0xff]  ;;  %v4674_v24 = vld [vmem:[#allocation7 + $0x458] sm:$0xff] }
 0x49e   : > { %5785 = vmatprep.subr.bf16.mxu0 %v9414_v29  ;;  %v4679_v62 = vld [vmem:[#allocation7 + $0x4b0] sm:$0xff] }
 0x4a0   : > { %5400 = vmatpush1.bf16.msra.mxu1 %v6853_v17  ;;  %v4676_v17 = vld [vmem:[#allocation7 + $0x478] sm:$0xff] }
 0x4a1   : > { %5401 = vmatprep.subr.bf16.mxu1 %v6858_v0  ;;  %5786 = vmatpush1.bf16.msra.mxu0 %v9420_v25  ;;  %v6872_v35 = vcombine.high %v4674_v24, %v4676_v17 }
 0x4a2   : > { %3875 = vmatmul.mubr.bf16.gmra.mrb[156].mxu1 %v9222_v6  ;;  %5787 = vmatprep.subr.bf16.mxu0 %v9423_v27 }
 0x4a3   : > { %4261 = vmatmul.mubr.bf16.gmra.mrb[132].mxu0 %v9222_v6  ;;  %3884 = vmatprep.mubr.bf16.mxu1 %v9240_v32 }
 0x4a4   : > { %4270 = vmatprep.mubr.bf16.mxu0 %v9240_v32  ;;  %5402 = vmatpush1.bf16.msra.mxu1 %v6857_v18  ;;  %v4673_v18 = vld [vmem:[#allocation7 + $0x450] sm:$0xff] }
 0x4a5   : > { %5403 = vmatprep.subr.bf16.mxu1 %v6862_v61  ;;  %5788 = vmatpush1.bf16.msra.mxu0 %v9426_v58  ;;  %v6870_v0 = vcombine.high %v4673_v18, %v4675_v22  ;;  %v6869_v61 = vcombine.low %v4673_v18, %v4675_v22 }
 0x4a6   : > { %5789 = vmatprep.subr.bf16.mxu0 %v9430_v57 }
 0x4a8   : > { %5404 = vmatpush1.bf16.msra.mxu1 %v6861_v1  ;;  %v10154_v1 = vcombine.low %v9344_v41, %v9349_v9  ;;  %v4685_v41 = vld [vmem:[#allocation7 + $0x510] sm:$0xff] }
 0x4a9   : > { %5790 = vmatpush1.bf16.msra.mxu0 %v9436_v60  ;;  %5566 = vmatprep.subr.bf16.mxu1 %v6866_v16  ;;  %v6871_v16 = vcombine.low %v4674_v24, %v4676_v17  ;;  %v4687_v9 = vld [vmem:[#allocation7 + $0x530] sm:$0xff]  ;;  %v6880_v24 = vcombine.high %v4682_v47, %v4684_v13 }
 0x4aa   : > { %3885 = vmatmul.mubr.bf16.gmra.mrb[160].mxu1 %v9238_v21  ;;  %5952 = vmatprep.subr.bf16.mxu0 %v6868_v49  ;;  %v4678_v49 = vld [vmem:[#allocation7 + $0x498] sm:$0xff] }
 0x4ab   : > { %4271 = vmatmul.mubr.bf16.gmra.mrb[136].mxu0 %v9238_v21  ;;  %3894 = vmatprep.mubr.bf16.mxu1 %v9256_v50 }
 0x4ac   : > { %4280 = vmatprep.mubr.bf16.mxu0 %v9256_v50 }
 0x4b2   : > { %3895 = vmatmul.mubr.bf16.gmra.mrb[164].mxu1 %v9252_v31 }
 0x4b3   : > { %4281 = vmatmul.mubr.bf16.gmra.mrb[140].mxu0 %v9252_v31  ;;  %3904 = vmatprep.mubr.bf16.mxu1 %v9275_v7 }
 0x4b4   : > { %4290 = vmatprep.mubr.bf16.mxu0 %v9275_v7 }
 0x4ba   : > { %3905 = vmatmul.mubr.bf16.gmra.mrb[168].mxu1 %v9272_v36 }
 0x4bb   : > { %4291 = vmatmul.mubr.bf16.gmra.mrb[144].mxu0 %v9272_v36  ;;  %3914 = vmatprep.mubr.bf16.mxu1 %v9299_v63 }
 0x4bc   : > { %4300 = vmatprep.mubr.bf16.mxu0 %v9299_v63 }
 0x4c2   : > { %3915 = vmatmul.mubr.bf16.gmra.mrb[172].mxu1 %v9296_v28 }
 0x4c3   : > { %4301 = vmatmul.mubr.bf16.gmra.mrb[148].mxu0 %v9296_v28  ;;  %3924 = vmatprep.mubr.bf16.mxu1 %v9323_v19 }
 0x4c4   : > { %4310 = vmatprep.mubr.bf16.mxu0 %v9323_v19 }
 0x4ca   : > { %3925 = vmatmul.mubr.bf16.gmra.mrb[176].mxu1 %v9320_v23 }
 0x4cb   : > { %4311 = vmatmul.mubr.bf16.gmra.mrb[152].mxu0 %v9320_v23  ;;  %3934 = vmatprep.mubr.bf16.mxu1 %v9351_v8 }
 0x4cc   : > { %4320 = vmatprep.mubr.bf16.mxu0 %v9351_v8 }
 0x4d2   : > { %3935 = vmatmul.mubr.bf16.gmra.mrb[180].mxu1 %v9346_v5 }
 0x4d3   : > { %4321 = vmatmul.mubr.bf16.gmra.mrb[156].mxu0 %v9346_v5  ;;  %3944 = vmatprep.mubr.bf16.mxu1 %v9377_v15 }
 0x4d4   : > { %4330 = vmatprep.mubr.bf16.mxu0 %v9377_v15  ;;  %v10196_v15 = vld [vmem:[#allocation63_spill] sm:$0xff] }
 0x4da   : > { %3945 = vmatmul.mubr.bf16.gmra.mrb[184].mxu1 %v9374_v26 }
 0x4db   : > { %4331 = vmatmul.mubr.bf16.gmra.mrb[160].mxu0 %v9374_v26  ;;  %3954 = vmatprep.mubr.bf16.mxu1 %v9401_v14 }
 0x4dc   : > { %4340 = vmatprep.mubr.bf16.mxu0 %v9401_v14  ;;  %v4683_v14 = vld [vmem:[#allocation7 + $0x4f0] sm:$0xff] }
 0x4e2   : > { %3955 = vmatmul.mubr.bf16.gmra.mrb[188].mxu1 %v9398_v11 }
 0x4e3   : > { %4341 = vmatmul.mubr.bf16.gmra.mrb[164].mxu0 %v9398_v11  ;;  %5405 = vmatprep.mubr.bf16.mxu1 %v8791_v4  ;;  %v4680_v11 = vld [vmem:[#allocation7 + $0x4b8] sm:$0xff] }
 0x4e4   : > { %5791 = vmatprep.mubr.bf16.mxu0 %v8791_v4  ;;  %v6874_v4 = vcombine.high %v4677_v45, %v4679_v62  ;;  %v6876_v18 = vcombine.high %v4678_v49, %v4680_v11 }
 0x4ea   : > { %5406 = vmatmul.mubr.bf16.vlgmr.msra.gmra.mrb[192].mxu1 %v8793_v33 }
 0x4eb   : > { %5792 = vmatmul.mubr.bf16.vlgmr.msra.gmra.mrb[168].mxu0 %v8793_v33  ;;  %5567 = vmatpush1.bf16.msra.mxu1 %v10153_v12  ;;  %v4681_v33 = vld [vmem:[#allocation7 + $0x4d0] sm:$0xff]  ;;  %v6873_v12 = vcombine.low %v4677_v45, %v4679_v62  ;;  %v6879_v45 = vcombine.low %v4682_v47, %v4684_v13  ;;  %v4686_v62 = vld [vmem:[#allocation7 + $0x518] sm:$0xff] }
 0x4ec   : > { %5415 = vmatprep.mubr.bf16.mxu1 %v8799_v37  ;;  %5801 = vmatprep.mubr.bf16.mxu0 %v8799_v37  ;;  %v6878_v22 = vcombine.high %v4681_v33, %v4683_v14  ;;  %v6875_v37 = vcombine.low %v4678_v49, %v4680_v11  ;;  %v6877_v17 = vcombine.low %v4681_v33, %v4683_v14  ;;  %v4688_v11 = vld [vmem:[#allocation7 + $0x538] sm:$0xff]  ;;  %v4693_v14 = vld [vmem:[#allocation7 + $0x590] sm:$0xff] }
 0x4ed   : > { %5568 = vmatprep.subr.bf16.mxu1 %v6870_v0  ;;  %5953 = vmatpush1.bf16.msra.mxu0 %v10154_v1  ;;  %v6882_v0 = vcombine.high %v4685_v41, %v4687_v9  ;;  %v6881_v1 = vcombine.low %v4685_v41, %v4687_v9  ;;  %v4695_v33 = vld [vmem:[#allocation7 + $0x5b0] sm:$0xff] }
 0x4ee   : > { %5954 = vmatprep.subr.bf16.mxu0 %v6872_v35  ;;  %v4689_v35 = vld [vmem:[#allocation7 + $0x550] sm:$0xff] }
 0x4ef   : > { %5569 = vmatpush1.bf16.msra.mxu1 %v6869_v61  ;;  %v4691_v61 = vld [vmem:[#allocation7 + $0x570] sm:$0xff] }
 0x4f0   : > { %5570 = vmatprep.subr.bf16.mxu1 %v6874_v4  ;;  %v4692_v4 = vld [vmem:[#allocation7 + $0x578] sm:$0xff]  ;;  %v6886_v49 = vcombine.high %v4689_v35, %v4691_v61  ;;  %v6885_v13 = vcombine.low %v4689_v35, %v4691_v61  ;;  %v4697_v41 = vld [vmem:[#allocation7 + $0x5d0] sm:$0xff] }
 0x4f1   : > { %5955 = vmatpush1.bf16.msra.mxu0 %v6871_v16  ;;  %v6884_v16 = vcombine.high %v4686_v62, %v4688_v11  ;;  %v4699_v9 = vld [vmem:[#allocation7 + $0x5f0] sm:$0xff] }
 0x4f2   : > { %5416 = vmatmul.mubr.bf16.gmra.mrb[196].mxu1 %v8801_v44  ;;  %5956 = vmatprep.subr.bf16.mxu0 %v6876_v18  ;;  %v6893_v61 = vcombine.low %v4697_v41, %v4699_v9 }
 0x4f3   : > { %5802 = vmatmul.mubr.bf16.gmra.mrb[172].mxu0 %v8801_v44  ;;  %5425 = vmatprep.mubr.bf16.mxu1 %v8823_v51  ;;  %v4690_v44 = vld [vmem:[#allocation7 + $0x558] sm:$0xff] }
 0x4f4   : > { %5811 = vmatprep.mubr.bf16.mxu0 %v8823_v51  ;;  %5571 = vmatpush1.bf16.msra.mxu1 %v6873_v12  ;;  %v6883_v51 = vcombine.low %v4686_v62, %v4688_v11  ;;  %v6888_v47 = vcombine.high %v4690_v44, %v4692_v4  ;;  %v6890_v12 = vcombine.high %v4693_v14, %v4695_v33  ;;  %v4701_v62 = vld [vmem:[#allocation7 + $0x610] sm:$0xff] }
 0x4f5   : > { %5572 = vmatprep.subr.bf16.mxu1 %v6878_v22  ;;  %5957 = vmatpush1.bf16.msra.mxu0 %v6875_v37  ;;  %v6887_v18 = vcombine.low %v4690_v44, %v4692_v4  ;;  %v4694_v22 = vld [vmem:[#allocation7 + $0x598] sm:$0xff]  ;;  %v4703_v11 = vld [vmem:[#allocation7 + $0x630] sm:$0xff] }
 0x4f6   : > { %5958 = vmatprep.subr.bf16.mxu0 %v6880_v24  ;;  %v4696_v37 = vld [vmem:[#allocation7 + $0x5b8] sm:$0xff]  ;;  %v6898_v44 = vcombine.high %v4701_v62, %v4703_v11 }
 0x4f7   : > { %v4700_v24 = vld [vmem:[#allocation7 + $0x5f8] sm:$0xff] }
 0x4f8   : > { %5573 = vmatpush1.bf16.msra.mxu1 %v6877_v17  ;;  %v6889_v17 = vcombine.low %v4693_v14, %v4695_v33  ;;  %v4708_v14 = vld [vmem:[#allocation7 + $0x678] sm:$0xff]  ;;  %v6897_v33 = vcombine.low %v4701_v62, %v4703_v11 }
 0x4f9   : > { %5574 = vmatprep.subr.bf16.mxu1 %v6882_v0  ;;  %5959 = vmatpush1.bf16.msra.mxu0 %v6879_v45  ;;  %v6892_v0 = vcombine.high %v4694_v22, %v4696_v37  ;;  %v6894_v45 = vcombine.high %v4697_v41, %v4699_v9  ;;  %v10156_v41 = vld [vmem:[#allocation20_spill] sm:$0xff] }
 0x4fa   : > { %5426 = vmatmul.mubr.bf16.gmra.mrb[200].mxu1 %v8831_v53  ;;  %5960 = vmatprep.subr.bf16.mxu0 %v6884_v16  ;;  %v4704_v16 = vld [vmem:[#allocation7 + $0x638] sm:$0xff] }
 0x4fb   : > { %5812 = vmatmul.mubr.bf16.gmra.mrb[176].mxu0 %v8831_v53  ;;  %5435 = vmatprep.mubr.bf16.mxu1 %v8835_v43  ;;  %v4698_v53 = vld [vmem:[#allocation7 + $0x5d8] sm:$0xff] }
 0x4fc   : > { %5821 = vmatprep.mubr.bf16.mxu0 %v8835_v43  ;;  %5575 = vmatpush1.bf16.msra.mxu1 %v6881_v1  ;;  %v6891_v43 = vcombine.low %v4694_v22, %v4696_v37  ;;  %v6896_v35 = vcombine.high %v4698_v53, %v4700_v24  ;;  %v6895_v4 = vcombine.low %v4698_v53, %v4700_v24  ;;  %v4702_v1 = vld [vmem:[#allocation7 + $0x618] sm:$0xff]  ;;  %v4711_v22 = vld [vmem:[#allocation7 + $0x6b0] sm:$0xff] }
 0x4fd   : > { %5576 = vmatprep.subr.bf16.mxu1 %v6886_v49  ;;  %5961 = vmatpush1.bf16.msra.mxu0 %v6883_v51  ;;  %v4705_v49 = vld [vmem:[#allocation7 + $0x650] sm:$0xff]  ;;  %v4714_v62 = vld [vmem:[#allocation7 + $0x6d8] sm:$0xff] }
 0x4fe   : > { %5962 = vmatprep.subr.bf16.mxu0 %v6888_v47  ;;  %v4707_v51 = vld [vmem:[#allocation7 + $0x670] sm:$0xff]  ;;  %v6900_v47 = vcombine.high %v4702_v1, %v4704_v16  ;;  %v4716_v11 = vld [vmem:[#allocation7 + $0x6f8] sm:$0xff] }
 0x4ff   : > { %v6901_v9 = vcombine.low %v4705_v49, %v4707_v51 }
 0x500   : > { %5577 = vmatpush1.bf16.msra.mxu1 %v6885_v13  ;;  %v6902_v13 = vcombine.high %v4705_v49, %v4707_v51  ;;  %v4717_v49 = vld [vmem:[#allocation7 + $0x710] sm:$0xff] }
 0x501   : > { %5578 = vmatprep.subr.bf16.mxu1 %v6890_v12  ;;  %5963 = vmatpush1.bf16.msra.mxu0 %v6887_v18  ;;  %v10155_v12 = vld [vmem:[#allocation22_spill] sm:$0xff]  ;;  %v4709_v18 = vld [vmem:[#allocation7 + $0x690] sm:$0xff] }
 0x502   : > { %5436 = vmatmul.mubr.bf16.gmra.mrb[204].mxu1 %v8844_v3  ;;  %5964 = vmatprep.subr.bf16.mxu0 %v6892_v0  ;;  %v6906_v53 = vcombine.high %v4709_v18, %v4711_v22  ;;  %v4712_v0 = vld [vmem:[#allocation7 + $0x6b8] sm:$0xff]  ;;  %v4719_v51 = vld [vmem:[#allocation7 + $0x730] sm:$0xff] }
 0x503   : > { %5822 = vmatmul.mubr.bf16.gmra.mrb[180].mxu0 %v8844_v3  ;;  %5445 = vmatprep.mubr.bf16.mxu1 %v8863_v56  ;;  %v4706_v3 = vld [vmem:[#allocation7 + $0x658] sm:$0xff] }
 0x504   : > { %5831 = vmatprep.mubr.bf16.mxu0 %v8863_v56  ;;  %5579 = vmatpush1.bf16.msra.mxu1 %v6889_v17  ;;  %v6899_v56 = vcombine.low %v4702_v1, %v4704_v16  ;;  %v6904_v37 = vcombine.high %v4706_v3, %v4708_v14  ;;  %v6903_v24 = vcombine.low %v4706_v3, %v4708_v14  ;;  %v4710_v17 = vld [vmem:[#allocation7 + $0x698] sm:$0xff]  ;;  %v10157_v1 = vld [vmem:[#allocation21_spill] sm:$0xff] }
 0x505   : > { %5580 = vmatprep.subr.bf16.mxu1 %v6894_v45  ;;  %5965 = vmatpush1.bf16.msra.mxu0 %v6891_v43  ;;  %v4713_v45 = vld [vmem:[#allocation7 + $0x6d0] sm:$0xff]  ;;  %v6912_v16 = vcombine.high %v4714_v62, %v4716_v11  ;;  %v10158_v3 = vld [vmem:[#allocation24_spill] sm:$0xff] }
 0x506   : > { %5966 = vmatprep.subr.bf16.mxu0 %v6896_v35  ;;  %v4715_v43 = vld [vmem:[#allocation7 + $0x6f0] sm:$0xff]  ;;  %v6905_v35 = vcombine.low %v4709_v18, %v4711_v22  ;;  %v4722_v22 = vld [vmem:[#allocation7 + $0x758] sm:$0xff] }
 0x507   : > { %v6909_v14 = vcombine.low %v4713_v45, %v4715_v43  ;;  %v4723_v18 = vld [vmem:[#allocation7 + $0x770] sm:$0xff] }
 0x508   : > { %5581 = vmatpush1.bf16.msra.mxu1 %v6893_v61  ;;  %v6908_v61 = vcombine.high %v4710_v17, %v4712_v0 }
 0x509   : > { %5582 = vmatprep.subr.bf16.mxu1 %v6898_v44  ;;  %5967 = vmatpush1.bf16.msra.mxu0 %v6895_v4  ;;  %v6910_v44 = vcombine.high %v4713_v45, %v4715_v43  ;;  %v6907_v4 = vcombine.low %v4710_v17, %v4712_v0  ;;  %v4725_v0 = vld [vmem:[#allocation7 + $0x790] sm:$0xff]  ;;  %v10159_v43 = vld [vmem:[#allocation26_spill] sm:$0xff] }
 0x50a   : > { %5446 = vmatmul.mubr.bf16.gmra.mrb[208].mxu1 %v10155_v12  ;;  %5968 = vmatprep.subr.bf16.mxu0 %v6900_v47  ;;  %v6914_v47 = vcombine.high %v4717_v49, %v4719_v51  ;;  %v4727_v45 = vld [vmem:[#allocation7 + $0x7b0] sm:$0xff] }
 0x50b   : > { %5832 = vmatmul.mubr.bf16.gmra.mrb[184].mxu0 %v10155_v12  ;;  %5455 = vmatprep.mubr.bf16.mxu1 %v10156_v41  ;;  %v4721_v12 = vld [vmem:[#allocation7 + $0x750] sm:$0xff] }
 0x50c   : > { %5841 = vmatprep.mubr.bf16.mxu0 %v10156_v41  ;;  %5583 = vmatpush1.bf16.msra.mxu1 %v6897_v33  ;;  %v6911_v33 = vcombine.low %v4714_v62, %v4716_v11  ;;  %v6913_v41 = vcombine.low %v4717_v49, %v4719_v51  ;;  %v6917_v62 = vcombine.low %v4721_v12, %v4723_v18 }
 0x50d   : > { %5584 = vmatprep.subr.bf16.mxu1 %v6902_v13  ;;  %5969 = vmatpush1.bf16.msra.mxu0 %v6899_v56  ;;  %v4718_v13 = vld [vmem:[#allocation7 + $0x718] sm:$0xff]  ;;  %v6921_v51 = vcombine.low %v4725_v0, %v4727_v45 }
 0x50e   : > { %5970 = vmatprep.subr.bf16.mxu0 %v6904_v37  ;;  %v4720_v56 = vld [vmem:[#allocation7 + $0x738] sm:$0xff] }
 0x50f   : > { %v4724_v37 = vld [vmem:[#allocation7 + $0x778] sm:$0xff] }
 0x510   : > { %5585 = vmatpush1.bf16.msra.mxu1 %v6901_v9  ;;  %v6916_v9 = vcombine.high %v4718_v13, %v4720_v56  ;;  %v6920_v17 = vcombine.high %v4722_v22, %v4724_v37  ;;  %v6919_v11 = vcombine.low %v4722_v22, %v4724_v37 }
 0x511   : > { %5586 = vmatprep.subr.bf16.mxu1 %v6906_v53  ;;  %5971 = vmatpush1.bf16.msra.mxu0 %v6903_v24  ;;  %v6915_v53 = vcombine.low %v4718_v13, %v4720_v56  ;;  %v6918_v24 = vcombine.high %v4721_v12, %v4723_v18  ;;  %v10162_v56 = vld [vmem:[#allocation28_spill] sm:$0xff] }
 0x512   : > { %5456 = vmatmul.mubr.bf16.gmra.mrb[212].mxu1 %v10157_v1  ;;  %5972 = vmatprep.subr.bf16.mxu0 %v6908_v61  ;;  %v4728_v61 = vld [vmem:[#allocation7 + $0x7b8] sm:$0xff] }
 0x513   : > { %5842 = vmatmul.mubr.bf16.gmra.mrb[188].mxu0 %v10157_v1  ;;  %5465 = vmatprep.mubr.bf16.mxu1 %v10158_v3  ;;  %v4731_v1 = vld [vmem:[#allocation7 + $0x7f0] sm:$0xff] }
 0x514   : > { %5851 = vmatprep.mubr.bf16.mxu0 %v10158_v3  ;;  %5587 = vmatpush1.bf16.msra.mxu1 %v6905_v35  ;;  %v4726_v35 = vld [vmem:[#allocation7 + $0x798] sm:$0xff] }
 0x515   : > { %5588 = vmatprep.subr.bf16.mxu1 %v6910_v44  ;;  %5973 = vmatpush1.bf16.msra.mxu0 %v6907_v4  ;;  %v6922_v44 = vcombine.high %v4725_v0, %v4727_v45  ;;  %v4729_v4 = vld [vmem:[#allocation7 + $0x7d0] sm:$0xff]  ;;  %v6924_v49 = vcombine.high %v4726_v35, %v4728_v61  ;;  %v6923_v3 = vcombine.low %v4726_v35, %v4728_v61 }
 0x516   : > { %5974 = vmatprep.subr.bf16.mxu0 %v6912_v16  ;;  %v4732_v16 = vld [vmem:[#allocation7 + $0x7f8] sm:$0xff]  ;;  %v10164_v45 = vld [vmem:[#allocation27_spill] sm:$0xff] }
 0x518   : > { %5589 = vmatpush1.bf16.msra.mxu1 %v6909_v14  ;;  %v6926_v14 = vcombine.high %v4729_v4, %v4731_v1 }
 0x519   : > { %5975 = vmatpush1.bf16.msra.mxu0 %v6911_v33  ;;  %5590 = vmatprep.subr.bf16.mxu1 %v6914_v47  ;;  %v6925_v47 = vcombine.low %v4729_v4, %v4731_v1 }
 0x51a   : > { %5466 = vmatmul.mubr.bf16.gmra.mrb[216].mxu1 %v8910_v30  ;;  %5976 = vmatprep.subr.bf16.mxu0 %v6916_v9 }
 0x51b   : > { %5852 = vmatmul.mubr.bf16.gmra.mrb[192].mxu0 %v8910_v30  ;;  %5475 = vmatprep.mubr.bf16.mxu1 %v10159_v43  ;;  %v4730_v30 = vld [vmem:[#allocation7 + $0x7d8] sm:$0xff] }
 0x51c   : > { %5861 = vmatprep.mubr.bf16.mxu0 %v10159_v43  ;;  %5591 = vmatpush1.bf16.msra.mxu1 %v6913_v41  ;;  %v6928_v33 = vcombine.high %v4730_v30, %v4732_v16  ;;  %v6927_v13 = vcombine.low %v4730_v30, %v4732_v16  ;;  %v10165_v43 = vld [vmem:[#allocation29_spill] sm:$0xff] }
 0x51d   : > { %5977 = vmatpush1.bf16.msra.mxu0 %v6915_v53  ;;  %5592 = vmatprep.subr.bf16.mxu1 %v6918_v24 }
 0x51e   : > { %5978 = vmatprep.subr.bf16.mxu0 %v6920_v17 }
 0x520   : > { %5593 = vmatpush1.bf16.msra.mxu1 %v6917_v62 }
 0x521   : > { %5979 = vmatpush1.bf16.msra.mxu0 %v6919_v11  ;;  %5594 = vmatprep.subr.bf16.mxu1 %v6922_v44 }
 0x522   : > { %5476 = vmatmul.mubr.bf16.gmra.mrb[220].mxu1 %v8926_v48  ;;  %5980 = vmatprep.subr.bf16.mxu0 %v6924_v49 }
 0x523   : > { %5862 = vmatmul.mubr.bf16.gmra.mrb[196].mxu0 %v8926_v48  ;;  %5485 = vmatprep.mubr.bf16.mxu1 %v8944_v10  ;;  %v10160_v48 = vld [vmem:[#allocation23_spill] sm:$0xff] }
 0x524   : > { %5871 = vmatprep.mubr.bf16.mxu0 %v8944_v10  ;;  %5595 = vmatpush1.bf16.msra.mxu1 %v6921_v51  ;;  %v10161_v10 = vld [vmem:[#allocation25_spill] sm:$0xff] }
 0x525   : > { %5981 = vmatpush1.bf16.msra.mxu0 %v6923_v3  ;;  %5596 = vmatprep.subr.bf16.mxu1 %v6926_v14 }
 0x526   : > { %5982 = vmatprep.subr.bf16.mxu0 %v6928_v33 }
 0x528   : > { %5597 = vmatpush1.bf16.msra.mxu1 %v6925_v47 }
 0x529   : > { %5983 = vmatpush1.bf16.msra.mxu0 %v6927_v13  ;;  %6987 = vmatprep.subr.bf16.mxu1 %v9150_v46  ;;  %v10163_v46 = vld [vmem:[#allocation30_spill] sm:$0xff] }
 0x52a   : > { %5486 = vmatmul.mubr.bf16.gmra.mrb[224].mxu1 %v8950_v38 }
 0x52b   : > { %5872 = vmatmul.mubr.bf16.gmra.mrb[200].mxu0 %v8950_v38  ;;  %5495 = vmatprep.mubr.bf16.mxu1 %v8960_v52 }
 0x52c   : > { %5881 = vmatprep.mubr.bf16.mxu0 %v8960_v52 }
 0x532   : > { %5496 = vmatmul.mubr.bf16.gmra.mrb[228].mxu1 %v10160_v48 }
 0x533   : > { %5882 = vmatmul.mubr.bf16.gmra.mrb[204].mxu0 %v10160_v48  ;;  %5505 = vmatprep.mubr.bf16.mxu1 %v10161_v10  ;;  %v10166_v48 = vld [vmem:[#allocation32_spill] sm:$0xff] }
 0x534   : > { %5891 = vmatprep.mubr.bf16.mxu0 %v10161_v10  ;;  %v10167_v10 = vld [vmem:[#allocation34_spill] sm:$0xff] }
 0x53a   : > { %5506 = vmatmul.mubr.bf16.gmra.mrb[232].mxu1 %v10162_v56 }
 0x53b   : > { %5892 = vmatmul.mubr.bf16.gmra.mrb[208].mxu0 %v10162_v56  ;;  %5515 = vmatprep.mubr.bf16.mxu1 %v10163_v46 }
 0x53c   : > { %5901 = vmatprep.mubr.bf16.mxu0 %v10163_v46 }
 0x53d   : > { %v3806_v38 = vpop.f32.mrb[128].mxu1 }
 0x53e   : > { %v4192_v12 = vpop.f32.mrb[104].mxu0  ;;  %v3808_v18 = vpop.f32.mrb[129].mxu1 }
 0x53f   : > { %v4194_v52 = vpop.f32.mrb[105].mxu0  ;;  %v3810_v22 = vpop.f32.mrb[130].mxu1 }
 0x540   : > { %v4196_v37 = vpop.f32.mrb[106].mxu0  ;;  %v4351_v41 = vmax.f32 %v3806_v38, %v3810_v22  ;;  %v3812_v53 = vpop.f32.mrb[131].mxu1 }
 0x541   : > { %v4393_v9 = vmax.f32 %v4192_v12, %v4196_v37  ;;  %v4198_v24 = vpop.f32.mrb[107].mxu0  ;;  %v4372_v17 = vmax.f32 %v3808_v18, %v3812_v53 }
 0x542   : > { %v4414_v0 = vmax.f32 %v4194_v52, %v4198_v24  ;;  %5516 = vmatmul.mubr.bf16.gmra.mrb[236].mxu1 %v10164_v45 }
 0x543   : > { %5902 = vmatmul.mubr.bf16.gmra.mrb[212].mxu0 %v10164_v45  ;;  %5525 = vmatprep.mubr.bf16.mxu1 %v10165_v43 }
 0x544   : > { %5911 = vmatprep.mubr.bf16.mxu0 %v10165_v43 }
 0x545   : > { %v3816_v62 = vpop.f32.mrb[132].mxu1 }
 0x546   : > { %v4202_v11 = vpop.f32.mrb[108].mxu0  ;;  %v4352_v35 = vmax.f32 %v4351_v41, %v3816_v62  ;;  %v3818_v44 = vpop.f32.mrb[133].mxu1  ;;  %v10168_v62 = vld [vmem:[#allocation31_spill] sm:$0xff] }
 0x547   : > { %v4394_v61 = vmax.f32 %v4393_v9, %v4202_v11  ;;  %v4204_v4 = vpop.f32.mrb[109].mxu0  ;;  %v4373_v1 = vmax.f32 %v4372_v17, %v3818_v44  ;;  %v3820_v16 = vpop.f32.mrb[134].mxu1  ;;  %v10169_v11 = vld [vmem:[#allocation33_spill] sm:$0xff] }
 0x548   : > { %v4415_v30 = vmax.f32 %v4414_v0, %v4204_v4  ;;  %v4206_v49 = vpop.f32.mrb[110].mxu0  ;;  %v4353_v51 = vmax.f32 %v4352_v35, %v3820_v16  ;;  %v3822_v14 = vpop.f32.mrb[135].mxu1  ;;  %v10170_v35 = vld [vmem:[#allocation39_spill] sm:$0xff] }
 0x549   : > { %v4395_v3 = vmax.f32 %v4394_v61, %v4206_v49  ;;  %v4208_v33 = vpop.f32.mrb[111].mxu0  ;;  %v4374_v47 = vmax.f32 %v4373_v1, %v3822_v14 }
 0x54a   : > { %v4416_v13 = vmax.f32 %v4415_v30, %v4208_v33  ;;  %5526 = vmatmul.mubr.bf16.gmra.mrb[240].mxu1 %v10166_v48 }
 0x54b   : > { %5912 = vmatmul.mubr.bf16.gmra.mrb[216].mxu0 %v10166_v48  ;;  %5535 = vmatprep.mubr.bf16.mxu1 %v10167_v10 }
 0x54c   : > { %5921 = vmatprep.mubr.bf16.mxu0 %v10167_v10 }
 0x54d   : > { %v3826_v56 = vpop.f32.mrb[136].mxu1 }
 0x54e   : > { %v4212_v46 = vpop.f32.mrb[112].mxu0  ;;  %v4354_v38 = vmax.f32 %v4353_v51, %v3826_v56  ;;  %v3828_v18 = vpop.f32.mrb[137].mxu1 }
 0x54f   : > { %v4396_v12 = vmax.f32 %v4395_v3, %v4212_v46  ;;  %v4214_v52 = vpop.f32.mrb[113].mxu0  ;;  %v4375_v22 = vmax.f32 %v4374_v47, %v3828_v18  ;;  %v3830_v41 = vpop.f32.mrb[138].mxu1  ;;  %v10171_v46 = vld [vmem:[#allocation36_spill] sm:$0xff]  ;;  %v10174_v18 = vld [vmem:[#allocation43_spill] sm:$0xff] }
 0x550   : > { %v4417_v37 = vmax.f32 %v4416_v13, %v4214_v52  ;;  %v4216_v9 = vpop.f32.mrb[114].mxu0  ;;  %v4355_v53 = vmax.f32 %v4354_v38, %v3830_v41  ;;  %v3832_v17 = vpop.f32.mrb[139].mxu1  ;;  %v10172_v38 = vld [vmem:[#allocation41_spill] sm:$0xff] }
 0x551   : > { %v4397_v24 = vmax.f32 %v4396_v12, %v4216_v9  ;;  %v4218_v0 = vpop.f32.mrb[115].mxu0  ;;  %v4376_v45 = vmax.f32 %v4375_v22, %v3832_v17  ;;  %v10173_v12 = vld [vmem:[#allocation38_spill] sm:$0xff] }
 0x552   : > { %v4418_v43 = vmax.f32 %v4417_v37, %v4218_v0  ;;  %5536 = vmatmul.mubr.bf16.gmra.mrb[244].mxu1 %v10168_v62 }
 0x553   : > { %5922 = vmatmul.mubr.bf16.gmra.mrb[220].mxu0 %v10168_v62  ;;  %5545 = vmatprep.mubr.bf16.mxu1 %v10169_v11  ;;  %v10195_v11 = vld [vmem:[#allocation18_spill] sm:$0xff] }
 0x554   : > { %5984 = vmatprep.mubr.bf16.mxu0 %v10170_v35 }
 0x555   : > { %v3836_v61 = vpop.f32.mrb[140].mxu1 }
 0x556   : > { %v4222_v44 = vpop.f32.mrb[116].mxu0  ;;  %v4356_v4 = vmax.f32 %v4355_v53, %v3836_v61  ;;  %v3838_v30 = vpop.f32.mrb[141].mxu1 }
 0x557   : > { %v4398_v1 = vmax.f32 %v4397_v24, %v4222_v44  ;;  %v4224_v16 = vpop.f32.mrb[117].mxu0  ;;  %v4377_v49 = vmax.f32 %v4376_v45, %v3838_v30  ;;  %v3840_v3 = vpop.f32.mrb[142].mxu1  ;;  %v10175_v30 = vld [vmem:[#allocation35_spill] sm:$0xff] }
 0x558   : > { %v4419_v51 = vmax.f32 %v4418_v43, %v4224_v16  ;;  %v4226_v14 = vpop.f32.mrb[118].mxu0  ;;  %v4357_v33 = vmax.f32 %v4356_v4, %v3840_v3  ;;  %v3842_v13 = vpop.f32.mrb[143].mxu1  ;;  %v10176_v16 = vld [vmem:[#allocation40_spill] sm:$0xff] }
 0x559   : > { %v4399_v47 = vmax.f32 %v4398_v1, %v4226_v14  ;;  %v4228_v48 = vpop.f32.mrb[119].mxu0  ;;  %v4378_v10 = vmax.f32 %v4377_v49, %v3842_v13  ;;  %v10177_v49 = vld [vmem:[#allocation42_spill] sm:$0xff] }
 0x55a   : > { %v4420_v56 = vmax.f32 %v4419_v51, %v4228_v48  ;;  %5546 = vmatmul.mubr.bf16.gmra.mrb[248].mxu1 %v10171_v46 }
 0x55b   : > { %5985 = vmatmul.mubr.bf16.vlgmr.msra.gmra.mrb[168].mxu0 %v10172_v38  ;;  %5555 = vmatprep.mubr.bf16.mxu1 %v10173_v12  ;;  %v10194_v12 = vld [vmem:[#allocation56_spill] sm:$0xff] }
 0x55c   : > { %5994 = vmatprep.mubr.bf16.mxu0 %v10174_v18 }
 0x55d   : > { %v3846_v52 = vpop.f32.mrb[144].mxu1 }
 0x55e   : > { %v4232_v22 = vpop.f32.mrb[120].mxu0  ;;  %v4358_v37 = vmax.f32 %v4357_v33, %v3846_v52  ;;  %v3848_v9 = vpop.f32.mrb[145].mxu1 }
 0x55f   : > { %v4400_v41 = vmax.f32 %v4399_v47, %v4232_v22  ;;  %v4234_v53 = vpop.f32.mrb[121].mxu0  ;;  %v4379_v24 = vmax.f32 %v4378_v10, %v3848_v9  ;;  %v3850_v0 = vpop.f32.mrb[146].mxu1 }
 0x560   : > { %v4421_v17 = vmax.f32 %v4420_v56, %v4234_v53  ;;  %v4236_v45 = vpop.f32.mrb[122].mxu0  ;;  %v4359_v43 = vmax.f32 %v4358_v37, %v3850_v0  ;;  %v3852_v61 = vpop.f32.mrb[147].mxu1  ;;  %v10180_v0 = vld [vmem:[#allocation46_spill] sm:$0xff] }
 0x561   : > { %v4401_v62 = vmax.f32 %v4400_v41, %v4236_v45  ;;  %v4238_v44 = vpop.f32.mrb[123].mxu0  ;;  %v4380_v4 = vmax.f32 %v4379_v24, %v3852_v61  ;;  %v10181_v45 = vld [vmem:[#allocation65_spill] sm:$0xff] }
 0x562   : > { %v4422_v1 = vmax.f32 %v4421_v17, %v4238_v44  ;;  %5556 = vmatmul.mubr.bf16.gmra.mrb[252].mxu1 %v10175_v30  ;;  %v10179_v17 = vld [vmem:[#allocation37_spill] sm:$0xff] }
 0x563   : > { %5995 = vmatmul.mubr.bf16.gmra.mrb[172].mxu0 %v10176_v16  ;;  %5598 = vmatprep.mubr.bf16.mxu1 %v10170_v35  ;;  %v10178_v35 = vld [vmem:[#allocation45_spill] sm:$0xff] }
 0x564   : > { %6004 = vmatprep.mubr.bf16.mxu0 %v10177_v49 }
 0x565   : > { %v3856_v51 = vpop.f32.mrb[148].mxu1 }
 0x566   : > { %v4242_v3 = vpop.f32.mrb[124].mxu0  ;;  %v4360_v14 = vmax.f32 %v4359_v43, %v3856_v51  ;;  %v3858_v47 = vpop.f32.mrb[149].mxu1 }
 0x567   : > { %v4402_v33 = vmax.f32 %v4401_v62, %v4242_v3  ;;  %v4244_v13 = vpop.f32.mrb[125].mxu0  ;;  %v4381_v48 = vmax.f32 %v4380_v4, %v3858_v47  ;;  %v3860_v56 = vpop.f32.mrb[150].mxu1 }
 0x568   : > { %v4423_v10 = vmax.f32 %v4422_v1, %v4244_v13  ;;  %v4246_v52 = vpop.f32.mrb[126].mxu0  ;;  %v4361_v22 = vmax.f32 %v4360_v14, %v3860_v56  ;;  %v3862_v41 = vpop.f32.mrb[151].mxu1 }
 0x569   : > { %v4403_v37 = vmax.f32 %v4402_v33, %v4246_v52  ;;  %v4248_v9 = vpop.f32.mrb[127].mxu0  ;;  %v4382_v53 = vmax.f32 %v4381_v48, %v3862_v41  ;;  %v10182_v33 = vld [vmem:[#allocation66_spill] sm:$0xff]  ;;  %v10186_v41 = vld [vmem:[#allocation49_spill] sm:$0xff] }
 0x56a   : > { %v4424_v24 = vmax.f32 %v4423_v10, %v4248_v9  ;;  %5599 = vmatmul.mubr.bf16.vlgmr.msra.gmra.mrb[192].mxu1 %v10172_v38  ;;  %v10183_v10 = vld [vmem:[#allocation47_spill] sm:$0xff] }
 0x56b   : > { %6005 = vmatmul.mubr.bf16.gmra.mrb[176].mxu0 %v10178_v35  ;;  %7003 = vmatpush1.bf16.msra.mxu1 %v10179_v17 }
 0x56c   : > { %5608 = vmatprep.mubr.bf16.mxu1 %v10174_v18  ;;  %6014 = vmatprep.mubr.bf16.mxu0 %v10180_v0 }
 0x56d   : > { %6988 = vmatprep.subr.bf16.mxu1 %v10181_v45  ;;  %v3866_v43 = vpop.f32.mrb[152].mxu1 }
 0x56e   : > { %v4252_v62 = vpop.f32.mrb[128].mxu0  ;;  %v4362_v61 = vmax.f32 %v4361_v22, %v3866_v43  ;;  %v3868_v4 = vpop.f32.mrb[153].mxu1  ;;  %v10184_v22 = vld [vmem:[#allocation44_spill] sm:$0xff] }
 0x56f   : > { %v4404_v44 = vmax.f32 %v4403_v37, %v4252_v62  ;;  %v4254_v1 = vpop.f32.mrb[129].mxu0  ;;  %v4383_v51 = vmax.f32 %v4382_v53, %v3868_v4  ;;  %v3870_v14 = vpop.f32.mrb[154].mxu1  ;;  %7004 = vmatpush1.bf16.msra.mxu1 %v10182_v33  ;;  %v10185_v37 = vld [vmem:[#allocation48_spill] sm:$0xff] }
 0x570   : > { %v4425_v3 = vmax.f32 %v4424_v24, %v4254_v1  ;;  %v4256_v38 = vpop.f32.mrb[130].mxu0  ;;  %v4363_v47 = vmax.f32 %v4362_v61, %v3870_v14  ;;  %v3872_v48 = vpop.f32.mrb[155].mxu1  ;;  %6989 = vmatprep.subr.bf16.mxu1 %v10183_v10  ;;  %v10187_v24 = vld [vmem:[#allocation52_spill] sm:$0xff]  ;;  %v10188_v14 = vld [vmem:[#allocation54_spill] sm:$0xff] }
 0x571   : > { %v4405_v13 = vmax.f32 %v4404_v44, %v4256_v38  ;;  %v4258_v18 = vpop.f32.mrb[131].mxu0  ;;  %v4384_v56 = vmax.f32 %v4383_v51, %v3872_v48  ;;  %v10189_v48 = vld [vmem:[#allocation51_spill] sm:$0xff] }
 0x572   : > { %v4426_v52 = vmax.f32 %v4425_v3, %v4258_v18  ;;  %5609 = vmatmul.mubr.bf16.gmra.mrb[196].mxu1 %v10176_v16 }
 0x573   : > { %6015 = vmatmul.mubr.bf16.gmra.mrb[180].mxu0 %v10184_v22  ;;  %5618 = vmatprep.mubr.bf16.mxu1 %v10177_v49 }
 0x574   : > { %6024 = vmatprep.mubr.bf16.mxu0 %v10185_v37  ;;  %7005 = vmatpush1.bf16.msra.mxu1 %v10186_v41  ;;  %v10190_v41 = vld [vmem:[#allocation50_spill] sm:$0xff] }
 0x575   : > { %v3876_v9 = vpop.f32.mrb[156].mxu1  ;;  %6990 = vmatprep.subr.bf16.mxu1 %v10187_v24  ;;  %v10191_v24 = vld [vmem:[#allocation53_spill] sm:$0xff] }
 0x576   : > { %v4262_v53 = vpop.f32.mrb[132].mxu0  ;;  %v4364_v17 = vmax.f32 %v4363_v47, %v3876_v9  ;;  %v3878_v43 = vpop.f32.mrb[157].mxu1 }
 0x577   : > { %v4406_v45 = vmax.f32 %v4405_v13, %v4262_v53  ;;  %v4264_v62 = vpop.f32.mrb[133].mxu0  ;;  %v4385_v61 = vmax.f32 %v4384_v56, %v3878_v43  ;;  %v3880_v4 = vpop.f32.mrb[158].mxu1  ;;  %v7738_v13 = vmov 1983009808  }
 0x578   : > { %v4427_v44 = vmax.f32 %v4426_v52, %v4264_v62  ;;  %v4266_v16 = vpop.f32.mrb[134].mxu0  ;;  %v4365_v1 = vmax.f32 %v4364_v17, %v3880_v4  ;;  %v3882_v3 = vpop.f32.mrb[159].mxu1  ;;  %7006 = vmatpush1.bf16.msra.mxu1 %v10188_v14  ;;  %v4560_v56 = vunpack.c.l.s4 %v7738_v13  ;;  %v10193_v13 = vld [vmem:[#allocation72_spill] sm:$0xff] }
 0x579   : > { %v4407_v51 = vmax.f32 %v4406_v45, %v4266_v16  ;;  %v4268_v49 = vpop.f32.mrb[135].mxu0  ;;  %v4386_v38 = vmax.f32 %v4385_v61, %v3882_v3  ;;  %6991 = vmatprep.subr.bf16.mxu1 %v10189_v48  ;;  %v10192_v61 = vld [vmem:[#allocation71_spill] sm:$0xff] }
 0x57a   : > { %v4428_v33 = vmax.f32 %v4427_v44, %v4268_v49  ;;  %v4366_v18 = vrot.slane %v4365_v1, 4  ;;  %5619 = vmatmul.mubr.bf16.gmra.mrb[200].mxu1 %v10178_v35  ;;  %v4561_v49 = vunpack.c.0.s8 %v4560_v56 }
 0x57b   : > { %v4408_v10 = vrot.slane %v4407_v51, 4  ;;  %6025 = vmatmul.mubr.bf16.gmra.mrb[184].mxu0 %v9182_v34  ;;  %v4387_v47 = vrot.slane %v4386_v38, 4  ;;  %5628 = vmatprep.mubr.bf16.mxu1 %v10180_v0  ;;  %v4519_v0 = vld [vmem:[%s9803_s9] sm:$0xf] }
 0x57c   : > { %v4429_v52 = vrot.slane %v4428_v33, 4  ;;  %6034 = vmatprep.mubr.bf16.mxu0 %v10190_v41  ;;  %v4367_v9 = vmax.f32 %v4365_v1, %v4366_v18  ;;  %7007 = vmatpush1.bf16.msra.mxu1 %v10191_v24  ;;  %v9575_v56 = vrot.slane %v4519_v0, %v10195_v11 }
 0x57d   : > { %v4409_v53 = vmax.f32 %v4407_v51, %v4408_v10  ;;  %v4388_v17 = vmax.f32 %v4386_v38, %v4387_v47  ;;  %v3886_v43 = vpop.f32.mrb[160].mxu1  ;;  %6992 = vmatprep.subr.bf16.mxu1 %v10192_v61 }
 0x57e   : > { %v4430_v45 = vmax.f32 %v4428_v33, %v4429_v52  ;;  %v4272_v62 = vpop.f32.mrb[136].mxu0  ;;  %v4368_v35 = vrot.slane %v4367_v9, 2  ;;  %v3888_v4 = vpop.f32.mrb[161].mxu1 }
 0x57f   : > { %v4410_v44 = vrot.slane %v4409_v53, 2  ;;  %v4274_v16 = vpop.f32.mrb[137].mxu0  ;;  %v4389_v3 = vrot.slane %v4388_v17, 2  ;;  %v3890_v51 = vpop.f32.mrb[162].mxu1 }
 0x580   : > { %v4431_v1 = vrot.slane %v4430_v45, 2  ;;  %v4276_v14 = vpop.f32.mrb[138].mxu0  ;;  %v4369_v48 = vmax.f32 %v4367_v9, %v4368_v35  ;;  %v4435_v33 = vmax.f32 %v3886_v43, %v3890_v51  ;;  %v3892_v10 = vpop.f32.mrb[163].mxu1  ;;  %7008 = vmatpush1.bf16.msra.mxu1 %v10193_v13  ;;  %v9578_v9 = vrot.slane %v4519_v0, %v10196_v15  ;;  %v10197_v43 = vld [vmem:[#allocation19_spill] sm:$0xff] }
 0x581   : > { %v4411_v38 = vmax.f32 %v4409_v53, %v4410_v44  ;;  %v4477_v18 = vmax.f32 %v4272_v62, %v4276_v14  ;;  %v4278_v47 = vpop.f32.mrb[139].mxu0  ;;  %v4390_v52 = vmax.f32 %v4388_v17, %v4389_v3  ;;  %v4456_v61 = vmax.f32 %v3888_v4, %v3892_v10  ;;  %6993 = vmatprep.subr.bf16.mxu1 %v10194_v12  ;;  %v10198_v62 = vld [vmem:[#allocation64_spill] sm:$0xff]  ;;  %v10199_v4 = vld [vmem:[#allocation67_spill] sm:$0xff] }
 0x582   : > { %v4432_v24 = vmax.f32 %v4430_v45, %v4431_v1  ;;  %v4498_v30 = vmax.f32 %v4274_v16, %v4278_v47  ;;  %v4370_v46 = vrot.slane %v4369_v48, 1  ;;  %5629 = vmatmul.mubr.bf16.gmra.mrb[204].mxu1 %v10184_v22  ;;  %v9583_v17 = vrot.slane %v4519_v0, %v10197_v43  ;;  %v10200_v22 = vld [vmem:[#allocation17_spill] sm:$0xff]  ;;  %v10201_v10 = vld [vmem:[#allocation68_spill] sm:$0xff] }
 0x583   : > { %v4412_v26 = vrot.slane %v4411_v38, 1  ;;  %6035 = vmatmul.mubr.bf16.gmra.mrb[188].mxu0 %v9194_v39  ;;  %v4391_v53 = vrot.slane %v4390_v52, 1  ;;  %v9586_v35 = vrot.slane %v4519_v0, %v10198_v62  ;;  %5638 = vmatprep.mubr.bf16.mxu1 %v10185_v37  ;;  %v9592_v3 = vsub.s32 %v4561_v49, %v10200_v22 }
 0x584   : > { %v4433_v45 = vrot.slane %v4432_v24, 1  ;;  %6044 = vmatprep.mubr.bf16.mxu0 %v9208_v42  ;;  %v4371_v12 = vmax.f32 %v4369_v48, %v4370_v46  ;;  %7009 = vmatpush1.bf16.msra.mxu1 %v10199_v4 }
 0x585   : > { %v4413_v44 = vmax.f32 %v4411_v38, %v4412_v26  ;;  %v4392_v16 = vmax.f32 %v4390_v52, %v4391_v53  ;;  %v3896_v51 = vpop.f32.mrb[164].mxu1  ;;  %6994 = vmatprep.subr.bf16.mxu1 %v10201_v10  ;;  %v10202_v10 = vld [vmem:[#allocation58_spill] sm:$0xff] }
 0x586   : > { %v4434_v1 = vmax.f32 %v4432_v24, %v4433_v45  ;;  %v4282_v14 = vpop.f32.mrb[140].mxu0  ;;  %v4541_v0 = vadd.f32 %v9575_v56, %v4371_v12  ;;  %v4436_v37 = vmax.f32 %v4435_v33, %v3896_v51  ;;  %v3898_v43 = vpop.f32.mrb[165].mxu1  ;;  %v10203_v51 = vld [vmem:[#allocation75_spill] sm:$0xff] }
 0x587   : > { %v4543_v47 = vadd.f32 %v9578_v9, %v4413_v44  ;;  %v4478_v13 = vmax.f32 %v4477_v18, %v4282_v14  ;;  %v4284_v46 = vpop.f32.mrb[141].mxu0  ;;  %v4542_v26 = vadd.f32 %v9583_v17, %v4392_v16  ;;  %v4457_v38 = vmax.f32 %v4456_v61, %v3898_v43  ;;  %v3900_v52 = vpop.f32.mrb[166].mxu1  ;;  %v10204_v43 = vld [vmem:[#allocation76_spill] sm:$0xff] }
 0x588   : > { %v4544_v48 = vadd.f32 %v9586_v35, %v4434_v1  ;;  %v4499_v49 = vmax.f32 %v4498_v30, %v4284_v46  ;;  %v4286_v24 = vpop.f32.mrb[142].mxu0  ;;  %v4437_v53 = vmax.f32 %v4436_v37, %v3900_v52  ;;  %v3902_v4 = vpop.f32.mrb[167].mxu1  ;;  %7010 = vmatpush1.bf16.msra.mxu1 %v10202_v10 }
 0x589   : > { %v4479_v45 = vmax.f32 %v4478_v13, %v4286_v24  ;;  %v4288_v22 = vpop.f32.mrb[143].mxu0  ;;  %v4557_v12 = vcombine.low %v4541_v0, %v4542_v26  ;;  %v4458_v33 = vmax.f32 %v4457_v38, %v3902_v4  ;;  %6995 = vmatprep.subr.bf16.mxu1 %v10203_v51 }
 0x58a   : > { %v4558_v44 = vcombine.low %v4543_v47, %v4544_v48  ;;  %v4500_v18 = vmax.f32 %v4499_v49, %v4288_v22  ;;  %5639 = vmatmul.mubr.bf16.gmra.mrb[208].mxu1 %v9182_v34  ;;  %v10205_v34 = vld [vmem:[#allocation55_spill] sm:$0xff] }
 0x58b   : > { %6045 = vmatmul.mubr.bf16.gmra.mrb[192].mxu0 %v9206_v20  ;;  %v9604_v30 = vrot.slane %v4557_v12, %v9592_v3  ;;  %5648 = vmatprep.mubr.bf16.mxu1 %v10190_v41  ;;  %v10207_v12 = vld [vmem:[#allocation69_spill] sm:$0xff] }
 0x58c   : > { %v9607_v61 = vrot.slane %v4558_v44, %v9592_v3  ;;  %6054 = vmatprep.mubr.bf16.mxu0 %v9228_v59  ;;  %7011 = vmatpush1.bf16.msra.mxu1 %v10204_v43 }
 0x58d   : > { %v3906_v1 = vpop.f32.mrb[168].mxu1  ;;  %6996 = vmatprep.subr.bf16.mxu1 %v10205_v34 }
 0x58e   : > { %v4573_v16 = vcombine.low %v9604_v30, %v9607_v61  ;;  %v4292_v14 = vpop.f32.mrb[144].mxu0  ;;  %v4438_v0 = vmax.f32 %v4437_v53, %v3906_v1  ;;  %v3908_v37 = vpop.f32.mrb[169].mxu1  ;;  %v10206_v53 = vld [vmem:[#allocation62_spill] sm:$0xff]  ;;  %v10214_v30 = vld [vmem:[#allocation36_spill] sm:$0xff] }
 0x58f   : > { %v4480_v47 = vmax.f32 %v4479_v45, %v4292_v14  ;;  %v4294_v13 = vpop.f32.mrb[145].mxu0  ;;  %v4459_v46 = vmax.f32 %v4458_v33, %v3908_v37  ;;  %v3910_v48 = vpop.f32.mrb[170].mxu1  ;;  %v10215_v61 = vld [vmem:[#allocation38_spill] sm:$0xff] }
 0x590   : > { %v4501_v26 = vmax.f32 %v4500_v18, %v4294_v13  ;;  %v4296_v38 = vpop.f32.mrb[146].mxu0  ;;  %v4439_v41 = vmax.f32 %v4438_v0, %v3910_v48  ;;  %v3912_v52 = vpop.f32.mrb[171].mxu1  ;;  %7012 = vmatpush1.bf16.msra.mxu1 %v9380_v55  ;;  %v10208_v0 = vld [vmem:[#allocation61_spill] sm:$0xff] }
 0x591   : > { %v4481_v49 = vmax.f32 %v4480_v47, %v4296_v38  ;;  %v4298_v24 = vpop.f32.mrb[147].mxu0  ;;  %v4460_v4 = vmax.f32 %v4459_v46, %v3912_v52  ;;  %6997 = vmatprep.subr.bf16.mxu1 %v9386_v2 }
 0x592   : > { %v4502_v22 = vmax.f32 %v4501_v26, %v4298_v24  ;;  %5649 = vmatmul.mubr.bf16.gmra.mrb[212].mxu1 %v9194_v39 }
 0x593   : > { %6055 = vmatmul.mubr.bf16.gmra.mrb[196].mxu0 %v9222_v6  ;;  %5658 = vmatprep.mubr.bf16.mxu1 %v9208_v42 }
 0x594   : > { %6064 = vmatprep.mubr.bf16.mxu0 %v9240_v32  ;;  %7013 = vmatpush1.bf16.msra.mxu1 %v10206_v53 }
 0x595   : > { %v3916_v45 = vpop.f32.mrb[172].mxu1  ;;  %6998 = vmatprep.subr.bf16.mxu1 %v10207_v12 }
 0x596   : > { %v4302_v10 = vpop.f32.mrb[148].mxu0  ;;  %v4440_v44 = vmax.f32 %v4439_v41, %v3916_v45  ;;  %v3918_v33 = vpop.f32.mrb[173].mxu1 }
 0x597   : > { %v4482_v55 = vmax.f32 %v4481_v49, %v4302_v10  ;;  %v4304_v18 = vpop.f32.mrb[149].mxu0  ;;  %v4461_v51 = vmax.f32 %v4460_v4, %v3918_v33  ;;  %v3920_v43 = vpop.f32.mrb[174].mxu1 }
 0x598   : > { %v4503_v2 = vmax.f32 %v4502_v22, %v4304_v18  ;;  %v4306_v39 = vpop.f32.mrb[150].mxu0  ;;  %v4441_v1 = vmax.f32 %v4440_v44, %v3920_v43  ;;  %v3922_v34 = vpop.f32.mrb[175].mxu1  ;;  %7014 = vmatpush1.bf16.msra.mxu1 %v10208_v0 }
 0x599   : > { %v4483_v14 = vmax.f32 %v4482_v55, %v4306_v39  ;;  %v4308_v42 = vpop.f32.mrb[151].mxu0  ;;  %v4462_v47 = vmax.f32 %v4461_v51, %v3922_v34  ;;  %6999 = vmatprep.subr.bf16.mxu1 %v9407_v40 }
 0x59a   : > { %v4504_v37 = vmax.f32 %v4503_v2, %v4308_v42  ;;  %5659 = vmatmul.mubr.bf16.gmra.mrb[216].mxu1 %v9206_v20 }
 0x59b   : > { %6065 = vmatmul.mubr.bf16.gmra.mrb[200].mxu0 %v9238_v21  ;;  %5668 = vmatprep.mubr.bf16.mxu1 %v9228_v59 }
 0x59c   : > { %6074 = vmatprep.mubr.bf16.mxu0 %v9256_v50  ;;  %7015 = vmatpush1.bf16.msra.mxu1 %v9410_v54 }
 0x59d   : > { %v3926_v13 = vpop.f32.mrb[176].mxu1  ;;  %7000 = vmatprep.subr.bf16.mxu1 %v9414_v29 }
 0x59e   : > { %v4312_v46 = vpop.f32.mrb[152].mxu0  ;;  %v4442_v26 = vmax.f32 %v4441_v1, %v3926_v13  ;;  %v3928_v38 = vpop.f32.mrb[177].mxu1 }
 0x59f   : > { %v4484_v48 = vmax.f32 %v4483_v14, %v4312_v46  ;;  %v4314_v41 = vpop.f32.mrb[153].mxu0  ;;  %v4463_v49 = vmax.f32 %v4462_v47, %v3928_v38  ;;  %v3930_v52 = vpop.f32.mrb[178].mxu1 }
 0x5a0   : > { %v4505_v40 = vmax.f32 %v4504_v37, %v4314_v41  ;;  %v4316_v20 = vpop.f32.mrb[154].mxu0  ;;  %v4443_v24 = vmax.f32 %v4442_v26, %v3930_v52  ;;  %v3932_v22 = vpop.f32.mrb[179].mxu1  ;;  %7016 = vmatpush1.bf16.msra.mxu1 %v9420_v25 }
 0x5a1   : > { %v4485_v4 = vmax.f32 %v4484_v48, %v4316_v20  ;;  %v4318_v59 = vpop.f32.mrb[155].mxu0  ;;  %v4464_v53 = vmax.f32 %v4463_v49, %v3932_v22  ;;  %7001 = vmatprep.subr.bf16.mxu1 %v9423_v27 }
 0x5a2   : > { %v4506_v54 = vmax.f32 %v4505_v40, %v4318_v59  ;;  %5669 = vmatmul.mubr.bf16.gmra.mrb[220].mxu1 %v9222_v6 }
 0x5a3   : > { %6075 = vmatmul.mubr.bf16.gmra.mrb[204].mxu0 %v9252_v31  ;;  %5678 = vmatprep.mubr.bf16.mxu1 %v9240_v32 }
 0x5a4   : > { %6084 = vmatprep.mubr.bf16.mxu0 %v9275_v7  ;;  %7017 = vmatpush1.bf16.msra.mxu1 %v9426_v58 }
 0x5a5   : > { %v3936_v29 = vpop.f32.mrb[180].mxu1  ;;  %7002 = vmatprep.subr.bf16.mxu1 %v9430_v57 }
 0x5a6   : > { %v4322_v45 = vpop.f32.mrb[156].mxu0  ;;  %v4444_v10 = vmax.f32 %v4443_v24, %v3936_v29  ;;  %v3938_v12 = vpop.f32.mrb[181].mxu1 }
 0x5a7   : > { %v4486_v25 = vmax.f32 %v4485_v4, %v4322_v45  ;;  %v4324_v44 = vpop.f32.mrb[157].mxu0  ;;  %v4465_v55 = vmax.f32 %v4464_v53, %v3938_v12  ;;  %v3940_v33 = vpop.f32.mrb[182].mxu1 }
 0x5a8   : > { %v4507_v27 = vmax.f32 %v4506_v54, %v4324_v44  ;;  %v4326_v6 = vpop.f32.mrb[158].mxu0  ;;  %v4445_v18 = vmax.f32 %v4444_v10, %v3940_v33  ;;  %v3942_v2 = vpop.f32.mrb[183].mxu1  ;;  %7018 = vmatpush1.bf16.msra.mxu1 %v9436_v60 }
 0x5a9   : > { %v4487_v51 = vmax.f32 %v4486_v25, %v4326_v6  ;;  %v4328_v32 = vpop.f32.mrb[159].mxu0  ;;  %v4466_v43 = vmax.f32 %v4465_v55, %v3942_v2 }
 0x5aa   : > { %v4508_v58 = vmax.f32 %v4507_v27, %v4328_v32  ;;  %5679 = vmatmul.mubr.bf16.gmra.mrb[224].mxu1 %v9238_v21 }
 0x5ab   : > { %6085 = vmatmul.mubr.bf16.gmra.mrb[208].mxu0 %v9272_v36  ;;  %5688 = vmatprep.mubr.bf16.mxu1 %v9256_v50 }
 0x5ac   : > { %6094 = vmatprep.mubr.bf16.mxu0 %v9299_v63 }
 0x5ad   : > { %v3946_v57 = vpop.f32.mrb[184].mxu1 }
 0x5ae   : > { %v4332_v39 = vpop.f32.mrb[160].mxu0  ;;  %v4446_v1 = vmax.f32 %v4445_v18, %v3946_v57  ;;  %v3948_v34 = vpop.f32.mrb[185].mxu1 }
 0x5af   : > { %v4488_v14 = vmax.f32 %v4487_v51, %v4332_v39  ;;  %v4334_v42 = vpop.f32.mrb[161].mxu0  ;;  %v4467_v0 = vmax.f32 %v4466_v43, %v3948_v34  ;;  %v3950_v37 = vpop.f32.mrb[186].mxu1  ;;  %v10209_v34 = vld [vmem:[#allocation60_spill] sm:$0xff] }
 0x5b0   : > { %v4509_v47 = vmax.f32 %v4508_v58, %v4334_v42  ;;  %v4336_v60 = vpop.f32.mrb[162].mxu0  ;;  %v4447_v13 = vmax.f32 %v4446_v1, %v3950_v37  ;;  %v3952_v26 = vpop.f32.mrb[187].mxu1 }
 0x5b1   : > { %v4489_v46 = vmax.f32 %v4488_v14, %v4336_v60  ;;  %v4338_v21 = vpop.f32.mrb[163].mxu0  ;;  %v4468_v48 = vmax.f32 %v4467_v0, %v3952_v26 }
 0x5b2   : > { %v4510_v38 = vmax.f32 %v4509_v47, %v4338_v21  ;;  %5689 = vmatmul.mubr.bf16.gmra.mrb[228].mxu1 %v9252_v31 }
 0x5b3   : > { %6095 = vmatmul.mubr.bf16.gmra.mrb[212].mxu0 %v9296_v28  ;;  %5698 = vmatprep.mubr.bf16.mxu1 %v9275_v7 }
 0x5b4   : > { %6104 = vmatprep.mubr.bf16.mxu0 %v9323_v19 }
 0x5b5   : > { %v3956_v50 = vpop.f32.mrb[188].mxu1 }
 0x5b6   : > { %v4342_v41 = vpop.f32.mrb[164].mxu0  ;;  %v4448_v49 = vmax.f32 %v4447_v13, %v3956_v50  ;;  %v3958_v52 = vpop.f32.mrb[189].mxu1  ;;  %v10211_v50 = vld [vmem:[#allocation59_spill] sm:$0xff] }
 0x5b7   : > { %v4490_v40 = vmax.f32 %v4489_v46, %v4342_v41  ;;  %v4344_v20 = vpop.f32.mrb[165].mxu0  ;;  %v4469_v24 = vmax.f32 %v4468_v48, %v3958_v52  ;;  %v3960_v22 = vpop.f32.mrb[190].mxu1 }
 0x5b8   : > { %v4511_v4 = vmax.f32 %v4510_v38, %v4344_v20  ;;  %v4346_v59 = vpop.f32.mrb[166].mxu0  ;;  %v4449_v53 = vmax.f32 %v4448_v49, %v3960_v22  ;;  %v3962_v29 = vpop.f32.mrb[191].mxu1 }
 0x5b9   : > { %v4491_v54 = vmax.f32 %v4490_v40, %v4346_v59  ;;  %v4348_v31 = vpop.f32.mrb[167].mxu0  ;;  %v4470_v45 = vmax.f32 %v4469_v24, %v3962_v29 }
 0x5ba   : > { %v4512_v10 = vmax.f32 %v4511_v4, %v4348_v31  ;;  %v4450_v25 = vrot.slane %v4449_v53, 4  ;;  %5699 = vmatmul.mubr.bf16.gmra.mrb[232].mxu1 %v9272_v36 }
 0x5bb   : > { %v4492_v7 = vrot.slane %v4491_v54, 4  ;;  %6105 = vmatmul.mubr.bf16.gmra.mrb[216].mxu0 %v9320_v23  ;;  %v4471_v12 = vrot.slane %v4470_v45, 4  ;;  %5708 = vmatprep.mubr.bf16.mxu1 %v9299_v63 }
 0x5bc   : > { %v4513_v44 = vrot.slane %v4512_v10, 4  ;;  %6114 = vmatprep.mubr.bf16.mxu0 %v9351_v8  ;;  %v4451_v55 = vmax.f32 %v4449_v53, %v4450_v25 }
 0x5bd   : > { %v4493_v27 = vmax.f32 %v4491_v54, %v4492_v7  ;;  %v4472_v33 = vmax.f32 %v4470_v45, %v4471_v12 }
 0x5be   : > { %v4514_v6 = vmax.f32 %v4512_v10, %v4513_v44  ;;  %v4452_v18 = vrot.slane %v4451_v55, 2 }
 0x5bf   : > { %v4494_v51 = vrot.slane %v4493_v27, 2  ;;  %v4473_v2 = vrot.slane %v4472_v33, 2 }
 0x5c0   : > { %v4515_v32 = vrot.slane %v4514_v6, 2  ;;  %v4453_v43 = vmax.f32 %v4451_v55, %v4452_v18 }
 0x5c1   : > { %v4495_v58 = vmax.f32 %v4493_v27, %v4494_v51  ;;  %v4474_v57 = vmax.f32 %v4472_v33, %v4473_v2 }
 0x5c2   : > { %v4516_v36 = vmax.f32 %v4514_v6, %v4515_v32  ;;  %v4454_v39 = vrot.slane %v4453_v43, 1  ;;  %5709 = vmatmul.mubr.bf16.gmra.mrb[236].mxu1 %v9296_v28 }
 0x5c3   : > { %v4496_v1 = vrot.slane %v4495_v58, 1  ;;  %6115 = vmatmul.mubr.bf16.gmra.mrb[220].mxu0 %v9346_v5  ;;  %v4475_v63 = vrot.slane %v4474_v57, 1  ;;  %5718 = vmatprep.mubr.bf16.mxu1 %v9323_v19  ;;  %v10210_v19 = vld [vmem:[#allocation57_spill] sm:$0xff] }
 0x5c4   : > { %v4517_v14 = vrot.slane %v4516_v36, 1  ;;  %6124 = vmatprep.mubr.bf16.mxu0 %v10209_v34  ;;  %v4455_v42 = vmax.f32 %v4453_v43, %v4454_v39 }
 0x5c5   : > { %v4497_v0 = vmax.f32 %v4495_v58, %v4496_v1  ;;  %v4476_v47 = vmax.f32 %v4474_v57, %v4475_v63 }
 0x5c6   : > { %v4518_v37 = vmax.f32 %v4516_v36, %v4517_v14  ;;  %v4545_v60 = vadd.f32 %v9575_v56, %v4455_v42 }
 0x5c7   : > { %v4547_v13 = vadd.f32 %v9578_v9, %v4497_v0  ;;  %v4546_v28 = vadd.f32 %v9583_v17, %v4476_v47  ;;  %v10212_v17 = vld [vmem:[#allocation70_spill] sm:$0xff] }
 0x5c8   : > { %v4548_v46 = vadd.f32 %v9586_v35, %v4518_v37 }
 0x5c9   : > { %v4574_v26 = vcombine.low %v4545_v60, %v4546_v28 }
 0x5ca   : > { %v4575_v21 = vcombine.low %v4547_v13, %v4548_v46  ;;  %5719 = vmatmul.mubr.bf16.gmra.mrb[240].mxu1 %v9320_v23 }
 0x5cb   : > { %6125 = vmatmul.mubr.bf16.gmra.mrb[224].mxu0 %v10210_v19  ;;  %v4582_v48 = vrot.slane %v4574_v26, %v9592_v3  ;;  %5728 = vmatprep.mubr.bf16.mxu1 %v9351_v8 }
 0x5cc   : > { %v4589_v38 = vrot.slane %v4575_v21, %v9592_v3  ;;  %6134 = vmatprep.mubr.bf16.mxu0 %v10211_v50 }
 0x5ce   : > { %v4590_v56 = vcombine.low %v4582_v48, %v4589_v38 }
 0x5d0   : > { %v4595_v9 = vrot.slane %v4590_v56, 7 }
 0x5d2   : > { %v4596_v23 = vsel %vm1204_vm2, %v4595_v9, %v4573_v16  ;;  %5729 = vmatmul.mubr.bf16.gmra.mrb[244].mxu1 %v9346_v5  ;;  %v10213_v5 = vld [vmem:[#allocation33_spill] sm:$0xff]  ;;  %v10216_v16 = vld [vmem:[#allocation35_spill] sm:$0xff] }
 0x5d3   : > { %6135 = vmatmul.mubr.bf16.gmra.mrb[228].mxu0 %v10212_v17  ;;  %v4598_v8 = vsel %vm4597_vm3, %v4595_v9, %v4596_v23  ;;  %5738 = vmatprep.mubr.bf16.mxu1 %v10209_v34 }
 0x5d4   : > { %v4600_v35 = vsel %vm4599_vm4, %v4595_v9, %v4598_v8 }
 0x5d5   : > { %v4602_v41 = vsel %vm4601_vm5, %v4595_v9, %v4600_v35 }
 0x5d6   : > { %4604 = vst [vmem:[%s9679_s29] sm:$0xff] %v4602_v41 }
 0x5da   : > { %5739 = vmatmul.mubr.bf16.gmra.mrb[248].mxu1 %v10210_v19 }
 0x5db   : > { %5748 = vmatprep.mubr.bf16.mxu1 %v10211_v50 }
 0x5e2   : > { %5749 = vmatmul.mubr.bf16.gmra.mrb[252].mxu1 %v10212_v17 }
 0x5e3   : > { %5931 = vmatprep.mubr.bf16.mxu1 %v10213_v5 }
 0x5ea   : > { %5932 = vmatmul.mubr.bf16.vlgmr.msra.gmra.mrb[0].mxu1 %v10214_v30 }
 0x5eb   : > { %5941 = vmatprep.mubr.bf16.mxu1 %v10215_v61 }
 0x5f2   : > { %5942 = vmatmul.mubr.bf16.gmra.mrb[4].mxu1 %v10216_v16 }
 0x62e   : > { %v5986_v49 = vpop.f32.mrb[168].mxu0 }
 0x62f   : > { %v5988_v40 = vpop.f32.mrb[169].mxu0 }
 0x630   : > { %v5990_v52 = vpop.f32.mrb[170].mxu0 }
 0x631   : > { %v6187_v20 = vmax.f32 %v5986_v49, %v5990_v52  ;;  %v5992_v24 = vpop.f32.mrb[171].mxu0 }
 0x632   : > { %v6208_v4 = vmax.f32 %v5988_v40, %v5992_v24 }
 0x636   : > { %v5996_v22 = vpop.f32.mrb[172].mxu0 }
 0x637   : > { %v6188_v59 = vmax.f32 %v6187_v20, %v5996_v22  ;;  %v5998_v53 = vpop.f32.mrb[173].mxu0 }
 0x638   : > { %v6209_v54 = vmax.f32 %v6208_v4, %v5998_v53  ;;  %v6000_v29 = vpop.f32.mrb[174].mxu0 }
 0x639   : > { %v6189_v31 = vmax.f32 %v6188_v59, %v6000_v29  ;;  %v6002_v45 = vpop.f32.mrb[175].mxu0 }
 0x63a   : > { %v6210_v10 = vmax.f32 %v6209_v54, %v6002_v45 }
 0x63d   : > { %v5600_v25 = vpop.f32.mrb[192].mxu1 }
 0x63e   : > { %v6006_v7 = vpop.f32.mrb[176].mxu0  ;;  %v5602_v44 = vpop.f32.mrb[193].mxu1 }
 0x63f   : > { %v6190_v12 = vmax.f32 %v6189_v31, %v6006_v7  ;;  %v6008_v55 = vpop.f32.mrb[177].mxu0  ;;  %v5604_v33 = vpop.f32.mrb[194].mxu1 }
 0x640   : > { %v6211_v27 = vmax.f32 %v6210_v10, %v6008_v55  ;;  %v6010_v6 = vpop.f32.mrb[178].mxu0  ;;  %v6145_v18 = vmax.f32 %v5600_v25, %v5604_v33  ;;  %v5606_v2 = vpop.f32.mrb[195].mxu1 }
 0x641   : > { %v6191_v51 = vmax.f32 %v6190_v12, %v6010_v6  ;;  %v6012_v32 = vpop.f32.mrb[179].mxu0  ;;  %v6166_v43 = vmax.f32 %v5602_v44, %v5606_v2 }
 0x642   : > { %v6212_v58 = vmax.f32 %v6211_v27, %v6012_v32 }
 0x645   : > { %v5610_v57 = vpop.f32.mrb[196].mxu1 }
 0x646   : > { %v6016_v36 = vpop.f32.mrb[180].mxu0  ;;  %v6146_v39 = vmax.f32 %v6145_v18, %v5610_v57  ;;  %v5612_v63 = vpop.f32.mrb[197].mxu1 }
 0x647   : > { %v6192_v1 = vmax.f32 %v6191_v51, %v6016_v36  ;;  %v6018_v14 = vpop.f32.mrb[181].mxu0  ;;  %v6167_v34 = vmax.f32 %v6166_v43, %v5612_v63  ;;  %v5614_v0 = vpop.f32.mrb[198].mxu1 }
 0x648   : > { %v6213_v42 = vmax.f32 %v6212_v58, %v6018_v14  ;;  %v6020_v47 = vpop.f32.mrb[182].mxu0  ;;  %v6147_v37 = vmax.f32 %v6146_v39, %v5614_v0  ;;  %v5616_v13 = vpop.f32.mrb[199].mxu1 }
 0x649   : > { %v6193_v60 = vmax.f32 %v6192_v1, %v6020_v47  ;;  %v6022_v28 = vpop.f32.mrb[183].mxu0  ;;  %v6168_v46 = vmax.f32 %v6167_v34, %v5616_v13 }
 0x64a   : > { %v6214_v26 = vmax.f32 %v6213_v42, %v6022_v28 }
 0x64d   : > { %v5620_v21 = vpop.f32.mrb[200].mxu1 }
 0x64e   : > { %v6026_v19 = vpop.f32.mrb[184].mxu0  ;;  %v6148_v48 = vmax.f32 %v6147_v37, %v5620_v21  ;;  %v5622_v50 = vpop.f32.mrb[201].mxu1 }
 0x64f   : > { %v6194_v38 = vmax.f32 %v6193_v60, %v6026_v19  ;;  %v6028_v56 = vpop.f32.mrb[185].mxu0  ;;  %v6169_v9 = vmax.f32 %v6168_v46, %v5622_v50  ;;  %v5624_v17 = vpop.f32.mrb[202].mxu1 }
 0x650   : > { %v6215_v23 = vmax.f32 %v6214_v26, %v6028_v56  ;;  %v6030_v8 = vpop.f32.mrb[186].mxu0  ;;  %v6149_v35 = vmax.f32 %v6148_v48, %v5624_v17  ;;  %v5626_v5 = vpop.f32.mrb[203].mxu1 }
 0x651   : > { %v6195_v41 = vmax.f32 %v6194_v38, %v6030_v8  ;;  %v6032_v30 = vpop.f32.mrb[187].mxu0  ;;  %v6170_v61 = vmax.f32 %v6169_v9, %v5626_v5 }
 0x652   : > { %v6216_v16 = vmax.f32 %v6215_v23, %v6032_v30 }
 0x655   : > { %v5630_v49 = vpop.f32.mrb[204].mxu1 }
 0x656   : > { %v6036_v40 = vpop.f32.mrb[188].mxu0  ;;  %v6150_v52 = vmax.f32 %v6149_v35, %v5630_v49  ;;  %v5632_v24 = vpop.f32.mrb[205].mxu1 }
 0x657   : > { %v6196_v20 = vmax.f32 %v6195_v41, %v6036_v40  ;;  %v6038_v4 = vpop.f32.mrb[189].mxu0  ;;  %v6171_v22 = vmax.f32 %v6170_v61, %v5632_v24  ;;  %v5634_v53 = vpop.f32.mrb[206].mxu1  ;;  %v9692_v61 = vld [vmem:[%s9803_s9 + $0x4] sm:$0xf] }
 0x658   : > { %v6217_v59 = vmax.f32 %v6216_v16, %v6038_v4  ;;  %v6040_v54 = vpop.f32.mrb[190].mxu0  ;;  %v6151_v29 = vmax.f32 %v6150_v52, %v5634_v53  ;;  %v5636_v45 = vpop.f32.mrb[207].mxu1 }
 0x659   : > { %v6197_v31 = vmax.f32 %v6196_v20, %v6040_v54  ;;  %v6042_v10 = vpop.f32.mrb[191].mxu0  ;;  %v6172_v25 = vmax.f32 %v6171_v22, %v5636_v45  ;;  %v9696_v45 = vrot.slane %v9692_v61, %v10196_v15 }
 0x65a   : > { %v6218_v7 = vmax.f32 %v6217_v59, %v6042_v10 }
 0x65d   : > { %v5640_v12 = vpop.f32.mrb[208].mxu1 }
 0x65e   : > { %v6046_v44 = vpop.f32.mrb[192].mxu0  ;;  %v6152_v55 = vmax.f32 %v6151_v29, %v5640_v12  ;;  %v5642_v33 = vpop.f32.mrb[209].mxu1 }
 0x65f   : > { %v6198_v27 = vmax.f32 %v6197_v31, %v6046_v44  ;;  %v6048_v6 = vpop.f32.mrb[193].mxu0  ;;  %v6173_v18 = vmax.f32 %v6172_v25, %v5642_v33  ;;  %v5644_v2 = vpop.f32.mrb[210].mxu1  ;;  %v9700_v25 = vrot.slane %v9692_v61, %v10198_v62 }
 0x660   : > { %v6219_v51 = vmax.f32 %v6218_v7, %v6048_v6  ;;  %v6050_v32 = vpop.f32.mrb[194].mxu0  ;;  %v6153_v43 = vmax.f32 %v6152_v55, %v5644_v2  ;;  %v5646_v57 = vpop.f32.mrb[211].mxu1 }
 0x661   : > { %v6199_v58 = vmax.f32 %v6198_v27, %v6050_v32  ;;  %v6052_v36 = vpop.f32.mrb[195].mxu0  ;;  %v6174_v39 = vmax.f32 %v6173_v18, %v5646_v57 }
 0x662   : > { %v6220_v1 = vmax.f32 %v6219_v51, %v6052_v36 }
 0x665   : > { %v5650_v63 = vpop.f32.mrb[212].mxu1 }
 0x666   : > { %v6056_v14 = vpop.f32.mrb[196].mxu0  ;;  %v6154_v34 = vmax.f32 %v6153_v43, %v5650_v63  ;;  %v5652_v0 = vpop.f32.mrb[213].mxu1 }
 0x667   : > { %v6200_v42 = vmax.f32 %v6199_v58, %v6056_v14  ;;  %v6058_v47 = vpop.f32.mrb[197].mxu0  ;;  %v6175_v37 = vmax.f32 %v6174_v39, %v5652_v0  ;;  %v5654_v13 = vpop.f32.mrb[214].mxu1 }
 0x668   : > { %v6221_v60 = vmax.f32 %v6220_v1, %v6058_v47  ;;  %v6060_v28 = vpop.f32.mrb[198].mxu0  ;;  %v6155_v46 = vmax.f32 %v6154_v34, %v5654_v13  ;;  %v5656_v21 = vpop.f32.mrb[215].mxu1 }
 0x669   : > { %v6201_v26 = vmax.f32 %v6200_v42, %v6060_v28  ;;  %v6062_v19 = vpop.f32.mrb[199].mxu0  ;;  %v6176_v48 = vmax.f32 %v6175_v37, %v5656_v21 }
 0x66a   : > { %v6222_v38 = vmax.f32 %v6221_v60, %v6062_v19 }
 0x66b   : > { %v6202_v50 = vrot.slane %v6201_v26, 4 }
 0x66c   : > { %v6223_v56 = vrot.slane %v6222_v38, 4 }
 0x66d   : > { %v6203_v9 = vmax.f32 %v6201_v26, %v6202_v50  ;;  %v5660_v17 = vpop.f32.mrb[216].mxu1 }
 0x66e   : > { %v6224_v23 = vmax.f32 %v6222_v38, %v6223_v56  ;;  %v6066_v8 = vpop.f32.mrb[200].mxu0  ;;  %v6156_v41 = vmax.f32 %v6155_v46, %v5660_v17  ;;  %v5662_v5 = vpop.f32.mrb[217].mxu1 }
 0x66f   : > { %v6204_v35 = vrot.slane %v6203_v9, 2  ;;  %v6068_v30 = vpop.f32.mrb[201].mxu0  ;;  %v6177_v49 = vmax.f32 %v6176_v48, %v5662_v5  ;;  %v5664_v40 = vpop.f32.mrb[218].mxu1 }
 0x670   : > { %v6225_v16 = vrot.slane %v6224_v23, 2  ;;  %v6070_v52 = vpop.f32.mrb[202].mxu0  ;;  %v6157_v24 = vmax.f32 %v6156_v41, %v5664_v40  ;;  %v5666_v22 = vpop.f32.mrb[219].mxu1 }
 0x671   : > { %v6205_v20 = vmax.f32 %v6203_v9, %v6204_v35  ;;  %v6271_v4 = vmax.f32 %v6066_v8, %v6070_v52  ;;  %v6072_v59 = vpop.f32.mrb[203].mxu0  ;;  %v6178_v54 = vmax.f32 %v6177_v49, %v5666_v22  ;;  %v10217_v49 = vld [vmem:[#allocation19_spill] sm:$0xff] }
 0x672   : > { %v6226_v53 = vmax.f32 %v6224_v23, %v6225_v16  ;;  %v6292_v29 = vmax.f32 %v6068_v30, %v6072_v59  ;;  %v9709_v30 = vrot.slane %v9692_v61, %v10195_v11  ;;  %v9713_v40 = vrot.slane %v9692_v61, %v10217_v49 }
 0x673   : > { %v6206_v31 = vrot.slane %v6205_v20, 1 }
 0x674   : > { %v6227_v10 = vrot.slane %v6226_v53, 1 }
 0x675   : > { %v6207_v7 = vmax.f32 %v6205_v20, %v6206_v31  ;;  %v5670_v44 = vpop.f32.mrb[220].mxu1 }
 0x676   : > { %v6228_v12 = vmax.f32 %v6226_v53, %v6227_v10  ;;  %v6076_v55 = vpop.f32.mrb[204].mxu0  ;;  %v6158_v33 = vmax.f32 %v6157_v24, %v5670_v44  ;;  %v5672_v18 = vpop.f32.mrb[221].mxu1 }
 0x677   : > { %v9703_v27 = vadd.f32 %v9696_v45, %v6207_v7  ;;  %v6272_v6 = vmax.f32 %v6271_v4, %v6076_v55  ;;  %v6078_v51 = vpop.f32.mrb[205].mxu0  ;;  %v6179_v15 = vmax.f32 %v6178_v54, %v5672_v18  ;;  %v5674_v43 = vpop.f32.mrb[222].mxu1 }
 0x678   : > { %v6338_v2 = vadd.f32 %v9700_v25, %v6228_v12  ;;  %v6293_v32 = vmax.f32 %v6292_v29, %v6078_v51  ;;  %v6080_v58 = vpop.f32.mrb[206].mxu0  ;;  %v6159_v57 = vmax.f32 %v6158_v33, %v5674_v43  ;;  %v5676_v36 = vpop.f32.mrb[223].mxu1 }
 0x679   : > { %v6273_v62 = vmax.f32 %v6272_v6, %v6080_v58  ;;  %v6082_v39 = vpop.f32.mrb[207].mxu0  ;;  %v6180_v63 = vmax.f32 %v6179_v15, %v5676_v36 }
 0x67a   : > { %v6352_v1 = vcombine.low %v9703_v27, %v6338_v2  ;;  %v6294_v14 = vmax.f32 %v6293_v32, %v6082_v39  ;;  %v6160_v34 = vrot.slane %v6159_v57, 4 }
 0x67b   : > { %v6181_v42 = vrot.slane %v6180_v63, 4 }
 0x67c   : > { %v6161_v0 = vmax.f32 %v6159_v57, %v6160_v34  ;;  %v9718_v51 = vrot.slane %v6352_v1, %v9592_v3 }
 0x67d   : > { %v6182_v47 = vmax.f32 %v6180_v63, %v6181_v42  ;;  %v5680_v37 = vpop.f32.mrb[224].mxu1 }
 0x67e   : > { %v6086_v60 = vpop.f32.mrb[208].mxu0  ;;  %v6162_v13 = vrot.slane %v6161_v0, 2  ;;  %v5682_v46 = vpop.f32.mrb[225].mxu1 }
 0x67f   : > { %v6274_v28 = vmax.f32 %v6273_v62, %v6086_v60  ;;  %v6088_v26 = vpop.f32.mrb[209].mxu0  ;;  %v6183_v21 = vrot.slane %v6182_v47, 2  ;;  %v5684_v48 = vpop.f32.mrb[226].mxu1 }
 0x680   : > { %v6295_v19 = vmax.f32 %v6294_v14, %v6088_v26  ;;  %v6090_v38 = vpop.f32.mrb[210].mxu0  ;;  %v6163_v50 = vmax.f32 %v6161_v0, %v6162_v13  ;;  %v6229_v56 = vmax.f32 %v5680_v37, %v5684_v48  ;;  %v5686_v23 = vpop.f32.mrb[227].mxu1 }
 0x681   : > { %v6275_v9 = vmax.f32 %v6274_v28, %v6090_v38  ;;  %v6092_v17 = vpop.f32.mrb[211].mxu0  ;;  %v6184_v8 = vmax.f32 %v6182_v47, %v6183_v21  ;;  %v6250_v35 = vmax.f32 %v5682_v46, %v5686_v23 }
 0x682   : > { %v6296_v41 = vmax.f32 %v6295_v19, %v6092_v17  ;;  %v6164_v5 = vrot.slane %v6163_v50, 1 }
 0x683   : > { %v6185_v16 = vrot.slane %v6184_v8, 1 }
 0x684   : > { %v6165_v52 = vmax.f32 %v6163_v50, %v6164_v5 }
 0x685   : > { %v6186_v20 = vmax.f32 %v6184_v8, %v6185_v16  ;;  %v5690_v24 = vpop.f32.mrb[228].mxu1 }
 0x686   : > { %v6096_v4 = vpop.f32.mrb[212].mxu0  ;;  %v6335_v22 = vadd.f32 %v9709_v30, %v6165_v52  ;;  %v6230_v59 = vmax.f32 %v6229_v56, %v5690_v24  ;;  %v5692_v54 = vpop.f32.mrb[229].mxu1 }
 0x687   : > { %v6276_v53 = vmax.f32 %v6275_v9, %v6096_v4  ;;  %v6098_v29 = vpop.f32.mrb[213].mxu0  ;;  %v6336_v31 = vadd.f32 %v9713_v40, %v6186_v20  ;;  %v6251_v10 = vmax.f32 %v6250_v35, %v5692_v54  ;;  %v5694_v7 = vpop.f32.mrb[230].mxu1 }
 0x688   : > { %v6297_v11 = vmax.f32 %v6296_v41, %v6098_v29  ;;  %v6100_v12 = vpop.f32.mrb[214].mxu0  ;;  %v6231_v44 = vmax.f32 %v6230_v59, %v5694_v7  ;;  %v5696_v61 = vpop.f32.mrb[231].mxu1 }
 0x689   : > { %v6277_v55 = vmax.f32 %v6276_v53, %v6100_v12  ;;  %v6102_v27 = vpop.f32.mrb[215].mxu0  ;;  %v6351_v33 = vcombine.low %v6335_v22, %v6336_v31  ;;  %v6252_v6 = vmax.f32 %v6251_v10, %v5696_v61 }
 0x68a   : > { %v6298_v18 = vmax.f32 %v6297_v11, %v6102_v27 }
 0x68b   : > { %v9721_v2 = vrot.slane %v6351_v33, %v9592_v3 }
 0x68d   : > { %v6367_v15 = vcombine.low %v9721_v2, %v9718_v51  ;;  %v5700_v32 = vpop.f32.mrb[232].mxu1 }
 0x68e   : > { %v6106_v43 = vpop.f32.mrb[216].mxu0  ;;  %v6232_v58 = vmax.f32 %v6231_v44, %v5700_v32  ;;  %v5702_v62 = vpop.f32.mrb[233].mxu1 }
 0x68f   : > { %v6278_v57 = vmax.f32 %v6277_v55, %v6106_v43  ;;  %v6108_v36 = vpop.f32.mrb[217].mxu0  ;;  %v6253_v39 = vmax.f32 %v6252_v6, %v5702_v62  ;;  %v5704_v14 = vpop.f32.mrb[234].mxu1 }
 0x690   : > { %v6299_v63 = vmax.f32 %v6298_v18, %v6108_v36  ;;  %v6110_v34 = vpop.f32.mrb[218].mxu0  ;;  %v6233_v42 = vmax.f32 %v6232_v58, %v5704_v14  ;;  %v5706_v1 = vpop.f32.mrb[235].mxu1 }
 0x691   : > { %v6279_v0 = vmax.f32 %v6278_v57, %v6110_v34  ;;  %v6112_v47 = vpop.f32.mrb[219].mxu0  ;;  %v6254_v37 = vmax.f32 %v6253_v39, %v5706_v1 }
 0x692   : > { %v6300_v60 = vmax.f32 %v6299_v63, %v6112_v47 }
 0x695   : > { %v5710_v13 = vpop.f32.mrb[236].mxu1 }
 0x696   : > { %v6116_v28 = vpop.f32.mrb[220].mxu0  ;;  %v6234_v46 = vmax.f32 %v6233_v42, %v5710_v13  ;;  %v5712_v21 = vpop.f32.mrb[237].mxu1 }
 0x697   : > { %v9725_v26 = vmax.f32 %v6279_v0, %v6116_v28  ;;  %v6118_v19 = vpop.f32.mrb[221].mxu0  ;;  %v6255_v48 = vmax.f32 %v6254_v37, %v5712_v21  ;;  %v5714_v50 = vpop.f32.mrb[238].mxu1 }
 0x698   : > { %v9727_v38 = vmax.f32 %v6300_v60, %v6118_v19  ;;  %v6120_v56 = vpop.f32.mrb[222].mxu0  ;;  %v6235_v9 = vmax.f32 %v6234_v46, %v5714_v50  ;;  %v5716_v17 = vpop.f32.mrb[239].mxu1 }
 0x699   : > { %v6281_v23 = vmax.f32 %v9725_v26, %v6120_v56  ;;  %v6122_v8 = vpop.f32.mrb[223].mxu0  ;;  %v6256_v35 = vmax.f32 %v6255_v48, %v5716_v17 }
 0x69a   : > { %v6302_v41 = vmax.f32 %v9727_v38, %v6122_v8 }
 0x69d   : > { %v5720_v5 = vpop.f32.mrb[240].mxu1 }
 0x69e   : > { %v6126_v16 = vpop.f32.mrb[224].mxu0  ;;  %v6236_v49 = vmax.f32 %v6235_v9, %v5720_v5  ;;  %v5722_v52 = vpop.f32.mrb[241].mxu1 }
 0x69f   : > { %v6128_v20 = vpop.f32.mrb[225].mxu0  ;;  %v6257_v24 = vmax.f32 %v6256_v35, %v5722_v52  ;;  %v5724_v4 = vpop.f32.mrb[242].mxu1 }
 0x6a0   : > { %v6130_v22 = vpop.f32.mrb[226].mxu0  ;;  %v6237_v59 = vmax.f32 %v6236_v49, %v5724_v4  ;;  %v5726_v53 = vpop.f32.mrb[243].mxu1 }
 0x6a1   : > { %v6132_v54 = vpop.f32.mrb[227].mxu0  ;;  %v6258_v29 = vmax.f32 %v6257_v24, %v5726_v53 }
 0x6a5   : > { %v5730_v31 = vpop.f32.mrb[244].mxu1 }
 0x6a6   : > { %v6136_v10 = vpop.f32.mrb[228].mxu0  ;;  %v6238_v11 = vmax.f32 %v6237_v59, %v5730_v31  ;;  %v5732_v7 = vpop.f32.mrb[245].mxu1 }
 0x6a7   : > { %v6138_v12 = vpop.f32.mrb[229].mxu0  ;;  %v6259_v44 = vmax.f32 %v6258_v29, %v5732_v7  ;;  %v5734_v55 = vpop.f32.mrb[246].mxu1 }
 0x6a8   : > { %v6140_v61 = vpop.f32.mrb[230].mxu0  ;;  %v6239_v27 = vmax.f32 %v6238_v11, %v5734_v55  ;;  %v5736_v33 = vpop.f32.mrb[247].mxu1 }
 0x6a9   : > { %v6142_v6 = vpop.f32.mrb[231].mxu0  ;;  %v6260_v18 = vmax.f32 %v6259_v44, %v5736_v33 }
 0x6ad   : > { %v5740_v32 = vpop.f32.mrb[248].mxu1 }
 0x6ae   : > { %v6240_v43 = vmax.f32 %v6239_v27, %v5740_v32  ;;  %v5742_v58 = vpop.f32.mrb[249].mxu1 }
 0x6af   : > { %v6261_v57 = vmax.f32 %v6260_v18, %v5742_v58  ;;  %v5744_v62 = vpop.f32.mrb[250].mxu1 }
 0x6b0   : > { %v6241_v36 = vmax.f32 %v6240_v43, %v5744_v62  ;;  %v5746_v39 = vpop.f32.mrb[251].mxu1 }
 0x6b1   : > { %v6262_v63 = vmax.f32 %v6261_v57, %v5746_v39 }
 0x6b5   : > { %v5750_v14 = vpop.f32.mrb[252].mxu1 }
 0x6b6   : > { %v6242_v34 = vmax.f32 %v6241_v36, %v5750_v14  ;;  %v5752_v42 = vpop.f32.mrb[253].mxu1 }
 0x6b7   : > { %v6263_v0 = vmax.f32 %v6262_v63, %v5752_v42  ;;  %v5754_v1 = vpop.f32.mrb[254].mxu1 }
 0x6b8   : > { %v6243_v47 = vmax.f32 %v6242_v34, %v5754_v1  ;;  %v5756_v37 = vpop.f32.mrb[255].mxu1 }
 0x6b9   : > { %v6264_v60 = vmax.f32 %v6263_v0, %v5756_v37 }
 0x6ba   : > { %v6244_v13 = vrot.slane %v6243_v47, 4 }
 0x6bb   : > { %v6265_v28 = vrot.slane %v6264_v60, 4 }
 0x6bc   : > { %v6245_v46 = vmax.f32 %v6243_v47, %v6244_v13 }
 0x6bd   : > { %v6266_v26 = vmax.f32 %v6264_v60, %v6265_v28  ;;  %v5933_v21 = vpop.f32.mrb[0].mxu1 }
 0x6be   : > { %v6246_v19 = vrot.slane %v6245_v46, 2  ;;  %v6127_v48 = vadd.f32 %v6126_v16, %v5933_v21  ;;  %v5935_v38 = vpop.f32.mrb[1].mxu1 }
 0x6bf   : > { %v6267_v50 = vrot.slane %v6266_v26, 2  ;;  %v6129_v56 = vadd.f32 %v6128_v20, %v5935_v38  ;;  %v5937_v9 = vpop.f32.mrb[2].mxu1 }
 0x6c0   : > { %v6247_v17 = vmax.f32 %v6245_v46, %v6246_v19  ;;  %v6282_v8 = vmax.f32 %v6281_v23, %v6127_v48  ;;  %v6131_v35 = vadd.f32 %v6130_v22, %v5937_v9  ;;  %v5939_v5 = vpop.f32.mrb[3].mxu1 }
 0x6c1   : > { %v6268_v49 = vmax.f32 %v6266_v26, %v6267_v50  ;;  %v6303_v52 = vmax.f32 %v6302_v41, %v6129_v56  ;;  %v6133_v24 = vadd.f32 %v6132_v54, %v5939_v5 }
 0x6c2   : > { %v6248_v4 = vrot.slane %v6247_v17, 1  ;;  %v6283_v59 = vmax.f32 %v6282_v8, %v6131_v35 }
 0x6c3   : > { %v6269_v53 = vrot.slane %v6268_v49, 1  ;;  %v6304_v29 = vmax.f32 %v6303_v52, %v6133_v24 }
 0x6c4   : > { %v6249_v31 = vmax.f32 %v6247_v17, %v6248_v4 }
 0x6c5   : > { %v6270_v11 = vmax.f32 %v6268_v49, %v6269_v53  ;;  %v5943_v7 = vpop.f32.mrb[4].mxu1 }
 0x6c6   : > { %v6339_v16 = vadd.f32 %v9709_v30, %v6249_v31  ;;  %v6137_v44 = vadd.f32 %v6136_v10, %v5943_v7  ;;  %v5945_v55 = vpop.f32.mrb[5].mxu1 }
 0x6c7   : > { %v6340_v20 = vadd.f32 %v9713_v40, %v6270_v11  ;;  %v6139_v27 = vadd.f32 %v6138_v12, %v5945_v55  ;;  %v5947_v23 = vpop.f32.mrb[6].mxu1 }
 0x6c8   : > { %v6284_v22 = vmax.f32 %v6283_v59, %v6137_v44  ;;  %v6141_v33 = vadd.f32 %v6140_v61, %v5947_v23  ;;  %v5949_v18 = vpop.f32.mrb[7].mxu1 }
 0x6c9   : > { %v6368_v41 = vcombine.low %v6339_v16, %v6340_v20  ;;  %v6305_v54 = vmax.f32 %v6304_v29, %v6139_v27  ;;  %v6143_v32 = vadd.f32 %v6142_v6, %v5949_v18 }
 0x6ca   : > { %v6285_v43 = vmax.f32 %v6284_v22, %v6141_v33 }
 0x6cb   : > { %v6306_v58 = vmax.f32 %v6305_v54, %v6143_v32  ;;  %v6376_v1 = vrot.slane %v6368_v41, %v9592_v3 }
 0x6cc   : > { %v6286_v57 = vrot.slane %v6285_v43, 4 }
 0x6cd   : > { %v6307_v62 = vrot.slane %v6306_v58, 4 }
 0x6ce   : > { %v6287_v36 = vmax.f32 %v6285_v43, %v6286_v57 }
 0x6cf   : > { %v6308_v39 = vmax.f32 %v6306_v58, %v6307_v62 }
 0x6d0   : > { %v6288_v30 = vrot.slane %v6287_v36, 2 }
 0x6d1   : > { %v6309_v10 = vrot.slane %v6308_v39, 2 }
 0x6d2   : > { %v6289_v63 = vmax.f32 %v6287_v36, %v6288_v30 }
 0x6d3   : > { %v6310_v40 = vmax.f32 %v6308_v39, %v6309_v10 }
 0x6d4   : > { %v6290_v12 = vrot.slane %v6289_v63, 1 }
 0x6d5   : > { %v6311_v14 = vrot.slane %v6310_v40, 1 }
 0x6d6   : > { %v6291_v34 = vmax.f32 %v6289_v63, %v6290_v12 }
 0x6d7   : > { %v6312_v61 = vmax.f32 %v6310_v40, %v6311_v14 }
 0x6d8   : > { %v6341_v42 = vadd.f32 %v9696_v45, %v6291_v34 }
 0x6d9   : > { %v6342_v6 = vadd.f32 %v9700_v25, %v6312_v61 }
 0x6db   : > { %v6369_v0 = vcombine.low %v6341_v42, %v6342_v6 }
 0x6dd   : > { %v6383_v47 = vrot.slane %v6369_v0, %v9592_v3 }
 0x6df   : > { %v6384_v37 = vcombine.low %v6376_v1, %v6383_v47 }
 0x6e1   : > { %v6387_v60 = vrot.slane %v6384_v37, 7 }
 0x6e3   : > { %v6388_v13 = vsel %vm1204_vm2, %v6387_v60, %v6367_v15 }
 0x6e4   : > { %v6389_v45 = vsel %vm4597_vm3, %v6387_v60, %v6388_v13 }
 0x6e5   : > { %v6390_v28 = vsel %vm4599_vm4, %v6387_v60, %v6389_v45 }
 0x6e6   : > { %v6391_v3 = vsel %vm4601_vm5, %v6387_v60, %v6390_v28 }
 0x6e7   : > { %6393 = vst [vmem:[%s9679_s29 + $0x8] sm:$0xff] %v6391_v3 }
 0x6e8   : > { %7668 = shalt.err (!%p7665_p11)
}
 0x6e9   : > { %s7669_s12 = scalar_lea.hbm %s9748_s6, 256  ;;  %s7673_s18 = scalar_lea.hbm %s9804_s10, 512 }
 0x6ea   : > { %p7670_p13 = scmp.ne.s32.totalorder %s9748_s6, %s7669_s12  ;;  %p7674_p6 = scmp.lt.u32.totalorder %s9748_s6, %s9804_s10 }
 0x6eb   : > { %p7675_p9 = scmp.lt.u32.totalorder %s7673_s18, %s7669_s12  ;;  %p7677_p12 = scmp.lt.u32.totalorder %s7669_s12, %s9748_s6 }
 0x6ec   : > { %p7671_p5 = pnand %p7670_p13, %p10218_p1 }
 0x6ed   : > { %p7676_p10 = por %p7675_p9, %p7674_p6 }
 0x6ee   : > { %p7672_p0 = pneg %p7671_p5 }
 0x6ef   : > { %p7678_p2 = por %p7677_p12, %p7676_p10 }
 0x6f1   : > { %p7679_p3 = pnand %p7678_p2, %p7672_p0 }
 0x6f3   : > { %7682 = shalt.err (!%p7679_p3)
}
 0x6f4   : > { %7288 = dma.vmem_to_hbm [thread:$0]  (%p10218_p1), %s9750_s19, 256, %s9748_s6, %s6395_s17  }
 0x6f5 PF: > { %s10219_s11 = sld [smem:[#allocation12_spill]]  ;;  %s10220_s27 = sld [smem:[#allocation16_spill]] }
 0x6f6   : > { %p7310_p4 = scmp.ge.s32.totalorder %s7725_s16, 2 }
 0x6fb   : > { %s6421_s30 = sand.u32 1, %s10219_s11   ;;  %p10221_p7 = scmp.ne.s32.totalorder %s10220_s27, 0 }
 0x6fc   : > { %s6422_s13 = scalar_lea.sflag [#allocation4], %s6421_s30 }
 0x6fd   : > { %p7301_p8 = pnand %p7310_p4, %p10221_p7 }
 0x6ff   : > { %7708 = dma.done.wait (!%p7301_p8), %s6422_s13, 256  }
 0x700   : > { %7710 = vsyncadd (!%p7301_p8), %s6422_s13, 4294967040  ;;  %s10222_s16 = sld [smem:[#allocation14_spill]]  ;;  %s10223_s15 = sld [smem:[#allocation13_spill]] }
 0x701   : > { %s10224_s28 = sld [smem:[#allocation15_spill]]  ;;  %s10225_s13 = smov %s7717_s14 }
 0x706   : > { %p22_p11 = scmp.ge.s32.totalorder %s10222_s16, 4   ;;  %s10226_s14 = smov %s10223_s15 }
 0x707   : > { %s10227_s15 = smov %s10224_s28 }
 0x708   :  { %24 = sbr.rel (!%p22_p11) target bundleno = 7 (0x7), region = 108 }
 0x70f   :  { %6427 = vsyncpa [#allocation3], 1 }
 0x710   :  { %6429 = vsyncpa [#allocation3 + $0x1], 1 }
 0x711   :  { %6430 = vsyncpa [#allocation6], 1 }
 0x712   :  { %6431 = vsyncpa [#allocation4], 1 }
 0x713   :  { %6433 = vsyncpa [#allocation4 + $0x1], 1 }

</bundles_post_ra>
